<compile_context>
chip_gen: v5e
topology: v5e:2x2
jax: 0.10.0
libtpu: 0.0.40
codegen_flags: <defaults>
</compile_context>

<pallas_src>
import jax
import jax.numpy as jnp
from jax import lax
from jax.experimental import pallas as pl
from jax.experimental.pallas import tpu as pltpu

# ---- stand-in for the PyTorch `config` module ----
GRAPH_VECTOR_SIZE = 8      # config.graph_vector_size
ENTITY_SIZE = 10           # config.entity_size
RELATION_SIZE = 5          # config.relation_size
NEG_INF = -1.0e12


# ----------------------------------------------------------------------------
# Kernel 1: graph_stat_attention — single invocation over all B*T tokens.
#   ht_ref   : (N, M, 2G)  masked [head | tail] embeddings, N = B*T
#   rel_ref  : (N, M, G)   masked relation embeddings
#   bmask_ref: (N, M)      1.0 == masked triple (softmax -inf)
#   wht_ref  : (2G, G)     stacked [Wh^T ; Wt^T]
#   wr_ref   : (G, G)      Wr^T
#   out_ref  : (N, 2G)
# ----------------------------------------------------------------------------
def _graph_attn_kernel(ht_ref, rel_ref, bmask_ref, wht_ref, wr_ref, out_ref):
    N, M, G2 = ht_ref.shape
    G = wr_ref.shape[0]
    ht = ht_ref[...]                                      # (N, M, 2G)
    ht2 = ht.reshape(N * M, G2)
    r2 = rel_ref[...].reshape(N * M, G)
    # one K=2G dot replaces the two K=G head/tail dots
    proj = jnp.tanh(jnp.dot(ht2, wht_ref[...], preferred_element_type=jnp.float32))
    rel = jnp.dot(r2, wr_ref[...], preferred_element_type=jnp.float32)
    beta = jnp.sum((rel * proj).reshape(N, M, G), axis=-1)   # (N, M)
    bmask = bmask_ref[...]
    beta = jnp.where(bmask != 0.0, NEG_INF, beta)
    beta = beta - jnp.max(beta, axis=-1, keepdims=True)
    e = jnp.exp(beta)
    alpha = e / jnp.sum(e, axis=-1, keepdims=True)           # (N, M)
    out_ref[...] = jnp.sum(alpha[:, :, None] * ht, axis=1)   # (N, 2G)


def graph_stat_attention(ht_cat, rel, bmask, w_ht, w_r):
    N, _, G2 = ht_cat.shape
    # no grid: a single invocation, whole (tiny) arrays resident in VMEM
    return pl.pallas_call(
        _graph_attn_kernel,
        out_shape=jax.ShapeDtypeStruct((N, G2), jnp.float32),
    )(ht_cat, rel, bmask, w_ht, w_r)


# ----------------------------------------------------------------------------
# Kernel 2: one biLSTM layer (forward + backward direction fused), single
# invocation.  Input projections x @ W_ih + b are precomputed outside.
#   xg_f_ref / xg_b_ref : (T, B, 4H)  precomputed input gates per direction
#   m_ref               : (T, B, 1)   1.0 == valid timestep
#   whh_f_ref / whh_b_ref: (H, 4H)
#   out_f_ref / out_b_ref: (T, B, H)
#   hn_ref / cn_ref      : (2, B, H)  final states [fwd, bwd]
# ----------------------------------------------------------------------------
def _bilstm_layer_kernel(xg_f_ref, xg_b_ref, m_ref, whh_f_ref, whh_b_ref,
                         out_f_ref, out_b_ref, hn_ref, cn_ref):
    T = xg_f_ref.shape[0]
    B = xg_f_ref.shape[1]
    H = whh_f_ref.shape[0]

    def run_dir(xg_ref, whh, out_ref, reverse):
        h = jnp.zeros((B, H), jnp.float32)
        c = jnp.zeros((B, H), jnp.float32)
        # T is a static trace-time constant; the fully unrolled recurrence
        # gives the scheduler full visibility (only h @ W_hh on the serial path).
        # TODO(synk): for production-scale T, switch to lax.fori_loop(unroll=k).
        order = range(T - 1, -1, -1) if reverse else range(T)
        for t in order:
            xg = xg_ref[t]                    # (B, 4H) — input proj hoisted out
            m = m_ref[t]                      # (B, 1)
            gates = xg + jnp.dot(h, whh, preferred_element_type=jnp.float32)
            i = jax.nn.sigmoid(gates[:, 0:H])
            f = jax.nn.sigmoid(gates[:, H:2 * H])
            g = jnp.tanh(gates[:, 2 * H:3 * H])
            o = jax.nn.sigmoid(gates[:, 3 * H:4 * H])
            c_new = f * c + i * g
            h_new = o * jnp.tanh(c_new)
            # pack_padded_sequence semantics: hold state on pads, emit zeros
            out_ref[t] = m * h_new
            h = m * h_new + (1.0 - m) * h
            c = m * c_new + (1.0 - m) * c
        return h, c

    h_f, c_f = run_dir(xg_f_ref, whh_f_ref[...], out_f_ref, reverse=False)
    h_b, c_b = run_dir(xg_b_ref, whh_b_ref[...], out_b_ref, reverse=True)
    # final states written exactly once (no per-step writeback)
    hn_ref[0] = h_f
    hn_ref[1] = h_b
    cn_ref[0] = c_f
    cn_ref[1] = c_b


def bilstm_layer(xg_f, xg_b, m_tm, w_hh_f, w_hh_b):
    T, B, _ = xg_f.shape
    H = w_hh_f.shape[0]
    return pl.pallas_call(
        _bilstm_layer_kernel,
        out_shape=(jax.ShapeDtypeStruct((T, B, H), jnp.float32),   # out fwd
                   jax.ShapeDtypeStruct((T, B, H), jnp.float32),   # out bwd
                   jax.ShapeDtypeStruct((2, B, H), jnp.float32),   # h_n [f,b]
                   jax.ShapeDtypeStruct((2, B, H), jnp.float32)),  # c_n [f,b]
    )(xg_f, xg_b, m_tm, w_hh_f, w_hh_b)


# ----------------------------------------------------------------------------
# Kernel 3: linear_trans + gated self-attention (per batch element, grid=(B,)
# marked "parallel" so v7x's two TensorCores split the batch).
# Concat of [q | context] is avoided by splitting the update/gate weights.
# ----------------------------------------------------------------------------
def _gated_attn_kernel(q_ref, mask_ref, wtr_ref, btr_ref,
                       wu_top_ref, wu_bot_ref, wg_top_ref, wg_bot_ref, out_ref):
    q = q_ref[0]                                                    # (T, D)
    mem = jnp.dot(q, wtr_ref[...], preferred_element_type=jnp.float32) + btr_ref[...]
    energies = lax.dot_general(q, mem, (((1,), (1,)), ((), ())),
                               preferred_element_type=jnp.float32)  # (T, T)
    kmask = mask_ref[0]                                             # (1, T) 1==valid
    energies = jnp.where(kmask == 0.0, NEG_INF, energies)
    energies = energies - jnp.max(energies, axis=-1, keepdims=True)
    e = jnp.exp(energies)
    scores = e / jnp.sum(e, axis=-1, keepdims=True)
    context = jnp.dot(scores, q, preferred_element_type=jnp.float32)    # (T, D)
    # [q | context] @ W  ==  q @ W_top + context @ W_bot  (no (T,2D) concat copy)
    f_t = jnp.tanh(jnp.dot(q, wu_top_ref[...], preferred_element_type=jnp.float32)
                   + jnp.dot(context, wu_bot_ref[...], preferred_element_type=jnp.float32))
    g_t = jax.nn.sigmoid(jnp.dot(q, wg_top_ref[...], preferred_element_type=jnp.float32)
                         + jnp.dot(context, wg_bot_ref[...], preferred_element_type=jnp.float32))
    out_ref[0] = g_t * f_t + (1.0 - g_t) * q


def gated_self_attn(outputs, key_mask, w_trans_t, b_trans,
                    wu_top, wu_bot, wg_top, wg_bot):
    B, T, D = outputs.shape
    # TODO(synk): at production sequence lengths, tile this flash-style instead
    # of materializing the full (T, T) energies per batch element.
    return pl.pallas_call(
        _gated_attn_kernel,
        out_shape=jax.ShapeDtypeStruct((B, T, D), jnp.float32),
        grid_spec=pltpu.PrefetchScalarGridSpec(
            num_scalar_prefetch=0,
            grid=(B,),
            in_specs=[pl.BlockSpec((1, T, D), lambda b: (b, 0, 0)),
                      pl.BlockSpec((1, 1, T), lambda b: (b, 0, 0)),
                      pl.BlockSpec((D, D), lambda b: (0, 0)),
                      pl.BlockSpec((1, D), lambda b: (0, 0)),
                      pl.BlockSpec((D, D), lambda b: (0, 0)),
                      pl.BlockSpec((D, D), lambda b: (0, 0)),
                      pl.BlockSpec((D, D), lambda b: (0, 0)),
                      pl.BlockSpec((D, D), lambda b: (0, 0))],
            out_specs=pl.BlockSpec((1, T, D), lambda b: (b, 0, 0))),
        compiler_params=pltpu.CompilerParams(dimension_semantics=("parallel",)),
    )(outputs, key_mask, w_trans_t, b_trans, wu_top, wu_bot, wg_top, wg_bot)


# ----------------------------------------------------------------------------
# Parameters (deterministic init; synthetic, not a checkpoint load)
# ----------------------------------------------------------------------------
def init_encoder_params(key, vocab_size, embedding_size, hidden_size, num_layers):
    E, H, G = embedding_size, hidden_size, GRAPH_VECTOR_SIZE
    lstm_in = E + 3 + 2 * G
    ks = iter(jax.random.split(key, 64))

    def rnd(shape, scale=0.1):
        return scale * jax.random.normal(next(ks), shape, dtype=jnp.float32)

    params = {
        "embedding": rnd((vocab_size, E), 1.0),
        "tag_embedding": rnd((3, 3), 1.0),
        "entity_embedding": rnd((ENTITY_SIZE, G), 1.0),
        "relation_embedding": rnd((RELATION_SIZE + 1, G), 1.0),
        # Linear weights are stored pre-transposed (y = x @ W^T in torch).
        "head_graph_wT": rnd((G, G)),
        "rela_graph_wT": rnd((G, G)),
        "tail_graph_wT": rnd((G, G)),
        "linear_trans_wT": rnd((2 * H, 2 * H)),
        "linear_trans_b": rnd((1, 2 * H)),
        "update_layer_wT": rnd((4 * H, 2 * H)),
        "gate_wT": rnd((4 * H, 2 * H)),
        "lstm": [],
    }
    for layer in range(num_layers):
        din = lstm_in if layer == 0 else 2 * H
        layer_params = []
        for _direction in range(2):                      # fwd, bwd
            layer_params.append({
                "w_ih_T": rnd((din, 4 * H)),
                "w_hh_T": rnd((H, 4 * H)),
                "b": rnd((1, 4 * H)),                    # b_ih + b_hh folded
            })
        params["lstm"].append(layer_params)
    return params


# ----------------------------------------------------------------------------
# Encoder forward
# ----------------------------------------------------------------------------
def encoder_forward(params, src_seq, src_len, tag_seq, cs_seq, mask_seq, embed_mask):
    B, T = src_seq.shape
    H = params["lstm"][0][0]["w_hh_T"].shape[0]
    G = GRAPH_VECTOR_SIZE

    # embedding gathers + embedding zero-masking: plain-JAX glue (XLA fuses it)
    embedded = jnp.take(params["embedding"], src_seq, axis=0)            # (B,T,E)
    tag_embedded = jnp.take(params["tag_embedding"], tag_seq, axis=0)    # (B,T,3)
    head_emb = jnp.take(params["entity_embedding"], cs_seq[..., 0], axis=0)
    tail_emb = jnp.take(params["entity_embedding"], cs_seq[..., 2], axis=0)
    rela_emb = jnp.take(params["relation_embedding"], cs_seq[..., 1], axis=0)
    keep = 1.0 - embed_mask.astype(jnp.float32)                          # (B,T,M,1)
    ht_cat = jnp.concatenate([head_emb * keep, tail_emb * keep], axis=-1)  # (B,T,M,2G)
    M = ht_cat.shape[2]
    ht_cat = ht_cat.reshape(B * T, M, 2 * G)
    rel = (rela_emb * keep).reshape(B * T, M, G)
    bmask = mask_seq.astype(jnp.float32).reshape(B * T, M)
    w_ht = jnp.concatenate([params["head_graph_wT"], params["tail_graph_wT"]], axis=0)

    com_embedded = graph_stat_attention(ht_cat, rel, bmask, w_ht,
                                        params["rela_graph_wT"]).reshape(B, T, 2 * G)

    x = jnp.concatenate([embedded, tag_embedded, com_embedded], axis=2)  # (B,T,Din)

    # pack_padded_sequence equivalent: length mask, masked recurrence
    len_mask = (jnp.arange(T)[None, :] < src_len[:, None]).astype(jnp.float32)
    x_tm = jnp.transpose(x, (1, 0, 2))                                   # (T,B,Din)
    m_tm = jnp.transpose(len_mask)[:, :, None]                           # (T,B,1)

    h_list, c_list = [], []
    layer_in = x_tm
    for layer_p in params["lstm"]:
        # hoisted input projections (one big matmul per direction, off the
        # recurrent critical path)
        xg_f = jnp.einsum("tbd,dh->tbh", layer_in, layer_p[0]["w_ih_T"]) + layer_p[0]["b"]
        xg_b = jnp.einsum("tbd,dh->tbh", layer_in, layer_p[1]["w_ih_T"]) + layer_p[1]["b"]
        out_f, out_b, hn, cn = bilstm_layer(xg_f, xg_b, m_tm,
                                            layer_p[0]["w_hh_T"], layer_p[1]["w_hh_T"])
        layer_in = jnp.concatenate([out_f, out_b], axis=-1)              # (T,B,2H)
        h_list.append(hn)
        c_list.append(cn)
        # TODO(synk): nn.LSTM inter-layer dropout is training-only; eval semantics here.

    outputs = jnp.transpose(layer_in, (1, 0, 2))                         # (B,T,2H)

    attn_mask = jnp.sign(src_seq).astype(jnp.float32)[:, None, :]        # (B,1,T)
    wu = params["update_layer_wT"]
    wg = params["gate_wT"]
    outputs = gated_self_attn(outputs, attn_mask,
                              params["linear_trans_wT"], params["linear_trans_b"],
                              wu[:2 * H], wu[2 * H:], wg[:2 * H], wg[2 * H:])

    # states: (num_layers*2, B, H) ordered [l0_fwd, l0_bwd, l1_fwd, l1_bwd]
    h_all = jnp.stack(h_list, axis=0)                                    # (L,2,B,H)
    c_all = jnp.stack(c_list, axis=0)
    h = jnp.concatenate([h_all[:, 0], h_all[:, 1]], axis=-1)             # (L,B,2H)
    c = jnp.concatenate([c_all[:, 0], c_all[:, 1]], axis=-1)             # (L,B,2H)
    return outputs, (h, c)


# ----------------------------------------------------------------------------
if __name__ == "__main__":
    B, T, M = 2, 8, 4
    vocab_size, E, H = 30, 16, 32
    num_layers = 2

    key = jax.random.PRNGKey(0)
    k_param, k1, k2, k3, k4, k5 = jax.random.split(key, 6)
    params = init_encoder_params(k_param, vocab_size, E, H, num_layers)

    src_len = jnp.array([T, 5], dtype=jnp.int32)
    valid = jnp.arange(T)[None, :] < src_len[:, None]
    src_seq = jax.random.randint(k1, (B, T), 1, vocab_size, dtype=jnp.int32)
    src_seq = jnp.where(valid, src_seq, 0)                   # 0 == pad token
    tag_seq = jax.random.randint(k2, (B, T), 0, 3, dtype=jnp.int32)
    heads = jax.random.randint(k3, (B, T, M, 1), 0, ENTITY_SIZE, dtype=jnp.int32)
    rels = jax.random.randint(k4, (B, T, M, 1), 0, RELATION_SIZE + 1, dtype=jnp.int32)
    tails = jax.random.randint(k5, (B, T, M, 1), 0, ENTITY_SIZE, dtype=jnp.int32)
    cs_seq = jnp.concatenate([heads, rels, tails], axis=-1)  # (B,T,M,3)
    mask_seq = jax.random.bernoulli(k1, 0.3, (B, T, M)).astype(jnp.int32)
    mask_seq = mask_seq.at[:, :, 0].set(0)                   # keep >=1 valid triple
    embed_mask = mask_seq[..., None].astype(bool)            # (B,T,M,1)

    encoder_jit = jax.jit(encoder_forward)
    outputs, (h, c) = encoder_jit(params, src_seq, src_len, tag_seq,
                                  cs_seq, mask_seq, embed_mask)
    jax.block_until_ready((outputs, h, c))
    assert outputs.shape == (B, T, 2 * H)
    assert h.shape == (2, B, 2 * H) and c.shape == (2, B, 2 * H)
    print("KERNEL_OK")
</pallas_src>

<mosaic_0001>
module attributes {stable_mosaic.version = 11 : i64} {
  func.func @_graph_attn_kernel(%arg0: memref<16x4x16xf32, #tpu.memory_space<vmem>>, %arg1: memref<16x4x8xf32, #tpu.memory_space<vmem>>, %arg2: memref<16x4xf32, #tpu.memory_space<vmem>>, %arg3: memref<16x8xf32, #tpu.memory_space<vmem>>, %arg4: memref<8x8xf32, #tpu.memory_space<vmem>>, %arg5: memref<16x16xf32, #tpu.memory_space<vmem>>) attributes {dimension_semantics = [], scalar_prefetch = 0 : i64, scratch_operands = 0 : i64, tpu.core_type = #tpu.core_type<tc>} {
    %c0 = arith.constant 0 : index
    %c0_0 = arith.constant 0 : index
    %c0_1 = arith.constant 0 : index
    %0 = vector.load %arg0[%c0, %c0_0, %c0_1] : memref<16x4x16xf32, #tpu.memory_space<vmem>>, vector<16x4x16xf32>
    %1 = vector.shape_cast %0 : vector<16x4x16xf32> to vector<64x16xf32>
    %c0_2 = arith.constant 0 : index
    %c0_3 = arith.constant 0 : index
    %c0_4 = arith.constant 0 : index
    %2 = vector.load %arg1[%c0_2, %c0_3, %c0_4] : memref<16x4x8xf32, #tpu.memory_space<vmem>>, vector<16x4x8xf32>
    %3 = vector.shape_cast %2 : vector<16x4x8xf32> to vector<64x8xf32>
    %c0_5 = arith.constant 0 : index
    %c0_6 = arith.constant 0 : index
    %4 = vector.load %arg3[%c0_5, %c0_6] : memref<16x8xf32, #tpu.memory_space<vmem>>, vector<16x8xf32>
    %cst = arith.constant dense<0.000000e+00> : vector<64x8xf32>
    %5 = tpu.matmul %1, %4, %cst {dimension_numbers = #tpu.dot_dimension_numbers<[1], [0], [0], [1], [0, 0, 1, 1], [], []>} : vector<64x16xf32>, vector<16x8xf32>, vector<64x8xf32> -> vector<64x8xf32>
    %6 = math.tanh %5 : vector<64x8xf32>
    %c0_7 = arith.constant 0 : index
    %c0_8 = arith.constant 0 : index
    %7 = vector.load %arg4[%c0_7, %c0_8] : memref<8x8xf32, #tpu.memory_space<vmem>>, vector<8x8xf32>
    %cst_9 = arith.constant dense<0.000000e+00> : vector<64x8xf32>
    %8 = tpu.matmul %3, %7, %cst_9 {dimension_numbers = #tpu.dot_dimension_numbers<[1], [0], [0], [1], [0, 0, 1, 1], [], []>} : vector<64x8xf32>, vector<8x8xf32>, vector<64x8xf32> -> vector<64x8xf32>
    %9 = arith.mulf %8, %6 : vector<64x8xf32>
    %10 = vector.shape_cast %9 : vector<64x8xf32> to vector<16x4x8xf32>
    %cst_10 = arith.constant dense<0.000000e+00> : vector<16x4xf32>
    %11 = vector.multi_reduction <add>, %10, %cst_10 [2] : vector<16x4x8xf32> to vector<16x4xf32>
    %c0_11 = arith.constant 0 : index
    %c0_12 = arith.constant 0 : index
    %12 = vector.load %arg2[%c0_11, %c0_12] : memref<16x4xf32, #tpu.memory_space<vmem>>, vector<16x4xf32>
    %cst_13 = arith.constant 0.000000e+00 : f32
    %13 = vector.broadcast %cst_13 : f32 to vector<16x4xf32>
    %14 = arith.cmpf one, %12, %13 : vector<16x4xf32>
    %cst_14 = arith.constant -9.99999995E+11 : f32
    %15 = vector.broadcast %cst_14 : f32 to vector<16x4xf32>
    %16 = arith.select %14, %15, %11 : vector<16x4xi1>, vector<16x4xf32>
    %cst_15 = arith.constant dense<0xFF800000> : vector<16xf32>
    %17 = vector.multi_reduction <maximumf>, %16, %cst_15 [1] : vector<16x4xf32> to vector<16xf32>
    %18 = vector.shape_cast %17 : vector<16xf32> to vector<16x1xf32>
    %19 = vector.broadcast %18 : vector<16x1xf32> to vector<16x4xf32>
    %20 = arith.subf %16, %19 : vector<16x4xf32>
    %21 = math.exp %20 : vector<16x4xf32>
    %cst_16 = arith.constant dense<0.000000e+00> : vector<16xf32>
    %22 = vector.multi_reduction <add>, %21, %cst_16 [1] : vector<16x4xf32> to vector<16xf32>
    %23 = vector.shape_cast %22 : vector<16xf32> to vector<16x1xf32>
    %24 = vector.broadcast %23 : vector<16x1xf32> to vector<16x4xf32>
    %25 = arith.divf %21, %24 : vector<16x4xf32>
    %26 = vector.shape_cast %25 : vector<16x4xf32> to vector<16x4x1xf32>
    %27 = vector.broadcast %26 : vector<16x4x1xf32> to vector<16x4x16xf32>
    %28 = arith.mulf %27, %0 : vector<16x4x16xf32>
    %cst_17 = arith.constant dense<0.000000e+00> : vector<16x16xf32>
    %29 = vector.multi_reduction <add>, %28, %cst_17 [1] : vector<16x4x16xf32> to vector<16x16xf32>
    %c0_18 = arith.constant 0 : index
    %c0_19 = arith.constant 0 : index
    %30 = vector.load %arg5[%c0_18, %c0_19] : memref<16x16xf32, #tpu.memory_space<vmem>>, vector<16x16xf32>
    tpu.vector_store %arg5[%c0_18, %c0_19], %29 {strides = array<i32>} : memref<16x16xf32, #tpu.memory_space<vmem>>, vector<16x16xf32>,
    return
  }
}

module attributes {stable_mosaic.version = 11 : i64} {
  func.func @_gated_attn_kernel(%arg0: i32, %arg1: memref<1x8x64xf32, #tpu.memory_space<vmem>>, %arg2: memref<1x1x8xf32, #tpu.memory_space<vmem>>, %arg3: memref<64x64xf32, #tpu.memory_space<vmem>>, %arg4: memref<1x64xf32, #tpu.memory_space<vmem>>, %arg5: memref<64x64xf32, #tpu.memory_space<vmem>>, %arg6: memref<64x64xf32, #tpu.memory_space<vmem>>, %arg7: memref<64x64xf32, #tpu.memory_space<vmem>>, %arg8: memref<64x64xf32, #tpu.memory_space<vmem>>, %arg9: memref<1x8x64xf32, #tpu.memory_space<vmem>>) attributes {dimension_semantics = [#tpu.dimension_semantics<parallel>], iteration_bounds = array<i64: 2>, scalar_prefetch = 0 : i64, scratch_operands = 0 : i64, tpu.core_type = #tpu.core_type<tc>, window_params = [{transform_indices = @transform_0, window_bounds = array<i64: 1, 8, 64>}, {transform_indices = @transform_1, window_bounds = array<i64: 1, 1, 8>}, {pipeline_mode = #tpu.pipeline_mode<synchronous>, transform_indices = @transform_2, window_bounds = array<i64: 64, 64>}, {pipeline_mode = #tpu.pipeline_mode<synchronous>, transform_indices = @transform_3, window_bounds = array<i64: 1, 64>}, {pipeline_mode = #tpu.pipeline_mode<synchronous>, transform_indices = @transform_4, window_bounds = array<i64: 64, 64>}, {pipeline_mode = #tpu.pipeline_mode<synchronous>, transform_indices = @transform_5, window_bounds = array<i64: 64, 64>}, {pipeline_mode = #tpu.pipeline_mode<synchronous>, transform_indices = @transform_6, window_bounds = array<i64: 64, 64>}, {pipeline_mode = #tpu.pipeline_mode<synchronous>, transform_indices = @transform_7, window_bounds = array<i64: 64, 64>}, {transform_indices = @transform_8, window_bounds = array<i64: 1, 8, 64>}]} {
    %c0 = arith.constant 0 : index
    %c0_0 = arith.constant 0 : index
    %c0_1 = arith.constant 0 : index
    %0 = vector.load %arg1[%c0, %c0_0, %c0_1] : memref<1x8x64xf32, #tpu.memory_space<vmem>>, vector<1x8x64xf32>
    %1 = vector.shape_cast %0 : vector<1x8x64xf32> to vector<8x64xf32>
    %c0_2 = arith.constant 0 : index
    %c0_3 = arith.constant 0 : index
    %2 = vector.load %arg3[%c0_2, %c0_3] : memref<64x64xf32, #tpu.memory_space<vmem>>, vector<64x64xf32>
    %cst = arith.constant dense<0.000000e+00> : vector<8x64xf32>
    %3 = tpu.matmul %1, %2, %cst {dimension_numbers = #tpu.dot_dimension_numbers<[1], [0], [0], [1], [0, 0, 1, 1], [], []>} : vector<8x64xf32>, vector<64x64xf32>, vector<8x64xf32> -> vector<8x64xf32>
    %c0_4 = arith.constant 0 : index
    %c0_5 = arith.constant 0 : index
    %4 = vector.load %arg4[%c0_4, %c0_5] : memref<1x64xf32, #tpu.memory_space<vmem>>, vector<1x64xf32>
    %5 = vector.broadcast %4 : vector<1x64xf32> to vector<8x64xf32>
    %6 = arith.addf %3, %5 : vector<8x64xf32>
    %cst_6 = arith.constant dense<0.000000e+00> : vector<8x8xf32>
    %7 = tpu.matmul %1, %6, %cst_6 {dimension_numbers = #tpu.dot_dimension_numbers<[1], [1], [0], [0], [0, 0, 1, 0], [], []>} : vector<8x64xf32>, vector<8x64xf32>, vector<8x8xf32> -> vector<8x8xf32>
    %c0_7 = arith.constant 0 : index
    %c0_8 = arith.constant 0 : index
    %c0_9 = arith.constant 0 : index
    %8 = vector.load %arg2[%c0_7, %c0_8, %c0_9] : memref<1x1x8xf32, #tpu.memory_space<vmem>>, vector<1x1x8xf32>
    %9 = vector.shape_cast %8 : vector<1x1x8xf32> to vector<1x8xf32>
    %cst_10 = arith.constant 0.000000e+00 : f32
    %10 = vector.broadcast %cst_10 : f32 to vector<1x8xf32>
    %11 = arith.cmpf oeq, %9, %10 : vector<1x8xf32>
    %cst_11 = arith.constant -9.99999995E+11 : f32
    %12 = vector.shape_cast %11 : vector<1x8xi1> to vector<1x8xi1>
    %13 = vector.broadcast %12 : vector<1x8xi1> to vector<8x8xi1>
    %14 = vector.broadcast %cst_11 : f32 to vector<8x8xf32>
    %15 = arith.select %13, %14, %7 : vector<8x8xi1>, vector<8x8xf32>
    %cst_12 = arith.constant dense<0xFF800000> : vector<8xf32>
    %16 = vector.multi_reduction <maximumf>, %15, %cst_12 [1] : vector<8x8xf32> to vector<8xf32>
    %17 = vector.shape_cast %16 : vector<8xf32> to vector<8x1xf32>
    %18 = vector.broadcast %17 : vector<8x1xf32> to vector<8x8xf32>
    %19 = arith.subf %15, %18 : vector<8x8xf32>
    %20 = math.exp %19 : vector<8x8xf32>
    %cst_13 = arith.constant dense<0.000000e+00> : vector<8xf32>
    %21 = vector.multi_reduction <add>, %20, %cst_13 [1] : vector<8x8xf32> to vector<8xf32>
    %22 = vector.shape_cast %21 : vector<8xf32> to vector<8x1xf32>
    %23 = vector.broadcast %22 : vector<8x1xf32> to vector<8x8xf32>
    %24 = arith.divf %20, %23 : vector<8x8xf32>
    %cst_14 = arith.constant dense<0.000000e+00> : vector<8x64xf32>
    %25 = tpu.matmul %24, %1, %cst_14 {dimension_numbers = #tpu.dot_dimension_numbers<[1], [0], [0], [1], [0, 0, 1, 1], [], []>} : vector<8x8xf32>, vector<8x64xf32>, vector<8x64xf32> -> vector<8x64xf32>
    %c0_15 = arith.constant 0 : index
    %c0_16 = arith.constant 0 : index
    %26 = vector.load %arg5[%c0_15, %c0_16] : memref<64x64xf32, #tpu.memory_space<vmem>>, vector<64x64xf32>
    %cst_17 = arith.constant dense<0.000000e+00> : vector<8x64xf32>
    %27 = tpu.matmul %1, %26, %cst_17 {dimension_numbers = #tpu.dot_dimension_numbers<[1], [0], [0], [1], [0, 0, 1, 1], [], []>} : vector<8x64xf32>, vector<64x64xf32>, vector<8x64xf32> -> vector<8x64xf32>
    %c0_18 = arith.constant 0 : index
    %c0_19 = arith.constant 0 : index
    %28 = vector.load %arg6[%c0_18, %c0_19] : memref<64x64xf32, #tpu.memory_space<vmem>>, vector<64x64xf32>
    %cst_20 = arith.constant dense<0.000000e+00> : vector<8x64xf32>
    %29 = tpu.matmul %25, %28, %cst_20 {dimension_numbers = #tpu.dot_dimension_numbers<[1], [0], [0], [1], [0, 0, 1, 1], [], []>} : vector<8x64xf32>, vector<64x64xf32>, vector<8x64xf32> -> vector<8x64xf32>
    %30 = arith.addf %27, %29 : vector<8x64xf32>
    %31 = math.tanh %30 : vector<8x64xf32>
    %c0_21 = arith.constant 0 : index
    %c0_22 = arith.constant 0 : index
    %32 = vector.load %arg7[%c0_21, %c0_22] : memref<64x64xf32, #tpu.memory_space<vmem>>, vector<64x64xf32>
    %cst_23 = arith.constant dense<0.000000e+00> : vector<8x64xf32>
    %33 = tpu.matmul %1, %32, %cst_23 {dimension_numbers = #tpu.dot_dimension_numbers<[1], [0], [0], [1], [0, 0, 1, 1], [], []>} : vector<8x64xf32>, vector<64x64xf32>, vector<8x64xf32> -> vector<8x64xf32>
    %c0_24 = arith.constant 0 : index
    %c0_25 = arith.constant 0 : index
    %34 = vector.load %arg8[%c0_24, %c0_25] : memref<64x64xf32, #tpu.memory_space<vmem>>, vector<64x64xf32>
    %cst_26 = arith.constant dense<0.000000e+00> : vector<8x64xf32>
    %35 = tpu.matmul %25, %34, %cst_26 {dimension_numbers = #tpu.dot_dimension_numbers<[1], [0], [0], [1], [0, 0, 1, 1], [], []>} : vector<8x64xf32>, vector<64x64xf32>, vector<8x64xf32> -> vector<8x64xf32>
    %36 = arith.addf %33, %35 : vector<8x64xf32>
    %37 = arith.negf %36 : vector<8x64xf32>
    %38 = math.exp %37 : vector<8x64xf32>
    %cst_27 = arith.constant 1.000000e+00 : f32
    %39 = vector.broadcast %cst_27 : f32 to vector<8x64xf32>
    %40 = arith.addf %39, %38 : vector<8x64xf32>
    %41 = arith.divf %39, %40 : vector<8x64xf32>
    %42 = arith.mulf %41, %31 : vector<8x64xf32>
    %cst_28 = arith.constant 1.000000e+00 : f32
    %43 = vector.broadcast %cst_28 : f32 to vector<8x64xf32>
    %44 = arith.subf %43, %41 : vector<8x64xf32>
    %45 = arith.mulf %44, %1 : vector<8x64xf32>
    %46 = arith.addf %42, %45 : vector<8x64xf32>
    %c0_29 = arith.constant 0 : index
    %c0_30 = arith.constant 0 : index
    %c0_31 = arith.constant 0 : index
    %47 = vector.load %arg9[%c0_29, %c0_30, %c0_31] : memref<1x8x64xf32, #tpu.memory_space<vmem>>, vector<1x8x64xf32>
    %48 = vector.shape_cast %47 : vector<1x8x64xf32> to vector<8x64xf32>
    %49 = vector.shape_cast %46 : vector<8x64xf32> to vector<1x8x64xf32>
    tpu.vector_store %arg9[%c0_29, %c0_30, %c0_31], %49 {strides = array<i32>} : memref<1x8x64xf32, #tpu.memory_space<vmem>>, vector<1x8x64xf32>,
    return
  }
  func.func @transform_0(%arg0: i32) -> (i32, i32, i32) {
    %c0_i32 = arith.constant 0 : i32
    %c0_i32_0 = arith.constant 0 : i32
    %c0_i32_1 = arith.constant 0 : i32
    return %arg0, %c0_i32, %c0_i32_0 : i32, i32, i32
  }
  func.func @transform_1(%arg0: i32) -> (i32, i32, i32) {
    %c0_i32 = arith.constant 0 : i32
    %c0_i32_0 = arith.constant 0 : i32
    %c0_i32_1 = arith.constant 0 : i32
    return %arg0, %c0_i32, %c0_i32_0 : i32, i32, i32
  }
  func.func @transform_2(%arg0: i32) -> (i32, i32) {
    %c0_i32 = arith.constant 0 : i32
    %c0_i32_0 = arith.constant 0 : i32
    %c0_i32_1 = arith.constant 0 : i32
    return %c0_i32, %c0_i32_0 : i32, i32
  }
  func.func @transform_3(%arg0: i32) -> (i32, i32) {
    %c0_i32 = arith.constant 0 : i32
    %c0_i32_0 = arith.constant 0 : i32
    %c0_i32_1 = arith.constant 0 : i32
    return %c0_i32, %c0_i32_0 : i32, i32
  }
  func.func @transform_4(%arg0: i32) -> (i32, i32) {
    %c0_i32 = arith.constant 0 : i32
    %c0_i32_0 = arith.constant 0 : i32
    %c0_i32_1 = arith.constant 0 : i32
    return %c0_i32, %c0_i32_0 : i32, i32
  }
  func.func @transform_5(%arg0: i32) -> (i32, i32) {
    %c0_i32 = arith.constant 0 : i32
    %c0_i32_0 = arith.constant 0 : i32
    %c0_i32_1 = arith.constant 0 : i32
    return %c0_i32, %c0_i32_0 : i32, i32
  }
  func.func @transform_6(%arg0: i32) -> (i32, i32) {
    %c0_i32 = arith.constant 0 : i32
    %c0_i32_0 = arith.constant 0 : i32
    %c0_i32_1 = arith.constant 0 : i32
    return %c0_i32, %c0_i32_0 : i32, i32
  }
  func.func @transform_7(%arg0: i32) -> (i32, i32) {
    %c0_i32 = arith.constant 0 : i32
    %c0_i32_0 = arith.constant 0 : i32
    %c0_i32_1 = arith.constant 0 : i32
    return %c0_i32, %c0_i32_0 : i32, i32
  }
  func.func @transform_8(%arg0: i32) -> (i32, i32, i32) {
    %c0_i32 = arith.constant 0 : i32
    %c0_i32_0 = arith.constant 0 : i32
    %c0_i32_1 = arith.constant 0 : i32
    return %arg0, %c0_i32, %c0_i32_0 : i32, i32, i32
  }
}

module attributes {stable_mosaic.version = 11 : i64} {
  func.func @_bilstm_layer_kernel(%arg0: memref<8x2x128xf32, #tpu.memory_space<vmem>>, %arg1: memref<8x2x128xf32, #tpu.memory_space<vmem>>, %arg2: memref<8x2x1xf32, #tpu.memory_space<vmem>>, %arg3: memref<32x128xf32, #tpu.memory_space<vmem>>, %arg4: memref<32x128xf32, #tpu.memory_space<vmem>>, %arg5: memref<8x2x32xf32, #tpu.memory_space<vmem>>, %arg6: memref<8x2x32xf32, #tpu.memory_space<vmem>>, %arg7: memref<2x2x32xf32, #tpu.memory_space<vmem>>, %arg8: memref<2x2x32xf32, #tpu.memory_space<vmem>>) attributes {dimension_semantics = [], scalar_prefetch = 0 : i64, scratch_operands = 0 : i64, tpu.core_type = #tpu.core_type<tc>} {
    %c0 = arith.constant 0 : index
    %c0_0 = arith.constant 0 : index
    %0 = vector.load %arg3[%c0, %c0_0] : memref<32x128xf32, #tpu.memory_space<vmem>>, vector<32x128xf32>
    %cst = arith.constant 0.000000e+00 : f32
    %1 = vector.broadcast %cst : f32 to vector<2x32xf32>
    %cst_1 = arith.constant 0.000000e+00 : f32
    %2 = vector.broadcast %cst_1 : f32 to vector<2x32xf32>
    %c0_2 = arith.constant 0 : index
    %c0_3 = arith.constant 0 : index
    %c0_4 = arith.constant 0 : index
    %3 = vector.load %arg0[%c0_2, %c0_3, %c0_4] : memref<8x2x128xf32, #tpu.memory_space<vmem>>, vector<1x2x128xf32>
    %4 = vector.shape_cast %3 : vector<1x2x128xf32> to vector<2x128xf32>
    %c0_5 = arith.constant 0 : index
    %c0_6 = arith.constant 0 : index
    %c0_7 = arith.constant 0 : index
    %5 = vector.load %arg2[%c0_5, %c0_6, %c0_7] : memref<8x2x1xf32, #tpu.memory_space<vmem>>, vector<1x2x1xf32>
    %6 = vector.shape_cast %5 : vector<1x2x1xf32> to vector<2x1xf32>
    %cst_8 = arith.constant dense<0.000000e+00> : vector<2x128xf32>
    %7 = tpu.matmul %1, %0, %cst_8 {dimension_numbers = #tpu.dot_dimension_numbers<[1], [0], [0], [1], [0, 0, 1, 1], [], []>} : vector<2x32xf32>, vector<32x128xf32>, vector<2x128xf32> -> vector<2x128xf32>
    %8 = arith.addf %4, %7 : vector<2x128xf32>
    %9 = vector.extract_strided_slice %8 {offsets = [0, 0], sizes = [2, 32], strides = [1, 1]} : vector<2x128xf32> to vector<2x32xf32>
    %10 = arith.negf %9 : vector<2x32xf32>
    %11 = math.exp %10 : vector<2x32xf32>
    %cst_9 = arith.constant 1.000000e+00 : f32
    %12 = vector.broadcast %cst_9 : f32 to vector<2x32xf32>
    %13 = arith.addf %12, %11 : vector<2x32xf32>
    %14 = arith.divf %12, %13 : vector<2x32xf32>
    %15 = vector.extract_strided_slice %8 {offsets = [0, 32], sizes = [2, 32], strides = [1, 1]} : vector<2x128xf32> to vector<2x32xf32>
    %16 = arith.negf %15 : vector<2x32xf32>
    %17 = math.exp %16 : vector<2x32xf32>
    %cst_10 = arith.constant 1.000000e+00 : f32
    %18 = vector.broadcast %cst_10 : f32 to vector<2x32xf32>
    %19 = arith.addf %18, %17 : vector<2x32xf32>
    %20 = arith.divf %18, %19 : vector<2x32xf32>
    %21 = vector.extract_strided_slice %8 {offsets = [0, 64], sizes = [2, 32], strides = [1, 1]} : vector<2x128xf32> to vector<2x32xf32>
    %22 = math.tanh %21 : vector<2x32xf32>
    %23 = vector.extract_strided_slice %8 {offsets = [0, 96], sizes = [2, 32], strides = [1, 1]} : vector<2x128xf32> to vector<2x32xf32>
    %24 = arith.negf %23 : vector<2x32xf32>
    %25 = math.exp %24 : vector<2x32xf32>
    %cst_11 = arith.constant 1.000000e+00 : f32
    %26 = vector.broadcast %cst_11 : f32 to vector<2x32xf32>
    %27 = arith.addf %26, %25 : vector<2x32xf32>
    %28 = arith.divf %26, %27 : vector<2x32xf32>
    %29 = arith.mulf %20, %2 : vector<2x32xf32>
    %30 = arith.mulf %14, %22 : vector<2x32xf32>
    %31 = arith.addf %29, %30 : vector<2x32xf32>
    %32 = math.tanh %31 : vector<2x32xf32>
    %33 = arith.mulf %28, %32 : vector<2x32xf32>
    %34 = vector.broadcast %6 : vector<2x1xf32> to vector<2x32xf32>
    %35 = arith.mulf %34, %33 : vector<2x32xf32>
    %c0_12 = arith.constant 0 : index
    %c0_13 = arith.constant 0 : index
    %c0_14 = arith.constant 0 : index
    %36 = vector.load %arg5[%c0_12, %c0_13, %c0_14] : memref<8x2x32xf32, #tpu.memory_space<vmem>>, vector<1x2x32xf32>
    %37 = vector.shape_cast %36 : vector<1x2x32xf32> to vector<2x32xf32>
    %38 = vector.shape_cast %35 : vector<2x32xf32> to vector<1x2x32xf32>
    tpu.vector_store %arg5[%c0_12, %c0_13, %c0_14], %38 {strides = array<i32>} : memref<8x2x32xf32, #tpu.memory_space<vmem>>, vector<1x2x32xf32>,
    %39 = vector.broadcast %6 : vector<2x1xf32> to vector<2x32xf32>
    %40 = arith.mulf %39, %33 : vector<2x32xf32>
    %cst_15 = arith.constant 1.000000e+00 : f32
    %41 = vector.broadcast %cst_15 : f32 to vector<2x1xf32>
    %42 = arith.subf %41, %6 : vector<2x1xf32>
    %43 = vector.broadcast %42 : vector<2x1xf32> to vector<2x32xf32>
    %44 = arith.mulf %43, %1 : vector<2x32xf32>
    %45 = arith.addf %40, %44 : vector<2x32xf32>
    %46 = vector.broadcast %6 : vector<2x1xf32> to vector<2x32xf32>
    %47 = arith.mulf %46, %31 : vector<2x32xf32>
    %cst_16 = arith.constant 1.000000e+00 : f32
    %48 = vector.broadcast %cst_16 : f32 to vector<2x1xf32>
    %49 = arith.subf %48, %6 : vector<2x1xf32>
    %50 = vector.broadcast %49 : vector<2x1xf32> to vector<2x32xf32>
    %51 = arith.mulf %50, %2 : vector<2x32xf32>
    %52 = arith.addf %47, %51 : vector<2x32xf32>
    %c1 = arith.constant 1 : index
    %c0_17 = arith.constant 0 : index
    %c0_18 = arith.constant 0 : index
    %53 = vector.load %arg0[%c1, %c0_17, %c0_18] : memref<8x2x128xf32, #tpu.memory_space<vmem>>, vector<1x2x128xf32>
    %54 = vector.shape_cast %53 : vector<1x2x128xf32> to vector<2x128xf32>
    %c1_19 = arith.constant 1 : index
    %c0_20 = arith.constant 0 : index
    %c0_21 = arith.constant 0 : index
    %55 = vector.load %arg2[%c1_19, %c0_20, %c0_21] : memref<8x2x1xf32, #tpu.memory_space<vmem>>, vector<1x2x1xf32>
    %56 = vector.shape_cast %55 : vector<1x2x1xf32> to vector<2x1xf32>
    %cst_22 = arith.constant dense<0.000000e+00> : vector<2x128xf32>
    %57 = tpu.matmul %45, %0, %cst_22 {dimension_numbers = #tpu.dot_dimension_numbers<[1], [0], [0], [1], [0, 0, 1, 1], [], []>} : vector<2x32xf32>, vector<32x128xf32>, vector<2x128xf32> -> vector<2x128xf32>
    %58 = arith.addf %54, %57 : vector<2x128xf32>
    %59 = vector.extract_strided_slice %58 {offsets = [0, 0], sizes = [2, 32], strides = [1, 1]} : vector<2x128xf32> to vector<2x32xf32>
    %60 = arith.negf %59 : vector<2x32xf32>
    %61 = math.exp %60 : vector<2x32xf32>
    %cst_23 = arith.constant 1.000000e+00 : f32
    %62 = vector.broadcast %cst_23 : f32 to vector<2x32xf32>
    %63 = arith.addf %62, %61 : vector<2x32xf32>
    %64 = arith.divf %62, %63 : vector<2x32xf32>
    %65 = vector.extract_strided_slice %58 {offsets = [0, 32], sizes = [2, 32], strides = [1, 1]} : vector<2x128xf32> to vector<2x32xf32>
    %66 = arith.negf %65 : vector<2x32xf32>
    %67 = math.exp %66 : vector<2x32xf32>
    %cst_24 = arith.constant 1.000000e+00 : f32
    %68 = vector.broadcast %cst_24 : f32 to vector<2x32xf32>
    %69 = arith.addf %68, %67 : vector<2x32xf32>
    %70 = arith.divf %68, %69 : vector<2x32xf32>
    %71 = vector.extract_strided_slice %58 {offsets = [0, 64], sizes = [2, 32], strides = [1, 1]} : vector<2x128xf32> to vector<2x32xf32>
    %72 = math.tanh %71 : vector<2x32xf32>
    %73 = vector.extract_strided_slice %58 {offsets = [0, 96], sizes = [2, 32], strides = [1, 1]} : vector<2x128xf32> to vector<2x32xf32>
    %74 = arith.negf %73 : vector<2x32xf32>
    %75 = math.exp %74 : vector<2x32xf32>
    %cst_25 = arith.constant 1.000000e+00 : f32
    %76 = vector.broadcast %cst_25 : f32 to vector<2x32xf32>
    %77 = arith.addf %76, %75 : vector<2x32xf32>
    %78 = arith.divf %76, %77 : vector<2x32xf32>
    %79 = arith.mulf %70, %52 : vector<2x32xf32>
    %80 = arith.mulf %64, %72 : vector<2x32xf32>
    %81 = arith.addf %79, %80 : vector<2x32xf32>
    %82 = math.tanh %81 : vector<2x32xf32>
    %83 = arith.mulf %78, %82 : vector<2x32xf32>
    %84 = vector.broadcast %56 : vector<2x1xf32> to vector<2x32xf32>
    %85 = arith.mulf %84, %83 : vector<2x32xf32>
    %c1_26 = arith.constant 1 : index
    %c0_27 = arith.constant 0 : index
    %c0_28 = arith.constant 0 : index
    %86 = vector.load %arg5[%c1_26, %c0_27, %c0_28] : memref<8x2x32xf32, #tpu.memory_space<vmem>>, vector<1x2x32xf32>
    %87 = vector.shape_cast %86 : vector<1x2x32xf32> to vector<2x32xf32>
    %88 = vector.shape_cast %85 : vector<2x32xf32> to vector<1x2x32xf32>
    tpu.vector_store %arg5[%c1_26, %c0_27, %c0_28], %88 {strides = array<i32>} : memref<8x2x32xf32, #tpu.memory_space<vmem>>, vector<1x2x32xf32>,
    %89 = vector.broadcast %56 : vector<2x1xf32> to vector<2x32xf32>
    %90 = arith.mulf %89, %83 : vector<2x32xf32>
    %cst_29 = arith.constant 1.000000e+00 : f32
    %91 = vector.broadcast %cst_29 : f32 to vector<2x1xf32>
    %92 = arith.subf %91, %56 : vector<2x1xf32>
    %93 = vector.broadcast %92 : vector<2x1xf32> to vector<2x32xf32>
    %94 = arith.mulf %93, %45 : vector<2x32xf32>
    %95 = arith.addf %90, %94 : vector<2x32xf32>
    %96 = vector.broadcast %56 : vector<2x1xf32> to vector<2x32xf32>
    %97 = arith.mulf %96, %81 : vector<2x32xf32>
    %cst_30 = arith.constant 1.000000e+00 : f32
    %98 = vector.broadcast %cst_30 : f32 to vector<2x1xf32>
    %99 = arith.subf %98, %56 : vector<2x1xf32>
    %100 = vector.broadcast %99 : vector<2x1xf32> to vector<2x32xf32>
    %101 = arith.mulf %100, %52 : vector<2x32xf32>
    %102 = arith.addf %97, %101 : vector<2x32xf32>
    %c2 = arith.constant 2 : index
    %c0_31 = arith.constant 0 : index
    %c0_32 = arith.constant 0 : index
    %103 = vector.load %arg0[%c2, %c0_31, %c0_32] : memref<8x2x128xf32, #tpu.memory_space<vmem>>, vector<1x2x128xf32>
    %104 = vector.shape_cast %103 : vector<1x2x128xf32> to vector<2x128xf32>
    %c2_33 = arith.constant 2 : index
    %c0_34 = arith.constant 0 : index
    %c0_35 = arith.constant 0 : index
    %105 = vector.load %arg2[%c2_33, %c0_34, %c0_35] : memref<8x2x1xf32, #tpu.memory_space<vmem>>, vector<1x2x1xf32>
    %106 = vector.shape_cast %105 : vector<1x2x1xf32> to vector<2x1xf32>
    %cst_36 = arith.constant dense<0.000000e+00> : vector<2x128xf32>
    %107 = tpu.matmul %95, %0, %cst_36 {dimension_numbers = #tpu.dot_dimension_numbers<[1], [0], [0], [1], [0, 0, 1, 1], [], []>} : vector<2x32xf32>, vector<32x128xf32>, vector<2x128xf32> -> vector<2x128xf32>
    %108 = arith.addf %104, %107 : vector<2x128xf32>
    %109 = vector.extract_strided_slice %108 {offsets = [0, 0], sizes = [2, 32], strides = [1, 1]} : vector<2x128xf32> to vector<2x32xf32>
    %110 = arith.negf %109 : vector<2x32xf32>
    %111 = math.exp %110 : vector<2x32xf32>
    %cst_37 = arith.constant 1.000000e+00 : f32
    %112 = vector.broadcast %cst_37 : f32 to vector<2x32xf32>
    %113 = arith.addf %112, %111 : vector<2x32xf32>
    %114 = arith.divf %112, %113 : vector<2x32xf32>
    %115 = vector.extract_strided_slice %108 {offsets = [0, 32], sizes = [2, 32], strides = [1, 1]} : vector<2x128xf32> to vector<2x32xf32>
    %116 = arith.negf %115 : vector<2x32xf32>
    %117 = math.exp %116 : vector<2x32xf32>
    %cst_38 = arith.constant 1.000000e+00 : f32
    %118 = vector.broadcast %cst_38 : f32 to vector<2x32xf32>
    %119 = arith.addf %118, %117 : vector<2x32xf32>
    %120 = arith.divf %118, %119 : vector<2x32xf32>
    %121 = vector.extract_strided_slice %108 {offsets = [0, 64], sizes = [2, 32], strides = [1, 1]} : vector<2x128xf32> to vector<2x32xf32>
    %122 = math.tanh %121 : vector<2x32xf32>
    %123 = vector.extract_strided_slice %108 {offsets = [0, 96], sizes = [2, 32], strides = [1, 1]} : vector<2x128xf32> to vector<2x32xf32>
    %124 = arith.negf %123 : vector<2x32xf32>
    %125 = math.exp %124 : vector<2x32xf32>
    %cst_39 = arith.constant 1.000000e+00 : f32
    %126 = vector.broadcast %cst_39 : f32 to vector<2x32xf32>
    %127 = arith.addf %126, %125 : vector<2x32xf32>
    %128 = arith.divf %126, %127 : vector<2x32xf32>
    %129 = arith.mulf %120, %102 : vector<2x32xf32>
    %130 = arith.mulf %114, %122 : vector<2x32xf32>
    %131 = arith.addf %129, %130 : vector<2x32xf32>
    %132 = math.tanh %131 : vector<2x32xf32>
    %133 = arith.mulf %128, %132 : vector<2x32xf32>
    %134 = vector.broadcast %106 : vector<2x1xf32> to vector<2x32xf32>
    %135 = arith.mulf %134, %133 : vector<2x32xf32>
    %c2_40 = arith.constant 2 : index
    %c0_41 = arith.constant 0 : index
    %c0_42 = arith.constant 0 : index
    %136 = vector.load %arg5[%c2_40, %c0_41, %c0_42] : memref<8x2x32xf32, #tpu.memory_space<vmem>>, vector<1x2x32xf32>
    %137 = vector.shape_cast %136 : vector<1x2x32xf32> to vector<2x32xf32>
    %138 = vector.shape_cast %135 : vector<2x32xf32> to vector<1x2x32xf32>
    tpu.vector_store %arg5[%c2_40, %c0_41, %c0_42], %138 {strides = array<i32>} : memref<8x2x32xf32, #tpu.memory_space<vmem>>, vector<1x2x32xf32>,
    %139 = vector.broadcast %106 : vector<2x1xf32> to vector<2x32xf32>
    %140 = arith.mulf %139, %133 : vector<2x32xf32>
    %cst_43 = arith.constant 1.000000e+00 : f32
    %141 = vector.broadcast %cst_43 : f32 to vector<2x1xf32>
    %142 = arith.subf %141, %106 : vector<2x1xf32>
    %143 = vector.broadcast %142 : vector<2x1xf32> to vector<2x32xf32>
    %144 = arith.mulf %143, %95 : vector<2x32xf32>
    %145 = arith.addf %140, %144 : vector<2x32xf32>
    %146 = vector.broadcast %106 : vector<2x1xf32> to vector<2x32xf32>
    %147 = arith.mulf %146, %131 : vector<2x32xf32>
    %cst_44 = arith.constant 1.000000e+00 : f32
    %148 = vector.broadcast %cst_44 : f32 to vector<2x1xf32>
    %149 = arith.subf %148, %106 : vector<2x1xf32>
    %150 = vector.broadcast %149 : vector<2x1xf32> to vector<2x32xf32>
    %151 = arith.mulf %150, %102 : vector<2x32xf32>
    %152 = arith.addf %147, %151 : vector<2x32xf32>
    %c3 = arith.constant 3 : index
    %c0_45 = arith.constant 0 : index
    %c0_46 = arith.constant 0 : index
    %153 = vector.load %arg0[%c3, %c0_45, %c0_46] : memref<8x2x128xf32, #tpu.memory_space<vmem>>, vector<1x2x128xf32>
    %154 = vector.shape_cast %153 : vector<1x2x128xf32> to vector<2x128xf32>
    %c3_47 = arith.constant 3 : index
    %c0_48 = arith.constant 0 : index
    %c0_49 = arith.constant 0 : index
    %155 = vector.load %arg2[%c3_47, %c0_48, %c0_49] : memref<8x2x1xf32, #tpu.memory_space<vmem>>, vector<1x2x1xf32>
    %156 = vector.shape_cast %155 : vector<1x2x1xf32> to vector<2x1xf32>
    %cst_50 = arith.constant dense<0.000000e+00> : vector<2x128xf32>
    %157 = tpu.matmul %145, %0, %cst_50 {dimension_numbers = #tpu.dot_dimension_numbers<[1], [0], [0], [1], [0, 0, 1, 1], [], []>} : vector<2x32xf32>, vector<32x128xf32>, vector<2x128xf32> -> vector<2x128xf32>
    %158 = arith.addf %154, %157 : vector<2x128xf32>
    %159 = vector.extract_strided_slice %158 {offsets = [0, 0], sizes = [2, 32], strides = [1, 1]} : vector<2x128xf32> to vector<2x32xf32>
    %160 = arith.negf %159 : vector<2x32xf32>
    %161 = math.exp %160 : vector<2x32xf32>
    %cst_51 = arith.constant 1.000000e+00 : f32
    %162 = vector.broadcast %cst_51 : f32 to vector<2x32xf32>
    %163 = arith.addf %162, %161 : vector<2x32xf32>
    %164 = arith.divf %162, %163 : vector<2x32xf32>
    %165 = vector.extract_strided_slice %158 {offsets = [0, 32], sizes = [2, 32], strides = [1, 1]} : vector<2x128xf32> to vector<2x32xf32>
    %166 = arith.negf %165 : vector<2x32xf32>
    %167 = math.exp %166 : vector<2x32xf32>
    %cst_52 = arith.constant 1.000000e+00 : f32
    %168 = vector.broadcast %cst_52 : f32 to vector<2x32xf32>
    %169 = arith.addf %168, %167 : vector<2x32xf32>
    %170 = arith.divf %168, %169 : vector<2x32xf32>
    %171 = vector.extract_strided_slice %158 {offsets = [0, 64], sizes = [2, 32], strides = [1, 1]} : vector<2x128xf32> to vector<2x32xf32>
    %172 = math.tanh %171 : vector<2x32xf32>
    %173 = vector.extract_strided_slice %158 {offsets = [0, 96], sizes = [2, 32], strides = [1, 1]} : vector<2x128xf32> to vector<2x32xf32>
    %174 = arith.negf %173 : vector<2x32xf32>
    %175 = math.exp %174 : vector<2x32xf32>
    %cst_53 = arith.constant 1.000000e+00 : f32
    %176 = vector.broadcast %cst_53 : f32 to vector<2x32xf32>
    %177 = arith.addf %176, %175 : vector<2x32xf32>
    %178 = arith.divf %176, %177 : vector<2x32xf32>
    %179 = arith.mulf %170, %152 : vector<2x32xf32>
    %180 = arith.mulf %164, %172 : vector<2x32xf32>
    %181 = arith.addf %179, %180 : vector<2x32xf32>
    %182 = math.tanh %181 : vector<2x32xf32>
    %183 = arith.mulf %178, %182 : vector<2x32xf32>
    %184 = vector.broadcast %156 : vector<2x1xf32> to vector<2x32xf32>
    %185 = arith.mulf %184, %183 : vector<2x32xf32>
    %c3_54 = arith.constant 3 : index
    %c0_55 = arith.constant 0 : index
    %c0_56 = arith.constant 0 : index
    %186 = vector.load %arg5[%c3_54, %c0_55, %c0_56] : memref<8x2x32xf32, #tpu.memory_space<vmem>>, vector<1x2x32xf32>
    %187 = vector.shape_cast %186 : vector<1x2x32xf32> to vector<2x32xf32>
    %188 = vector.shape_cast %185 : vector<2x32xf32> to vector<1x2x32xf32>
    tpu.vector_store %arg5[%c3_54, %c0_55, %c0_56], %188 {strides = array<i32>} : memref<8x2x32xf32, #tpu.memory_space<vmem>>, vector<1x2x32xf32>,
    %189 = vector.broadcast %156 : vector<2x1xf32> to vector<2x32xf32>
    %190 = arith.mulf %189, %183 : vector<2x32xf32>
    %cst_57 = arith.constant 1.000000e+00 : f32
    %191 = vector.broadcast %cst_57 : f32 to vector<2x1xf32>
    %192 = arith.subf %191, %156 : vector<2x1xf32>
    %193 = vector.broadcast %192 : vector<2x1xf32> to vector<2x32xf32>
    %194 = arith.mulf %193, %145 : vector<2x32xf32>
    %195 = arith.addf %190, %194 : vector<2x32xf32>
    %196 = vector.broadcast %156 : vector<2x1xf32> to vector<2x32xf32>
    %197 = arith.mulf %196, %181 : vector<2x32xf32>
    %cst_58 = arith.constant 1.000000e+00 : f32
    %198 = vector.broadcast %cst_58 : f32 to vector<2x1xf32>
    %199 = arith.subf %198, %156 : vector<2x1xf32>
    %200 = vector.broadcast %199 : vector<2x1xf32> to vector<2x32xf32>
    %201 = arith.mulf %200, %152 : vector<2x32xf32>
    %202 = arith.addf %197, %201 : vector<2x32xf32>
    %c4 = arith.constant 4 : index
    %c0_59 = arith.constant 0 : index
    %c0_60 = arith.constant 0 : index
    %203 = vector.load %arg0[%c4, %c0_59, %c0_60] : memref<8x2x128xf32, #tpu.memory_space<vmem>>, vector<1x2x128xf32>
    %204 = vector.shape_cast %203 : vector<1x2x128xf32> to vector<2x128xf32>
    %c4_61 = arith.constant 4 : index
    %c0_62 = arith.constant 0 : index
    %c0_63 = arith.constant 0 : index
    %205 = vector.load %arg2[%c4_61, %c0_62, %c0_63] : memref<8x2x1xf32, #tpu.memory_space<vmem>>, vector<1x2x1xf32>
    %206 = vector.shape_cast %205 : vector<1x2x1xf32> to vector<2x1xf32>
    %cst_64 = arith.constant dense<0.000000e+00> : vector<2x128xf32>
    %207 = tpu.matmul %195, %0, %cst_64 {dimension_numbers = #tpu.dot_dimension_numbers<[1], [0], [0], [1], [0, 0, 1, 1], [], []>} : vector<2x32xf32>, vector<32x128xf32>, vector<2x128xf32> -> vector<2x128xf32>
    %208 = arith.addf %204, %207 : vector<2x128xf32>
    %209 = vector.extract_strided_slice %208 {offsets = [0, 0], sizes = [2, 32], strides = [1, 1]} : vector<2x128xf32> to vector<2x32xf32>
    %210 = arith.negf %209 : vector<2x32xf32>
    %211 = math.exp %210 : vector<2x32xf32>
    %cst_65 = arith.constant 1.000000e+00 : f32
    %212 = vector.broadcast %cst_65 : f32 to vector<2x32xf32>
    %213 = arith.addf %212, %211 : vector<2x32xf32>
    %214 = arith.divf %212, %213 : vector<2x32xf32>
    %215 = vector.extract_strided_slice %208 {offsets = [0, 32], sizes = [2, 32], strides = [1, 1]} : vector<2x128xf32> to vector<2x32xf32>
    %216 = arith.negf %215 : vector<2x32xf32>
    %217 = math.exp %216 : vector<2x32xf32>
    %cst_66 = arith.constant 1.000000e+00 : f32
    %218 = vector.broadcast %cst_66 : f32 to vector<2x32xf32>
    %219 = arith.addf %218, %217 : vector<2x32xf32>
    %220 = arith.divf %218, %219 : vector<2x32xf32>
    %221 = vector.extract_strided_slice %208 {offsets = [0, 64], sizes = [2, 32], strides = [1, 1]} : vector<2x128xf32> to vector<2x32xf32>
    %222 = math.tanh %221 : vector<2x32xf32>
    %223 = vector.extract_strided_slice %208 {offsets = [0, 96], sizes = [2, 32], strides = [1, 1]} : vector<2x128xf32> to vector<2x32xf32>
    %224 = arith.negf %223 : vector<2x32xf32>
    %225 = math.exp %224 : vector<2x32xf32>
    %cst_67 = arith.constant 1.000000e+00 : f32
    %226 = vector.broadcast %cst_67 : f32 to vector<2x32xf32>
    %227 = arith.addf %226, %225 : vector<2x32xf32>
    %228 = arith.divf %226, %227 : vector<2x32xf32>
    %229 = arith.mulf %220, %202 : vector<2x32xf32>
    %230 = arith.mulf %214, %222 : vector<2x32xf32>
    %231 = arith.addf %229, %230 : vector<2x32xf32>
    %232 = math.tanh %231 : vector<2x32xf32>
    %233 = arith.mulf %228, %232 : vector<2x32xf32>
    %234 = vector.broadcast %206 : vector<2x1xf32> to vector<2x32xf32>
    %235 = arith.mulf %234, %233 : vector<2x32xf32>
    %c4_68 = arith.constant 4 : index
    %c0_69 = arith.constant 0 : index
    %c0_70 = arith.constant 0 : index
    %236 = vector.load %arg5[%c4_68, %c0_69, %c0_70] : memref<8x2x32xf32, #tpu.memory_space<vmem>>, vector<1x2x32xf32>
    %237 = vector.shape_cast %236 : vector<1x2x32xf32> to vector<2x32xf32>
    %238 = vector.shape_cast %235 : vector<2x32xf32> to vector<1x2x32xf32>
    tpu.vector_store %arg5[%c4_68, %c0_69, %c0_70], %238 {strides = array<i32>} : memref<8x2x32xf32, #tpu.memory_space<vmem>>, vector<1x2x32xf32>,
    %239 = vector.broadcast %206 : vector<2x1xf32> to vector<2x32xf32>
    %240 = arith.mulf %239, %233 : vector<2x32xf32>
    %cst_71 = arith.constant 1.000000e+00 : f32
    %241 = vector.broadcast %cst_71 : f32 to vector<2x1xf32>
    %242 = arith.subf %241, %206 : vector<2x1xf32>
    %243 = vector.broadcast %242 : vector<2x1xf32> to vector<2x32xf32>
    %244 = arith.mulf %243, %195 : vector<2x32xf32>
    %245 = arith.addf %240, %244 : vector<2x32xf32>
    %246 = vector.broadcast %206 : vector<2x1xf32> to vector<2x32xf32>
    %247 = arith.mulf %246, %231 : vector<2x32xf32>
    %cst_72 = arith.constant 1.000000e+00 : f32
    %248 = vector.broadcast %cst_72 : f32 to vector<2x1xf32>
    %249 = arith.subf %248, %206 : vector<2x1xf32>
    %250 = vector.broadcast %249 : vector<2x1xf32> to vector<2x32xf32>
    %251 = arith.mulf %250, %202 : vector<2x32xf32>
    %252 = arith.addf %247, %251 : vector<2x32xf32>
    %c5 = arith.constant 5 : index
    %c0_73 = arith.constant 0 : index
    %c0_74 = arith.constant 0 : index
    %253 = vector.load %arg0[%c5, %c0_73, %c0_74] : memref<8x2x128xf32, #tpu.memory_space<vmem>>, vector<1x2x128xf32>
    %254 = vector.shape_cast %253 : vector<1x2x128xf32> to vector<2x128xf32>
    %c5_75 = arith.constant 5 : index
    %c0_76 = arith.constant 0 : index
    %c0_77 = arith.constant 0 : index
    %255 = vector.load %arg2[%c5_75, %c0_76, %c0_77] : memref<8x2x1xf32, #tpu.memory_space<vmem>>, vector<1x2x1xf32>
    %256 = vector.shape_cast %255 : vector<1x2x1xf32> to vector<2x1xf32>
    %cst_78 = arith.constant dense<0.000000e+00> : vector<2x128xf32>
    %257 = tpu.matmul %245, %0, %cst_78 {dimension_numbers = #tpu.dot_dimension_numbers<[1], [0], [0], [1], [0, 0, 1, 1], [], []>} : vector<2x32xf32>, vector<32x128xf32>, vector<2x128xf32> -> vector<2x128xf32>
    %258 = arith.addf %254, %257 : vector<2x128xf32>
    %259 = vector.extract_strided_slice %258 {offsets = [0, 0], sizes = [2, 32], strides = [1, 1]} : vector<2x128xf32> to vector<2x32xf32>
    %260 = arith.negf %259 : vector<2x32xf32>
    %261 = math.exp %260 : vector<2x32xf32>
    %cst_79 = arith.constant 1.000000e+00 : f32
    %262 = vector.broadcast %cst_79 : f32 to vector<2x32xf32>
    %263 = arith.addf %262, %261 : vector<2x32xf32>
    %264 = arith.divf %262, %263 : vector<2x32xf32>
    %265 = vector.extract_strided_slice %258 {offsets = [0, 32], sizes = [2, 32], strides = [1, 1]} : vector<2x128xf32> to vector<2x32xf32>
    %266 = arith.negf %265 : vector<2x32xf32>
    %267 = math.exp %266 : vector<2x32xf32>
    %cst_80 = arith.constant 1.000000e+00 : f32
    %268 = vector.broadcast %cst_80 : f32 to vector<2x32xf32>
    %269 = arith.addf %268, %267 : vector<2x32xf32>
    %270 = arith.divf %268, %269 : vector<2x32xf32>
    %271 = vector.extract_strided_slice %258 {offsets = [0, 64], sizes = [2, 32], strides = [1, 1]} : vector<2x128xf32> to vector<2x32xf32>
    %272 = math.tanh %271 : vector<2x32xf32>
    %273 = vector.extract_strided_slice %258 {offsets = [0, 96], sizes = [2, 32], strides = [1, 1]} : vector<2x128xf32> to vector<2x32xf32>
    %274 = arith.negf %273 : vector<2x32xf32>
    %275 = math.exp %274 : vector<2x32xf32>
    %cst_81 = arith.constant 1.000000e+00 : f32
    %276 = vector.broadcast %cst_81 : f32 to vector<2x32xf32>
    %277 = arith.addf %276, %275 : vector<2x32xf32>
    %278 = arith.divf %276, %277 : vector<2x32xf32>
    %279 = arith.mulf %270, %252 : vector<2x32xf32>
    %280 = arith.mulf %264, %272 : vector<2x32xf32>
    %281 = arith.addf %279, %280 : vector<2x32xf32>
    %282 = math.tanh %281 : vector<2x32xf32>
    %283 = arith.mulf %278, %282 : vector<2x32xf32>
    %284 = vector.broadcast %256 : vector<2x1xf32> to vector<2x32xf32>
    %285 = arith.mulf %284, %283 : vector<2x32xf32>
    %c5_82 = arith.constant 5 : index
    %c0_83 = arith.constant 0 : index
    %c0_84 = arith.constant 0 : index
    %286 = vector.load %arg5[%c5_82, %c0_83, %c0_84] : memref<8x2x32xf32, #tpu.memory_space<vmem>>, vector<1x2x32xf32>
    %287 = vector.shape_cast %286 : vector<1x2x32xf32> to vector<2x32xf32>
    %288 = vector.shape_cast %285 : vector<2x32xf32> to vector<1x2x32xf32>
    tpu.vector_store %arg5[%c5_82, %c0_83, %c0_84], %288 {strides = array<i32>} : memref<8x2x32xf32, #tpu.memory_space<vmem>>, vector<1x2x32xf32>,
    %289 = vector.broadcast %256 : vector<2x1xf32> to vector<2x32xf32>
    %290 = arith.mulf %289, %283 : vector<2x32xf32>
    %cst_85 = arith.constant 1.000000e+00 : f32
    %291 = vector.broadcast %cst_85 : f32 to vector<2x1xf32>
    %292 = arith.subf %291, %256 : vector<2x1xf32>
    %293 = vector.broadcast %292 : vector<2x1xf32> to vector<2x32xf32>
    %294 = arith.mulf %293, %245 : vector<2x32xf32>
    %295 = arith.addf %290, %294 : vector<2x32xf32>
    %296 = vector.broadcast %256 : vector<2x1xf32> to vector<2x32xf32>
    %297 = arith.mulf %296, %281 : vector<2x32xf32>
    %cst_86 = arith.constant 1.000000e+00 : f32
    %298 = vector.broadcast %cst_86 : f32 to vector<2x1xf32>
    %299 = arith.subf %298, %256 : vector<2x1xf32>
    %300 = vector.broadcast %299 : vector<2x1xf32> to vector<2x32xf32>
    %301 = arith.mulf %300, %252 : vector<2x32xf32>
    %302 = arith.addf %297, %301 : vector<2x32xf32>
    %c6 = arith.constant 6 : index
    %c0_87 = arith.constant 0 : index
    %c0_88 = arith.constant 0 : index
    %303 = vector.load %arg0[%c6, %c0_87, %c0_88] : memref<8x2x128xf32, #tpu.memory_space<vmem>>, vector<1x2x128xf32>
    %304 = vector.shape_cast %303 : vector<1x2x128xf32> to vector<2x128xf32>
    %c6_89 = arith.constant 6 : index
    %c0_90 = arith.constant 0 : index
    %c0_91 = arith.constant 0 : index
    %305 = vector.load %arg2[%c6_89, %c0_90, %c0_91] : memref<8x2x1xf32, #tpu.memory_space<vmem>>, vector<1x2x1xf32>
    %306 = vector.shape_cast %305 : vector<1x2x1xf32> to vector<2x1xf32>
    %cst_92 = arith.constant dense<0.000000e+00> : vector<2x128xf32>
    %307 = tpu.matmul %295, %0, %cst_92 {dimension_numbers = #tpu.dot_dimension_numbers<[1], [0], [0], [1], [0, 0, 1, 1], [], []>} : vector<2x32xf32>, vector<32x128xf32>, vector<2x128xf32> -> vector<2x128xf32>
    %308 = arith.addf %304, %307 : vector<2x128xf32>
    %309 = vector.extract_strided_slice %308 {offsets = [0, 0], sizes = [2, 32], strides = [1, 1]} : vector<2x128xf32> to vector<2x32xf32>
    %310 = arith.negf %309 : vector<2x32xf32>
    %311 = math.exp %310 : vector<2x32xf32>
    %cst_93 = arith.constant 1.000000e+00 : f32
    %312 = vector.broadcast %cst_93 : f32 to vector<2x32xf32>
    %313 = arith.addf %312, %311 : vector<2x32xf32>
    %314 = arith.divf %312, %313 : vector<2x32xf32>
    %315 = vector.extract_strided_slice %308 {offsets = [0, 32], sizes = [2, 32], strides = [1, 1]} : vector<2x128xf32> to vector<2x32xf32>
    %316 = arith.negf %315 : vector<2x32xf32>
    %317 = math.exp %316 : vector<2x32xf32>
    %cst_94 = arith.constant 1.000000e+00 : f32
    %318 = vector.broadcast %cst_94 : f32 to vector<2x32xf32>
    %319 = arith.addf %318, %317 : vector<2x32xf32>
    %320 = arith.divf %318, %319 : vector<2x32xf32>
    %321 = vector.extract_strided_slice %308 {offsets = [0, 64], sizes = [2, 32], strides = [1, 1]} : vector<2x128xf32> to vector<2x32xf32>
    %322 = math.tanh %321 : vector<2x32xf32>
    %323 = vector.extract_strided_slice %308 {offsets = [0, 96], sizes = [2, 32], strides = [1, 1]} : vector<2x128xf32> to vector<2x32xf32>
    %324 = arith.negf %323 : vector<2x32xf32>
    %325 = math.exp %324 : vector<2x32xf32>
    %cst_95 = arith.constant 1.000000e+00 : f32
    %326 = vector.broadcast %cst_95 : f32 to vector<2x32xf32>
    %327 = arith.addf %326, %325 : vector<2x32xf32>
    %328 = arith.divf %326, %327 : vector<2x32xf32>
    %329 = arith.mulf %320, %302 : vector<2x32xf32>
    %330 = arith.mulf %314, %322 : vector<2x32xf32>
    %331 = arith.addf %329, %330 : vector<2x32xf32>
    %332 = math.tanh %331 : vector<2x32xf32>
    %333 = arith.mulf %328, %332 : vector<2x32xf32>
    %334 = vector.broadcast %306 : vector<2x1xf32> to vector<2x32xf32>
    %335 = arith.mulf %334, %333 : vector<2x32xf32>
    %c6_96 = arith.constant 6 : index
    %c0_97 = arith.constant 0 : index
    %c0_98 = arith.constant 0 : index
    %336 = vector.load %arg5[%c6_96, %c0_97, %c0_98] : memref<8x2x32xf32, #tpu.memory_space<vmem>>, vector<1x2x32xf32>
    %337 = vector.shape_cast %336 : vector<1x2x32xf32> to vector<2x32xf32>
    %338 = vector.shape_cast %335 : vector<2x32xf32> to vector<1x2x32xf32>
    tpu.vector_store %arg5[%c6_96, %c0_97, %c0_98], %338 {strides = array<i32>} : memref<8x2x32xf32, #tpu.memory_space<vmem>>, vector<1x2x32xf32>,
    %339 = vector.broadcast %306 : vector<2x1xf32> to vector<2x32xf32>
    %340 = arith.mulf %339, %333 : vector<2x32xf32>
    %cst_99 = arith.constant 1.000000e+00 : f32
    %341 = vector.broadcast %cst_99 : f32 to vector<2x1xf32>
    %342 = arith.subf %341, %306 : vector<2x1xf32>
    %343 = vector.broadcast %342 : vector<2x1xf32> to vector<2x32xf32>
    %344 = arith.mulf %343, %295 : vector<2x32xf32>
    %345 = arith.addf %340, %344 : vector<2x32xf32>
    %346 = vector.broadcast %306 : vector<2x1xf32> to vector<2x32xf32>
    %347 = arith.mulf %346, %331 : vector<2x32xf32>
    %cst_100 = arith.constant 1.000000e+00 : f32
    %348 = vector.broadcast %cst_100 : f32 to vector<2x1xf32>
    %349 = arith.subf %348, %306 : vector<2x1xf32>
    %350 = vector.broadcast %349 : vector<2x1xf32> to vector<2x32xf32>
    %351 = arith.mulf %350, %302 : vector<2x32xf32>
    %352 = arith.addf %347, %351 : vector<2x32xf32>
    %c7 = arith.constant 7 : index
    %c0_101 = arith.constant 0 : index
    %c0_102 = arith.constant 0 : index
    %353 = vector.load %arg0[%c7, %c0_101, %c0_102] : memref<8x2x128xf32, #tpu.memory_space<vmem>>, vector<1x2x128xf32>
    %354 = vector.shape_cast %353 : vector<1x2x128xf32> to vector<2x128xf32>
    %c7_103 = arith.constant 7 : index
    %c0_104 = arith.constant 0 : index
    %c0_105 = arith.constant 0 : index
    %355 = vector.load %arg2[%c7_103, %c0_104, %c0_105] : memref<8x2x1xf32, #tpu.memory_space<vmem>>, vector<1x2x1xf32>
    %356 = vector.shape_cast %355 : vector<1x2x1xf32> to vector<2x1xf32>
    %cst_106 = arith.constant dense<0.000000e+00> : vector<2x128xf32>
    %357 = tpu.matmul %345, %0, %cst_106 {dimension_numbers = #tpu.dot_dimension_numbers<[1], [0], [0], [1], [0, 0, 1, 1], [], []>} : vector<2x32xf32>, vector<32x128xf32>, vector<2x128xf32> -> vector<2x128xf32>
    %358 = arith.addf %354, %357 : vector<2x128xf32>
    %359 = vector.extract_strided_slice %358 {offsets = [0, 0], sizes = [2, 32], strides = [1, 1]} : vector<2x128xf32> to vector<2x32xf32>
    %360 = arith.negf %359 : vector<2x32xf32>
    %361 = math.exp %360 : vector<2x32xf32>
    %cst_107 = arith.constant 1.000000e+00 : f32
    %362 = vector.broadcast %cst_107 : f32 to vector<2x32xf32>
    %363 = arith.addf %362, %361 : vector<2x32xf32>
    %364 = arith.divf %362, %363 : vector<2x32xf32>
    %365 = vector.extract_strided_slice %358 {offsets = [0, 32], sizes = [2, 32], strides = [1, 1]} : vector<2x128xf32> to vector<2x32xf32>
    %366 = arith.negf %365 : vector<2x32xf32>
    %367 = math.exp %366 : vector<2x32xf32>
    %cst_108 = arith.constant 1.000000e+00 : f32
    %368 = vector.broadcast %cst_108 : f32 to vector<2x32xf32>
    %369 = arith.addf %368, %367 : vector<2x32xf32>
    %370 = arith.divf %368, %369 : vector<2x32xf32>
    %371 = vector.extract_strided_slice %358 {offsets = [0, 64], sizes = [2, 32], strides = [1, 1]} : vector<2x128xf32> to vector<2x32xf32>
    %372 = math.tanh %371 : vector<2x32xf32>
    %373 = vector.extract_strided_slice %358 {offsets = [0, 96], sizes = [2, 32], strides = [1, 1]} : vector<2x128xf32> to vector<2x32xf32>
    %374 = arith.negf %373 : vector<2x32xf32>
    %375 = math.exp %374 : vector<2x32xf32>
    %cst_109 = arith.constant 1.000000e+00 : f32
    %376 = vector.broadcast %cst_109 : f32 to vector<2x32xf32>
    %377 = arith.addf %376, %375 : vector<2x32xf32>
    %378 = arith.divf %376, %377 : vector<2x32xf32>
    %379 = arith.mulf %370, %352 : vector<2x32xf32>
    %380 = arith.mulf %364, %372 : vector<2x32xf32>
    %381 = arith.addf %379, %380 : vector<2x32xf32>
    %382 = math.tanh %381 : vector<2x32xf32>
    %383 = arith.mulf %378, %382 : vector<2x32xf32>
    %384 = vector.broadcast %356 : vector<2x1xf32> to vector<2x32xf32>
    %385 = arith.mulf %384, %383 : vector<2x32xf32>
    %c7_110 = arith.constant 7 : index
    %c0_111 = arith.constant 0 : index
    %c0_112 = arith.constant 0 : index
    %386 = vector.load %arg5[%c7_110, %c0_111, %c0_112] : memref<8x2x32xf32, #tpu.memory_space<vmem>>, vector<1x2x32xf32>
    %387 = vector.shape_cast %386 : vector<1x2x32xf32> to vector<2x32xf32>
    %388 = vector.shape_cast %385 : vector<2x32xf32> to vector<1x2x32xf32>
    tpu.vector_store %arg5[%c7_110, %c0_111, %c0_112], %388 {strides = array<i32>} : memref<8x2x32xf32, #tpu.memory_space<vmem>>, vector<1x2x32xf32>,
    %389 = vector.broadcast %356 : vector<2x1xf32> to vector<2x32xf32>
    %390 = arith.mulf %389, %383 : vector<2x32xf32>
    %cst_113 = arith.constant 1.000000e+00 : f32
    %391 = vector.broadcast %cst_113 : f32 to vector<2x1xf32>
    %392 = arith.subf %391, %356 : vector<2x1xf32>
    %393 = vector.broadcast %392 : vector<2x1xf32> to vector<2x32xf32>
    %394 = arith.mulf %393, %345 : vector<2x32xf32>
    %395 = arith.addf %390, %394 : vector<2x32xf32>
    %396 = vector.broadcast %356 : vector<2x1xf32> to vector<2x32xf32>
    %397 = arith.mulf %396, %381 : vector<2x32xf32>
    %cst_114 = arith.constant 1.000000e+00 : f32
    %398 = vector.broadcast %cst_114 : f32 to vector<2x1xf32>
    %399 = arith.subf %398, %356 : vector<2x1xf32>
    %400 = vector.broadcast %399 : vector<2x1xf32> to vector<2x32xf32>
    %401 = arith.mulf %400, %352 : vector<2x32xf32>
    %402 = arith.addf %397, %401 : vector<2x32xf32>
    %c0_115 = arith.constant 0 : index
    %c0_116 = arith.constant 0 : index
    %403 = vector.load %arg4[%c0_115, %c0_116] : memref<32x128xf32, #tpu.memory_space<vmem>>, vector<32x128xf32>
    %cst_117 = arith.constant 0.000000e+00 : f32
    %404 = vector.broadcast %cst_117 : f32 to vector<2x32xf32>
    %cst_118 = arith.constant 0.000000e+00 : f32
    %405 = vector.broadcast %cst_118 : f32 to vector<2x32xf32>
    %c7_119 = arith.constant 7 : index
    %c0_120 = arith.constant 0 : index
    %c0_121 = arith.constant 0 : index
    %406 = vector.load %arg1[%c7_119, %c0_120, %c0_121] : memref<8x2x128xf32, #tpu.memory_space<vmem>>, vector<1x2x128xf32>
    %407 = vector.shape_cast %406 : vector<1x2x128xf32> to vector<2x128xf32>
    %c7_122 = arith.constant 7 : index
    %c0_123 = arith.constant 0 : index
    %c0_124 = arith.constant 0 : index
    %408 = vector.load %arg2[%c7_122, %c0_123, %c0_124] : memref<8x2x1xf32, #tpu.memory_space<vmem>>, vector<1x2x1xf32>
    %409 = vector.shape_cast %408 : vector<1x2x1xf32> to vector<2x1xf32>
    %cst_125 = arith.constant dense<0.000000e+00> : vector<2x128xf32>
    %410 = tpu.matmul %404, %403, %cst_125 {dimension_numbers = #tpu.dot_dimension_numbers<[1], [0], [0], [1], [0, 0, 1, 1], [], []>} : vector<2x32xf32>, vector<32x128xf32>, vector<2x128xf32> -> vector<2x128xf32>
    %411 = arith.addf %407, %410 : vector<2x128xf32>
    %412 = vector.extract_strided_slice %411 {offsets = [0, 0], sizes = [2, 32], strides = [1, 1]} : vector<2x128xf32> to vector<2x32xf32>
    %413 = arith.negf %412 : vector<2x32xf32>
    %414 = math.exp %413 : vector<2x32xf32>
    %cst_126 = arith.constant 1.000000e+00 : f32
    %415 = vector.broadcast %cst_126 : f32 to vector<2x32xf32>
    %416 = arith.addf %415, %414 : vector<2x32xf32>
    %417 = arith.divf %415, %416 : vector<2x32xf32>
    %418 = vector.extract_strided_slice %411 {offsets = [0, 32], sizes = [2, 32], strides = [1, 1]} : vector<2x128xf32> to vector<2x32xf32>
    %419 = arith.negf %418 : vector<2x32xf32>
    %420 = math.exp %419 : vector<2x32xf32>
    %cst_127 = arith.constant 1.000000e+00 : f32
    %421 = vector.broadcast %cst_127 : f32 to vector<2x32xf32>
    %422 = arith.addf %421, %420 : vector<2x32xf32>
    %423 = arith.divf %421, %422 : vector<2x32xf32>
    %424 = vector.extract_strided_slice %411 {offsets = [0, 64], sizes = [2, 32], strides = [1, 1]} : vector<2x128xf32> to vector<2x32xf32>
    %425 = math.tanh %424 : vector<2x32xf32>
    %426 = vector.extract_strided_slice %411 {offsets = [0, 96], sizes = [2, 32], strides = [1, 1]} : vector<2x128xf32> to vector<2x32xf32>
    %427 = arith.negf %426 : vector<2x32xf32>
    %428 = math.exp %427 : vector<2x32xf32>
    %cst_128 = arith.constant 1.000000e+00 : f32
    %429 = vector.broadcast %cst_128 : f32 to vector<2x32xf32>
    %430 = arith.addf %429, %428 : vector<2x32xf32>
    %431 = arith.divf %429, %430 : vector<2x32xf32>
    %432 = arith.mulf %423, %405 : vector<2x32xf32>
    %433 = arith.mulf %417, %425 : vector<2x32xf32>
    %434 = arith.addf %432, %433 : vector<2x32xf32>
    %435 = math.tanh %434 : vector<2x32xf32>
    %436 = arith.mulf %431, %435 : vector<2x32xf32>
    %437 = vector.broadcast %409 : vector<2x1xf32> to vector<2x32xf32>
    %438 = arith.mulf %437, %436 : vector<2x32xf32>
    %c7_129 = arith.constant 7 : index
    %c0_130 = arith.constant 0 : index
    %c0_131 = arith.constant 0 : index
    %439 = vector.load %arg6[%c7_129, %c0_130, %c0_131] : memref<8x2x32xf32, #tpu.memory_space<vmem>>, vector<1x2x32xf32>
    %440 = vector.shape_cast %439 : vector<1x2x32xf32> to vector<2x32xf32>
    %441 = vector.shape_cast %438 : vector<2x32xf32> to vector<1x2x32xf32>
    tpu.vector_store %arg6[%c7_129, %c0_130, %c0_131], %441 {strides = array<i32>} : memref<8x2x32xf32, #tpu.memory_space<vmem>>, vector<1x2x32xf32>,
    %442 = vector.broadcast %409 : vector<2x1xf32> to vector<2x32xf32>
    %443 = arith.mulf %442, %436 : vector<2x32xf32>
    %cst_132 = arith.constant 1.000000e+00 : f32
    %444 = vector.broadcast %cst_132 : f32 to vector<2x1xf32>
    %445 = arith.subf %444, %409 : vector<2x1xf32>
    %446 = vector.broadcast %445 : vector<2x1xf32> to vector<2x32xf32>
    %447 = arith.mulf %446, %404 : vector<2x32xf32>
    %448 = arith.addf %443, %447 : vector<2x32xf32>
    %449 = vector.broadcast %409 : vector<2x1xf32> to vector<2x32xf32>
    %450 = arith.mulf %449, %434 : vector<2x32xf32>
    %cst_133 = arith.constant 1.000000e+00 : f32
    %451 = vector.broadcast %cst_133 : f32 to vector<2x1xf32>
    %452 = arith.subf %451, %409 : vector<2x1xf32>
    %453 = vector.broadcast %452 : vector<2x1xf32> to vector<2x32xf32>
    %454 = arith.mulf %453, %405 : vector<2x32xf32>
    %455 = arith.addf %450, %454 : vector<2x32xf32>
    %c6_134 = arith.constant 6 : index
    %c0_135 = arith.constant 0 : index
    %c0_136 = arith.constant 0 : index
    %456 = vector.load %arg1[%c6_134, %c0_135, %c0_136] : memref<8x2x128xf32, #tpu.memory_space<vmem>>, vector<1x2x128xf32>
    %457 = vector.shape_cast %456 : vector<1x2x128xf32> to vector<2x128xf32>
    %c6_137 = arith.constant 6 : index
    %c0_138 = arith.constant 0 : index
    %c0_139 = arith.constant 0 : index
    %458 = vector.load %arg2[%c6_137, %c0_138, %c0_139] : memref<8x2x1xf32, #tpu.memory_space<vmem>>, vector<1x2x1xf32>
    %459 = vector.shape_cast %458 : vector<1x2x1xf32> to vector<2x1xf32>
    %cst_140 = arith.constant dense<0.000000e+00> : vector<2x128xf32>
    %460 = tpu.matmul %448, %403, %cst_140 {dimension_numbers = #tpu.dot_dimension_numbers<[1], [0], [0], [1], [0, 0, 1, 1], [], []>} : vector<2x32xf32>, vector<32x128xf32>, vector<2x128xf32> -> vector<2x128xf32>
    %461 = arith.addf %457, %460 : vector<2x128xf32>
    %462 = vector.extract_strided_slice %461 {offsets = [0, 0], sizes = [2, 32], strides = [1, 1]} : vector<2x128xf32> to vector<2x32xf32>
    %463 = arith.negf %462 : vector<2x32xf32>
    %464 = math.exp %463 : vector<2x32xf32>
    %cst_141 = arith.constant 1.000000e+00 : f32
    %465 = vector.broadcast %cst_141 : f32 to vector<2x32xf32>
    %466 = arith.addf %465, %464 : vector<2x32xf32>
    %467 = arith.divf %465, %466 : vector<2x32xf32>
    %468 = vector.extract_strided_slice %461 {offsets = [0, 32], sizes = [2, 32], strides = [1, 1]} : vector<2x128xf32> to vector<2x32xf32>
    %469 = arith.negf %468 : vector<2x32xf32>
    %470 = math.exp %469 : vector<2x32xf32>
    %cst_142 = arith.constant 1.000000e+00 : f32
    %471 = vector.broadcast %cst_142 : f32 to vector<2x32xf32>
    %472 = arith.addf %471, %470 : vector<2x32xf32>
    %473 = arith.divf %471, %472 : vector<2x32xf32>
    %474 = vector.extract_strided_slice %461 {offsets = [0, 64], sizes = [2, 32], strides = [1, 1]} : vector<2x128xf32> to vector<2x32xf32>
    %475 = math.tanh %474 : vector<2x32xf32>
    %476 = vector.extract_strided_slice %461 {offsets = [0, 96], sizes = [2, 32], strides = [1, 1]} : vector<2x128xf32> to vector<2x32xf32>
    %477 = arith.negf %476 : vector<2x32xf32>
    %478 = math.exp %477 : vector<2x32xf32>
    %cst_143 = arith.constant 1.000000e+00 : f32
    %479 = vector.broadcast %cst_143 : f32 to vector<2x32xf32>
    %480 = arith.addf %479, %478 : vector<2x32xf32>
    %481 = arith.divf %479, %480 : vector<2x32xf32>
    %482 = arith.mulf %473, %455 : vector<2x32xf32>
    %483 = arith.mulf %467, %475 : vector<2x32xf32>
    %484 = arith.addf %482, %483 : vector<2x32xf32>
    %485 = math.tanh %484 : vector<2x32xf32>
    %486 = arith.mulf %481, %485 : vector<2x32xf32>
    %487 = vector.broadcast %459 : vector<2x1xf32> to vector<2x32xf32>
    %488 = arith.mulf %487, %486 : vector<2x32xf32>
    %c6_144 = arith.constant 6 : index
    %c0_145 = arith.constant 0 : index
    %c0_146 = arith.constant 0 : index
    %489 = vector.load %arg6[%c6_144, %c0_145, %c0_146] : memref<8x2x32xf32, #tpu.memory_space<vmem>>, vector<1x2x32xf32>
    %490 = vector.shape_cast %489 : vector<1x2x32xf32> to vector<2x32xf32>
    %491 = vector.shape_cast %488 : vector<2x32xf32> to vector<1x2x32xf32>
    tpu.vector_store %arg6[%c6_144, %c0_145, %c0_146], %491 {strides = array<i32>} : memref<8x2x32xf32, #tpu.memory_space<vmem>>, vector<1x2x32xf32>,
    %492 = vector.broadcast %459 : vector<2x1xf32> to vector<2x32xf32>
    %493 = arith.mulf %492, %486 : vector<2x32xf32>
    %cst_147 = arith.constant 1.000000e+00 : f32
    %494 = vector.broadcast %cst_147 : f32 to vector<2x1xf32>
    %495 = arith.subf %494, %459 : vector<2x1xf32>
    %496 = vector.broadcast %495 : vector<2x1xf32> to vector<2x32xf32>
    %497 = arith.mulf %496, %448 : vector<2x32xf32>
    %498 = arith.addf %493, %497 : vector<2x32xf32>
    %499 = vector.broadcast %459 : vector<2x1xf32> to vector<2x32xf32>
    %500 = arith.mulf %499, %484 : vector<2x32xf32>
    %cst_148 = arith.constant 1.000000e+00 : f32
    %501 = vector.broadcast %cst_148 : f32 to vector<2x1xf32>
    %502 = arith.subf %501, %459 : vector<2x1xf32>
    %503 = vector.broadcast %502 : vector<2x1xf32> to vector<2x32xf32>
    %504 = arith.mulf %503, %455 : vector<2x32xf32>
    %505 = arith.addf %500, %504 : vector<2x32xf32>
    %c5_149 = arith.constant 5 : index
    %c0_150 = arith.constant 0 : index
    %c0_151 = arith.constant 0 : index
    %506 = vector.load %arg1[%c5_149, %c0_150, %c0_151] : memref<8x2x128xf32, #tpu.memory_space<vmem>>, vector<1x2x128xf32>
    %507 = vector.shape_cast %506 : vector<1x2x128xf32> to vector<2x128xf32>
    %c5_152 = arith.constant 5 : index
    %c0_153 = arith.constant 0 : index
    %c0_154 = arith.constant 0 : index
    %508 = vector.load %arg2[%c5_152, %c0_153, %c0_154] : memref<8x2x1xf32, #tpu.memory_space<vmem>>, vector<1x2x1xf32>
    %509 = vector.shape_cast %508 : vector<1x2x1xf32> to vector<2x1xf32>
    %cst_155 = arith.constant dense<0.000000e+00> : vector<2x128xf32>
    %510 = tpu.matmul %498, %403, %cst_155 {dimension_numbers = #tpu.dot_dimension_numbers<[1], [0], [0], [1], [0, 0, 1, 1], [], []>} : vector<2x32xf32>, vector<32x128xf32>, vector<2x128xf32> -> vector<2x128xf32>
    %511 = arith.addf %507, %510 : vector<2x128xf32>
    %512 = vector.extract_strided_slice %511 {offsets = [0, 0], sizes = [2, 32], strides = [1, 1]} : vector<2x128xf32> to vector<2x32xf32>
    %513 = arith.negf %512 : vector<2x32xf32>
    %514 = math.exp %513 : vector<2x32xf32>
    %cst_156 = arith.constant 1.000000e+00 : f32
    %515 = vector.broadcast %cst_156 : f32 to vector<2x32xf32>
    %516 = arith.addf %515, %514 : vector<2x32xf32>
    %517 = arith.divf %515, %516 : vector<2x32xf32>
    %518 = vector.extract_strided_slice %511 {offsets = [0, 32], sizes = [2, 32], strides = [1, 1]} : vector<2x128xf32> to vector<2x32xf32>
    %519 = arith.negf %518 : vector<2x32xf32>
    %520 = math.exp %519 : vector<2x32xf32>
    %cst_157 = arith.constant 1.000000e+00 : f32
    %521 = vector.broadcast %cst_157 : f32 to vector<2x32xf32>
    %522 = arith.addf %521, %520 : vector<2x32xf32>
    %523 = arith.divf %521, %522 : vector<2x32xf32>
    %524 = vector.extract_strided_slice %511 {offsets = [0, 64], sizes = [2, 32], strides = [1, 1]} : vector<2x128xf32> to vector<2x32xf32>
    %525 = math.tanh %524 : vector<2x32xf32>
    %526 = vector.extract_strided_slice %511 {offsets = [0, 96], sizes = [2, 32], strides = [1, 1]} : vector<2x128xf32> to vector<2x32xf32>
    %527 = arith.negf %526 : vector<2x32xf32>
    %528 = math.exp %527 : vector<2x32xf32>
    %cst_158 = arith.constant 1.000000e+00 : f32
    %529 = vector.broadcast %cst_158 : f32 to vector<2x32xf32>
    %530 = arith.addf %529, %528 : vector<2x32xf32>
    %531 = arith.divf %529, %530 : vector<2x32xf32>
    %532 = arith.mulf %523, %505 : vector<2x32xf32>
    %533 = arith.mulf %517, %525 : vector<2x32xf32>
    %534 = arith.addf %532, %533 : vector<2x32xf32>
    %535 = math.tanh %534 : vector<2x32xf32>
    %536 = arith.mulf %531, %535 : vector<2x32xf32>
    %537 = vector.broadcast %509 : vector<2x1xf32> to vector<2x32xf32>
    %538 = arith.mulf %537, %536 : vector<2x32xf32>
    %c5_159 = arith.constant 5 : index
    %c0_160 = arith.constant 0 : index
    %c0_161 = arith.constant 0 : index
    %539 = vector.load %arg6[%c5_159, %c0_160, %c0_161] : memref<8x2x32xf32, #tpu.memory_space<vmem>>, vector<1x2x32xf32>
    %540 = vector.shape_cast %539 : vector<1x2x32xf32> to vector<2x32xf32>
    %541 = vector.shape_cast %538 : vector<2x32xf32> to vector<1x2x32xf32>
    tpu.vector_store %arg6[%c5_159, %c0_160, %c0_161], %541 {strides = array<i32>} : memref<8x2x32xf32, #tpu.memory_space<vmem>>, vector<1x2x32xf32>,
    %542 = vector.broadcast %509 : vector<2x1xf32> to vector<2x32xf32>
    %543 = arith.mulf %542, %536 : vector<2x32xf32>
    %cst_162 = arith.constant 1.000000e+00 : f32
    %544 = vector.broadcast %cst_162 : f32 to vector<2x1xf32>
    %545 = arith.subf %544, %509 : vector<2x1xf32>
    %546 = vector.broadcast %545 : vector<2x1xf32> to vector<2x32xf32>
    %547 = arith.mulf %546, %498 : vector<2x32xf32>
    %548 = arith.addf %543, %547 : vector<2x32xf32>
    %549 = vector.broadcast %509 : vector<2x1xf32> to vector<2x32xf32>
    %550 = arith.mulf %549, %534 : vector<2x32xf32>
    %cst_163 = arith.constant 1.000000e+00 : f32
    %551 = vector.broadcast %cst_163 : f32 to vector<2x1xf32>
    %552 = arith.subf %551, %509 : vector<2x1xf32>
    %553 = vector.broadcast %552 : vector<2x1xf32> to vector<2x32xf32>
    %554 = arith.mulf %553, %505 : vector<2x32xf32>
    %555 = arith.addf %550, %554 : vector<2x32xf32>
    %c4_164 = arith.constant 4 : index
    %c0_165 = arith.constant 0 : index
    %c0_166 = arith.constant 0 : index
    %556 = vector.load %arg1[%c4_164, %c0_165, %c0_166] : memref<8x2x128xf32, #tpu.memory_space<vmem>>, vector<1x2x128xf32>
    %557 = vector.shape_cast %556 : vector<1x2x128xf32> to vector<2x128xf32>
    %c4_167 = arith.constant 4 : index
    %c0_168 = arith.constant 0 : index
    %c0_169 = arith.constant 0 : index
    %558 = vector.load %arg2[%c4_167, %c0_168, %c0_169] : memref<8x2x1xf32, #tpu.memory_space<vmem>>, vector<1x2x1xf32>
    %559 = vector.shape_cast %558 : vector<1x2x1xf32> to vector<2x1xf32>
    %cst_170 = arith.constant dense<0.000000e+00> : vector<2x128xf32>
    %560 = tpu.matmul %548, %403, %cst_170 {dimension_numbers = #tpu.dot_dimension_numbers<[1], [0], [0], [1], [0, 0, 1, 1], [], []>} : vector<2x32xf32>, vector<32x128xf32>, vector<2x128xf32> -> vector<2x128xf32>
    %561 = arith.addf %557, %560 : vector<2x128xf32>
    %562 = vector.extract_strided_slice %561 {offsets = [0, 0], sizes = [2, 32], strides = [1, 1]} : vector<2x128xf32> to vector<2x32xf32>
    %563 = arith.negf %562 : vector<2x32xf32>
    %564 = math.exp %563 : vector<2x32xf32>
    %cst_171 = arith.constant 1.000000e+00 : f32
    %565 = vector.broadcast %cst_171 : f32 to vector<2x32xf32>
    %566 = arith.addf %565, %564 : vector<2x32xf32>
    %567 = arith.divf %565, %566 : vector<2x32xf32>
    %568 = vector.extract_strided_slice %561 {offsets = [0, 32], sizes = [2, 32], strides = [1, 1]} : vector<2x128xf32> to vector<2x32xf32>
    %569 = arith.negf %568 : vector<2x32xf32>
    %570 = math.exp %569 : vector<2x32xf32>
    %cst_172 = arith.constant 1.000000e+00 : f32
    %571 = vector.broadcast %cst_172 : f32 to vector<2x32xf32>
    %572 = arith.addf %571, %570 : vector<2x32xf32>
    %573 = arith.divf %571, %572 : vector<2x32xf32>
    %574 = vector.extract_strided_slice %561 {offsets = [0, 64], sizes = [2, 32], strides = [1, 1]} : vector<2x128xf32> to vector<2x32xf32>
    %575 = math.tanh %574 : vector<2x32xf32>
    %576 = vector.extract_strided_slice %561 {offsets = [0, 96], sizes = [2, 32], strides = [1, 1]} : vector<2x128xf32> to vector<2x32xf32>
    %577 = arith.negf %576 : vector<2x32xf32>
    %578 = math.exp %577 : vector<2x32xf32>
    %cst_173 = arith.constant 1.000000e+00 : f32
    %579 = vector.broadcast %cst_173 : f32 to vector<2x32xf32>
    %580 = arith.addf %579, %578 : vector<2x32xf32>
    %581 = arith.divf %579, %580 : vector<2x32xf32>
    %582 = arith.mulf %573, %555 : vector<2x32xf32>
    %583 = arith.mulf %567, %575 : vector<2x32xf32>
    %584 = arith.addf %582, %583 : vector<2x32xf32>
    %585 = math.tanh %584 : vector<2x32xf32>
    %586 = arith.mulf %581, %585 : vector<2x32xf32>
    %587 = vector.broadcast %559 : vector<2x1xf32> to vector<2x32xf32>
    %588 = arith.mulf %587, %586 : vector<2x32xf32>
    %c4_174 = arith.constant 4 : index
    %c0_175 = arith.constant 0 : index
    %c0_176 = arith.constant 0 : index
    %589 = vector.load %arg6[%c4_174, %c0_175, %c0_176] : memref<8x2x32xf32, #tpu.memory_space<vmem>>, vector<1x2x32xf32>
    %590 = vector.shape_cast %589 : vector<1x2x32xf32> to vector<2x32xf32>
    %591 = vector.shape_cast %588 : vector<2x32xf32> to vector<1x2x32xf32>
    tpu.vector_store %arg6[%c4_174, %c0_175, %c0_176], %591 {strides = array<i32>} : memref<8x2x32xf32, #tpu.memory_space<vmem>>, vector<1x2x32xf32>,
    %592 = vector.broadcast %559 : vector<2x1xf32> to vector<2x32xf32>
    %593 = arith.mulf %592, %586 : vector<2x32xf32>
    %cst_177 = arith.constant 1.000000e+00 : f32
    %594 = vector.broadcast %cst_177 : f32 to vector<2x1xf32>
    %595 = arith.subf %594, %559 : vector<2x1xf32>
    %596 = vector.broadcast %595 : vector<2x1xf32> to vector<2x32xf32>
    %597 = arith.mulf %596, %548 : vector<2x32xf32>
    %598 = arith.addf %593, %597 : vector<2x32xf32>
    %599 = vector.broadcast %559 : vector<2x1xf32> to vector<2x32xf32>
    %600 = arith.mulf %599, %584 : vector<2x32xf32>
    %cst_178 = arith.constant 1.000000e+00 : f32
    %601 = vector.broadcast %cst_178 : f32 to vector<2x1xf32>
    %602 = arith.subf %601, %559 : vector<2x1xf32>
    %603 = vector.broadcast %602 : vector<2x1xf32> to vector<2x32xf32>
    %604 = arith.mulf %603, %555 : vector<2x32xf32>
    %605 = arith.addf %600, %604 : vector<2x32xf32>
    %c3_179 = arith.constant 3 : index
    %c0_180 = arith.constant 0 : index
    %c0_181 = arith.constant 0 : index
    %606 = vector.load %arg1[%c3_179, %c0_180, %c0_181] : memref<8x2x128xf32, #tpu.memory_space<vmem>>, vector<1x2x128xf32>
    %607 = vector.shape_cast %606 : vector<1x2x128xf32> to vector<2x128xf32>
    %c3_182 = arith.constant 3 : index
    %c0_183 = arith.constant 0 : index
    %c0_184 = arith.constant 0 : index
    %608 = vector.load %arg2[%c3_182, %c0_183, %c0_184] : memref<8x2x1xf32, #tpu.memory_space<vmem>>, vector<1x2x1xf32>
    %609 = vector.shape_cast %608 : vector<1x2x1xf32> to vector<2x1xf32>
    %cst_185 = arith.constant dense<0.000000e+00> : vector<2x128xf32>
    %610 = tpu.matmul %598, %403, %cst_185 {dimension_numbers = #tpu.dot_dimension_numbers<[1], [0], [0], [1], [0, 0, 1, 1], [], []>} : vector<2x32xf32>, vector<32x128xf32>, vector<2x128xf32> -> vector<2x128xf32>
    %611 = arith.addf %607, %610 : vector<2x128xf32>
    %612 = vector.extract_strided_slice %611 {offsets = [0, 0], sizes = [2, 32], strides = [1, 1]} : vector<2x128xf32> to vector<2x32xf32>
    %613 = arith.negf %612 : vector<2x32xf32>
    %614 = math.exp %613 : vector<2x32xf32>
    %cst_186 = arith.constant 1.000000e+00 : f32
    %615 = vector.broadcast %cst_186 : f32 to vector<2x32xf32>
    %616 = arith.addf %615, %614 : vector<2x32xf32>
    %617 = arith.divf %615, %616 : vector<2x32xf32>
    %618 = vector.extract_strided_slice %611 {offsets = [0, 32], sizes = [2, 32], strides = [1, 1]} : vector<2x128xf32> to vector<2x32xf32>
    %619 = arith.negf %618 : vector<2x32xf32>
    %620 = math.exp %619 : vector<2x32xf32>
    %cst_187 = arith.constant 1.000000e+00 : f32
    %621 = vector.broadcast %cst_187 : f32 to vector<2x32xf32>
    %622 = arith.addf %621, %620 : vector<2x32xf32>
    %623 = arith.divf %621, %622 : vector<2x32xf32>
    %624 = vector.extract_strided_slice %611 {offsets = [0, 64], sizes = [2, 32], strides = [1, 1]} : vector<2x128xf32> to vector<2x32xf32>
    %625 = math.tanh %624 : vector<2x32xf32>
    %626 = vector.extract_strided_slice %611 {offsets = [0, 96], sizes = [2, 32], strides = [1, 1]} : vector<2x128xf32> to vector<2x32xf32>
    %627 = arith.negf %626 : vector<2x32xf32>
    %628 = math.exp %627 : vector<2x32xf32>
    %cst_188 = arith.constant 1.000000e+00 : f32
    %629 = vector.broadcast %cst_188 : f32 to vector<2x32xf32>
    %630 = arith.addf %629, %628 : vector<2x32xf32>
    %631 = arith.divf %629, %630 : vector<2x32xf32>
    %632 = arith.mulf %623, %605 : vector<2x32xf32>
    %633 = arith.mulf %617, %625 : vector<2x32xf32>
    %634 = arith.addf %632, %633 : vector<2x32xf32>
    %635 = math.tanh %634 : vector<2x32xf32>
    %636 = arith.mulf %631, %635 : vector<2x32xf32>
    %637 = vector.broadcast %609 : vector<2x1xf32> to vector<2x32xf32>
    %638 = arith.mulf %637, %636 : vector<2x32xf32>
    %c3_189 = arith.constant 3 : index
    %c0_190 = arith.constant 0 : index
    %c0_191 = arith.constant 0 : index
    %639 = vector.load %arg6[%c3_189, %c0_190, %c0_191] : memref<8x2x32xf32, #tpu.memory_space<vmem>>, vector<1x2x32xf32>
    %640 = vector.shape_cast %639 : vector<1x2x32xf32> to vector<2x32xf32>
    %641 = vector.shape_cast %638 : vector<2x32xf32> to vector<1x2x32xf32>
    tpu.vector_store %arg6[%c3_189, %c0_190, %c0_191], %641 {strides = array<i32>} : memref<8x2x32xf32, #tpu.memory_space<vmem>>, vector<1x2x32xf32>,
    %642 = vector.broadcast %609 : vector<2x1xf32> to vector<2x32xf32>
    %643 = arith.mulf %642, %636 : vector<2x32xf32>
    %cst_192 = arith.constant 1.000000e+00 : f32
    %644 = vector.broadcast %cst_192 : f32 to vector<2x1xf32>
    %645 = arith.subf %644, %609 : vector<2x1xf32>
    %646 = vector.broadcast %645 : vector<2x1xf32> to vector<2x32xf32>
    %647 = arith.mulf %646, %598 : vector<2x32xf32>
    %648 = arith.addf %643, %647 : vector<2x32xf32>
    %649 = vector.broadcast %609 : vector<2x1xf32> to vector<2x32xf32>
    %650 = arith.mulf %649, %634 : vector<2x32xf32>
    %cst_193 = arith.constant 1.000000e+00 : f32
    %651 = vector.broadcast %cst_193 : f32 to vector<2x1xf32>
    %652 = arith.subf %651, %609 : vector<2x1xf32>
    %653 = vector.broadcast %652 : vector<2x1xf32> to vector<2x32xf32>
    %654 = arith.mulf %653, %605 : vector<2x32xf32>
    %655 = arith.addf %650, %654 : vector<2x32xf32>
    %c2_194 = arith.constant 2 : index
    %c0_195 = arith.constant 0 : index
    %c0_196 = arith.constant 0 : index
    %656 = vector.load %arg1[%c2_194, %c0_195, %c0_196] : memref<8x2x128xf32, #tpu.memory_space<vmem>>, vector<1x2x128xf32>
    %657 = vector.shape_cast %656 : vector<1x2x128xf32> to vector<2x128xf32>
    %c2_197 = arith.constant 2 : index
    %c0_198 = arith.constant 0 : index
    %c0_199 = arith.constant 0 : index
    %658 = vector.load %arg2[%c2_197, %c0_198, %c0_199] : memref<8x2x1xf32, #tpu.memory_space<vmem>>, vector<1x2x1xf32>
    %659 = vector.shape_cast %658 : vector<1x2x1xf32> to vector<2x1xf32>
    %cst_200 = arith.constant dense<0.000000e+00> : vector<2x128xf32>
    %660 = tpu.matmul %648, %403, %cst_200 {dimension_numbers = #tpu.dot_dimension_numbers<[1], [0], [0], [1], [0, 0, 1, 1], [], []>} : vector<2x32xf32>, vector<32x128xf32>, vector<2x128xf32> -> vector<2x128xf32>
    %661 = arith.addf %657, %660 : vector<2x128xf32>
    %662 = vector.extract_strided_slice %661 {offsets = [0, 0], sizes = [2, 32], strides = [1, 1]} : vector<2x128xf32> to vector<2x32xf32>
    %663 = arith.negf %662 : vector<2x32xf32>
    %664 = math.exp %663 : vector<2x32xf32>
    %cst_201 = arith.constant 1.000000e+00 : f32
    %665 = vector.broadcast %cst_201 : f32 to vector<2x32xf32>
    %666 = arith.addf %665, %664 : vector<2x32xf32>
    %667 = arith.divf %665, %666 : vector<2x32xf32>
    %668 = vector.extract_strided_slice %661 {offsets = [0, 32], sizes = [2, 32], strides = [1, 1]} : vector<2x128xf32> to vector<2x32xf32>
    %669 = arith.negf %668 : vector<2x32xf32>
    %670 = math.exp %669 : vector<2x32xf32>
    %cst_202 = arith.constant 1.000000e+00 : f32
    %671 = vector.broadcast %cst_202 : f32 to vector<2x32xf32>
    %672 = arith.addf %671, %670 : vector<2x32xf32>
    %673 = arith.divf %671, %672 : vector<2x32xf32>
    %674 = vector.extract_strided_slice %661 {offsets = [0, 64], sizes = [2, 32], strides = [1, 1]} : vector<2x128xf32> to vector<2x32xf32>
    %675 = math.tanh %674 : vector<2x32xf32>
    %676 = vector.extract_strided_slice %661 {offsets = [0, 96], sizes = [2, 32], strides = [1, 1]} : vector<2x128xf32> to vector<2x32xf32>
    %677 = arith.negf %676 : vector<2x32xf32>
    %678 = math.exp %677 : vector<2x32xf32>
    %cst_203 = arith.constant 1.000000e+00 : f32
    %679 = vector.broadcast %cst_203 : f32 to vector<2x32xf32>
    %680 = arith.addf %679, %678 : vector<2x32xf32>
    %681 = arith.divf %679, %680 : vector<2x32xf32>
    %682 = arith.mulf %673, %655 : vector<2x32xf32>
    %683 = arith.mulf %667, %675 : vector<2x32xf32>
    %684 = arith.addf %682, %683 : vector<2x32xf32>
    %685 = math.tanh %684 : vector<2x32xf32>
    %686 = arith.mulf %681, %685 : vector<2x32xf32>
    %687 = vector.broadcast %659 : vector<2x1xf32> to vector<2x32xf32>
    %688 = arith.mulf %687, %686 : vector<2x32xf32>
    %c2_204 = arith.constant 2 : index
    %c0_205 = arith.constant 0 : index
    %c0_206 = arith.constant 0 : index
    %689 = vector.load %arg6[%c2_204, %c0_205, %c0_206] : memref<8x2x32xf32, #tpu.memory_space<vmem>>, vector<1x2x32xf32>
    %690 = vector.shape_cast %689 : vector<1x2x32xf32> to vector<2x32xf32>
    %691 = vector.shape_cast %688 : vector<2x32xf32> to vector<1x2x32xf32>
    tpu.vector_store %arg6[%c2_204, %c0_205, %c0_206], %691 {strides = array<i32>} : memref<8x2x32xf32, #tpu.memory_space<vmem>>, vector<1x2x32xf32>,
    %692 = vector.broadcast %659 : vector<2x1xf32> to vector<2x32xf32>
    %693 = arith.mulf %692, %686 : vector<2x32xf32>
    %cst_207 = arith.constant 1.000000e+00 : f32
    %694 = vector.broadcast %cst_207 : f32 to vector<2x1xf32>
    %695 = arith.subf %694, %659 : vector<2x1xf32>
    %696 = vector.broadcast %695 : vector<2x1xf32> to vector<2x32xf32>
    %697 = arith.mulf %696, %648 : vector<2x32xf32>
    %698 = arith.addf %693, %697 : vector<2x32xf32>
    %699 = vector.broadcast %659 : vector<2x1xf32> to vector<2x32xf32>
    %700 = arith.mulf %699, %684 : vector<2x32xf32>
    %cst_208 = arith.constant 1.000000e+00 : f32
    %701 = vector.broadcast %cst_208 : f32 to vector<2x1xf32>
    %702 = arith.subf %701, %659 : vector<2x1xf32>
    %703 = vector.broadcast %702 : vector<2x1xf32> to vector<2x32xf32>
    %704 = arith.mulf %703, %655 : vector<2x32xf32>
    %705 = arith.addf %700, %704 : vector<2x32xf32>
    %c1_209 = arith.constant 1 : index
    %c0_210 = arith.constant 0 : index
    %c0_211 = arith.constant 0 : index
    %706 = vector.load %arg1[%c1_209, %c0_210, %c0_211] : memref<8x2x128xf32, #tpu.memory_space<vmem>>, vector<1x2x128xf32>
    %707 = vector.shape_cast %706 : vector<1x2x128xf32> to vector<2x128xf32>
    %c1_212 = arith.constant 1 : index
    %c0_213 = arith.constant 0 : index
    %c0_214 = arith.constant 0 : index
    %708 = vector.load %arg2[%c1_212, %c0_213, %c0_214] : memref<8x2x1xf32, #tpu.memory_space<vmem>>, vector<1x2x1xf32>
    %709 = vector.shape_cast %708 : vector<1x2x1xf32> to vector<2x1xf32>
    %cst_215 = arith.constant dense<0.000000e+00> : vector<2x128xf32>
    %710 = tpu.matmul %698, %403, %cst_215 {dimension_numbers = #tpu.dot_dimension_numbers<[1], [0], [0], [1], [0, 0, 1, 1], [], []>} : vector<2x32xf32>, vector<32x128xf32>, vector<2x128xf32> -> vector<2x128xf32>
    %711 = arith.addf %707, %710 : vector<2x128xf32>
    %712 = vector.extract_strided_slice %711 {offsets = [0, 0], sizes = [2, 32], strides = [1, 1]} : vector<2x128xf32> to vector<2x32xf32>
    %713 = arith.negf %712 : vector<2x32xf32>
    %714 = math.exp %713 : vector<2x32xf32>
    %cst_216 = arith.constant 1.000000e+00 : f32
    %715 = vector.broadcast %cst_216 : f32 to vector<2x32xf32>
    %716 = arith.addf %715, %714 : vector<2x32xf32>
    %717 = arith.divf %715, %716 : vector<2x32xf32>
    %718 = vector.extract_strided_slice %711 {offsets = [0, 32], sizes = [2, 32], strides = [1, 1]} : vector<2x128xf32> to vector<2x32xf32>
    %719 = arith.negf %718 : vector<2x32xf32>
    %720 = math.exp %719 : vector<2x32xf32>
    %cst_217 = arith.constant 1.000000e+00 : f32
    %721 = vector.broadcast %cst_217 : f32 to vector<2x32xf32>
    %722 = arith.addf %721, %720 : vector<2x32xf32>
    %723 = arith.divf %721, %722 : vector<2x32xf32>
    %724 = vector.extract_strided_slice %711 {offsets = [0, 64], sizes = [2, 32], strides = [1, 1]} : vector<2x128xf32> to vector<2x32xf32>
    %725 = math.tanh %724 : vector<2x32xf32>
    %726 = vector.extract_strided_slice %711 {offsets = [0, 96], sizes = [2, 32], strides = [1, 1]} : vector<2x128xf32> to vector<2x32xf32>
    %727 = arith.negf %726 : vector<2x32xf32>
    %728 = math.exp %727 : vector<2x32xf32>
    %cst_218 = arith.constant 1.000000e+00 : f32
    %729 = vector.broadcast %cst_218 : f32 to vector<2x32xf32>
    %730 = arith.addf %729, %728 : vector<2x32xf32>
    %731 = arith.divf %729, %730 : vector<2x32xf32>
    %732 = arith.mulf %723, %705 : vector<2x32xf32>
    %733 = arith.mulf %717, %725 : vector<2x32xf32>
    %734 = arith.addf %732, %733 : vector<2x32xf32>
    %735 = math.tanh %734 : vector<2x32xf32>
    %736 = arith.mulf %731, %735 : vector<2x32xf32>
    %737 = vector.broadcast %709 : vector<2x1xf32> to vector<2x32xf32>
    %738 = arith.mulf %737, %736 : vector<2x32xf32>
    %c1_219 = arith.constant 1 : index
    %c0_220 = arith.constant 0 : index
    %c0_221 = arith.constant 0 : index
    %739 = vector.load %arg6[%c1_219, %c0_220, %c0_221] : memref<8x2x32xf32, #tpu.memory_space<vmem>>, vector<1x2x32xf32>
    %740 = vector.shape_cast %739 : vector<1x2x32xf32> to vector<2x32xf32>
    %741 = vector.shape_cast %738 : vector<2x32xf32> to vector<1x2x32xf32>
    tpu.vector_store %arg6[%c1_219, %c0_220, %c0_221], %741 {strides = array<i32>} : memref<8x2x32xf32, #tpu.memory_space<vmem>>, vector<1x2x32xf32>,
    %742 = vector.broadcast %709 : vector<2x1xf32> to vector<2x32xf32>
    %743 = arith.mulf %742, %736 : vector<2x32xf32>
    %cst_222 = arith.constant 1.000000e+00 : f32
    %744 = vector.broadcast %cst_222 : f32 to vector<2x1xf32>
    %745 = arith.subf %744, %709 : vector<2x1xf32>
    %746 = vector.broadcast %745 : vector<2x1xf32> to vector<2x32xf32>
    %747 = arith.mulf %746, %698 : vector<2x32xf32>
    %748 = arith.addf %743, %747 : vector<2x32xf32>
    %749 = vector.broadcast %709 : vector<2x1xf32> to vector<2x32xf32>
    %750 = arith.mulf %749, %734 : vector<2x32xf32>
    %cst_223 = arith.constant 1.000000e+00 : f32
    %751 = vector.broadcast %cst_223 : f32 to vector<2x1xf32>
    %752 = arith.subf %751, %709 : vector<2x1xf32>
    %753 = vector.broadcast %752 : vector<2x1xf32> to vector<2x32xf32>
    %754 = arith.mulf %753, %705 : vector<2x32xf32>
    %755 = arith.addf %750, %754 : vector<2x32xf32>
    %c0_224 = arith.constant 0 : index
    %c0_225 = arith.constant 0 : index
    %c0_226 = arith.constant 0 : index
    %756 = vector.load %arg1[%c0_224, %c0_225, %c0_226] : memref<8x2x128xf32, #tpu.memory_space<vmem>>, vector<1x2x128xf32>
    %757 = vector.shape_cast %756 : vector<1x2x128xf32> to vector<2x128xf32>
    %c0_227 = arith.constant 0 : index
    %c0_228 = arith.constant 0 : index
    %c0_229 = arith.constant 0 : index
    %758 = vector.load %arg2[%c0_227, %c0_228, %c0_229] : memref<8x2x1xf32, #tpu.memory_space<vmem>>, vector<1x2x1xf32>
    %759 = vector.shape_cast %758 : vector<1x2x1xf32> to vector<2x1xf32>
    %cst_230 = arith.constant dense<0.000000e+00> : vector<2x128xf32>
    %760 = tpu.matmul %748, %403, %cst_230 {dimension_numbers = #tpu.dot_dimension_numbers<[1], [0], [0], [1], [0, 0, 1, 1], [], []>} : vector<2x32xf32>, vector<32x128xf32>, vector<2x128xf32> -> vector<2x128xf32>
    %761 = arith.addf %757, %760 : vector<2x128xf32>
    %762 = vector.extract_strided_slice %761 {offsets = [0, 0], sizes = [2, 32], strides = [1, 1]} : vector<2x128xf32> to vector<2x32xf32>
    %763 = arith.negf %762 : vector<2x32xf32>
    %764 = math.exp %763 : vector<2x32xf32>
    %cst_231 = arith.constant 1.000000e+00 : f32
    %765 = vector.broadcast %cst_231 : f32 to vector<2x32xf32>
    %766 = arith.addf %765, %764 : vector<2x32xf32>
    %767 = arith.divf %765, %766 : vector<2x32xf32>
    %768 = vector.extract_strided_slice %761 {offsets = [0, 32], sizes = [2, 32], strides = [1, 1]} : vector<2x128xf32> to vector<2x32xf32>
    %769 = arith.negf %768 : vector<2x32xf32>
    %770 = math.exp %769 : vector<2x32xf32>
    %cst_232 = arith.constant 1.000000e+00 : f32
    %771 = vector.broadcast %cst_232 : f32 to vector<2x32xf32>
    %772 = arith.addf %771, %770 : vector<2x32xf32>
    %773 = arith.divf %771, %772 : vector<2x32xf32>
    %774 = vector.extract_strided_slice %761 {offsets = [0, 64], sizes = [2, 32], strides = [1, 1]} : vector<2x128xf32> to vector<2x32xf32>
    %775 = math.tanh %774 : vector<2x32xf32>
    %776 = vector.extract_strided_slice %761 {offsets = [0, 96], sizes = [2, 32], strides = [1, 1]} : vector<2x128xf32> to vector<2x32xf32>
    %777 = arith.negf %776 : vector<2x32xf32>
    %778 = math.exp %777 : vector<2x32xf32>
    %cst_233 = arith.constant 1.000000e+00 : f32
    %779 = vector.broadcast %cst_233 : f32 to vector<2x32xf32>
    %780 = arith.addf %779, %778 : vector<2x32xf32>
    %781 = arith.divf %779, %780 : vector<2x32xf32>
    %782 = arith.mulf %773, %755 : vector<2x32xf32>
    %783 = arith.mulf %767, %775 : vector<2x32xf32>
    %784 = arith.addf %782, %783 : vector<2x32xf32>
    %785 = math.tanh %784 : vector<2x32xf32>
    %786 = arith.mulf %781, %785 : vector<2x32xf32>
    %787 = vector.broadcast %759 : vector<2x1xf32> to vector<2x32xf32>
    %788 = arith.mulf %787, %786 : vector<2x32xf32>
    %c0_234 = arith.constant 0 : index
    %c0_235 = arith.constant 0 : index
    %c0_236 = arith.constant 0 : index
    %789 = vector.load %arg6[%c0_234, %c0_235, %c0_236] : memref<8x2x32xf32, #tpu.memory_space<vmem>>, vector<1x2x32xf32>
    %790 = vector.shape_cast %789 : vector<1x2x32xf32> to vector<2x32xf32>
    %791 = vector.shape_cast %788 : vector<2x32xf32> to vector<1x2x32xf32>
    tpu.vector_store %arg6[%c0_234, %c0_235, %c0_236], %791 {strides = array<i32>} : memref<8x2x32xf32, #tpu.memory_space<vmem>>, vector<1x2x32xf32>,
    %792 = vector.broadcast %759 : vector<2x1xf32> to vector<2x32xf32>
    %793 = arith.mulf %792, %786 : vector<2x32xf32>
    %cst_237 = arith.constant 1.000000e+00 : f32
    %794 = vector.broadcast %cst_237 : f32 to vector<2x1xf32>
    %795 = arith.subf %794, %759 : vector<2x1xf32>
    %796 = vector.broadcast %795 : vector<2x1xf32> to vector<2x32xf32>
    %797 = arith.mulf %796, %748 : vector<2x32xf32>
    %798 = arith.addf %793, %797 : vector<2x32xf32>
    %799 = vector.broadcast %759 : vector<2x1xf32> to vector<2x32xf32>
    %800 = arith.mulf %799, %784 : vector<2x32xf32>
    %cst_238 = arith.constant 1.000000e+00 : f32
    %801 = vector.broadcast %cst_238 : f32 to vector<2x1xf32>
    %802 = arith.subf %801, %759 : vector<2x1xf32>
    %803 = vector.broadcast %802 : vector<2x1xf32> to vector<2x32xf32>
    %804 = arith.mulf %803, %755 : vector<2x32xf32>
    %805 = arith.addf %800, %804 : vector<2x32xf32>
    %c0_239 = arith.constant 0 : index
    %c0_240 = arith.constant 0 : index
    %c0_241 = arith.constant 0 : index
    %806 = vector.load %arg7[%c0_239, %c0_240, %c0_241] : memref<2x2x32xf32, #tpu.memory_space<vmem>>, vector<1x2x32xf32>
    %807 = vector.shape_cast %806 : vector<1x2x32xf32> to vector<2x32xf32>
    %808 = vector.shape_cast %395 : vector<2x32xf32> to vector<1x2x32xf32>
    tpu.vector_store %arg7[%c0_239, %c0_240, %c0_241], %808 {strides = array<i32>} : memref<2x2x32xf32, #tpu.memory_space<vmem>>, vector<1x2x32xf32>,
    %c1_242 = arith.constant 1 : index
    %c0_243 = arith.constant 0 : index
    %c0_244 = arith.constant 0 : index
    %809 = vector.load %arg7[%c1_242, %c0_243, %c0_244] : memref<2x2x32xf32, #tpu.memory_space<vmem>>, vector<1x2x32xf32>
    %810 = vector.shape_cast %809 : vector<1x2x32xf32> to vector<2x32xf32>
    %811 = vector.shape_cast %798 : vector<2x32xf32> to vector<1x2x32xf32>
    tpu.vector_store %arg7[%c1_242, %c0_243, %c0_244], %811 {strides = array<i32>} : memref<2x2x32xf32, #tpu.memory_space<vmem>>, vector<1x2x32xf32>,
    %c0_245 = arith.constant 0 : index
    %c0_246 = arith.constant 0 : index
    %c0_247 = arith.constant 0 : index
    %812 = vector.load %arg8[%c0_245, %c0_246, %c0_247] : memref<2x2x32xf32, #tpu.memory_space<vmem>>, vector<1x2x32xf32>
    %813 = vector.shape_cast %812 : vector<1x2x32xf32> to vector<2x32xf32>
    %814 = vector.shape_cast %402 : vector<2x32xf32> to vector<1x2x32xf32>
    tpu.vector_store %arg8[%c0_245, %c0_246, %c0_247], %814 {strides = array<i32>} : memref<2x2x32xf32, #tpu.memory_space<vmem>>, vector<1x2x32xf32>,
    %c1_248 = arith.constant 1 : index
    %c0_249 = arith.constant 0 : index
    %c0_250 = arith.constant 0 : index
    %815 = vector.load %arg8[%c1_248, %c0_249, %c0_250] : memref<2x2x32xf32, #tpu.memory_space<vmem>>, vector<1x2x32xf32>
    %816 = vector.shape_cast %815 : vector<1x2x32xf32> to vector<2x32xf32>
    %817 = vector.shape_cast %805 : vector<2x32xf32> to vector<1x2x32xf32>
    tpu.vector_store %arg8[%c1_248, %c0_249, %c0_250], %817 {strides = array<i32>} : memref<2x2x32xf32, #tpu.memory_space<vmem>>, vector<1x2x32xf32>,
    return
  }
}

</mosaic_0001>

<bundles_post_ra>
// kernel: encoder_forward.7
= control target key start
LH: loop header
LB: loop body
LE: loop exit
PB: predicated region body
PF: predicated region fallthrough
CT: control target
= control target key end

     0   :  { %13 = vsyncpa [#allocation3], 0  ;;  %s1067_s0 = inlined_call_operand.vmem [shape: f32[2,8,64], index: 0, kind: input, shape index: {}]   ;;  %s1068_s1 = inlined_call_operand.vmem [shape: f32[2,1,8], index: 1, kind: input, shape index: {}]   ;;  %s1069_s2 = inlined_call_operand.vmem [shape: f32[64,64], index: 2, kind: input, shape index: {}]   ;;  %s1070_s3 = inlined_call_operand.vmem [shape: f32[1,64], index: 3, kind: input, shape index: {}]   ;;  %s1071_s4 = inlined_call_operand.vmem [shape: f32[64,64], index: 4, kind: input, shape index: {}]   ;;  %s1072_s5 = inlined_call_operand.vmem [shape: f32[64,64], index: 5, kind: input, shape index: {}]   ;;  %s1073_s6 = inlined_call_operand.vmem [shape: f32[64,64], index: 6, kind: input, shape index: {}]   ;;  %s1074_s7 = inlined_call_operand.vmem [shape: f32[64,64], index: 7, kind: input, shape index: {}]   ;;  %s1075_s8 = inlined_call_operand.hbm [shape: f32[2,8,64], index: 8, kind: output, shape index: {}]  }
   0x1   :  { %15 = vsyncpa [#allocation3 + $0x1], 0  ;;  %s833_s27 = smov 0   ;;  %s835_s28 = smov 0  }
   0x2   :  { %s837_s29 = smov 0   ;;  %s839_s30 = smov 0  }
   0x3 LB: > { %s854_s9 = sadd.s32 4294967295, %s785_s30   ;;  %s653_s10 = sadd.s32 4294967294, %s785_s30   ;;  %s785_s30 = sphi %s839_s30, %s1081_s30   ;;  %s781_s29 = sphi %s837_s29, %s1080_s29   ;;  %s777_s28 = sphi %s835_s28, %s1079_s28   ;;  %s773_s27 = sphi %s833_s27, %s1078_s27  }
   0x4   : > { %s858_s11 = sadd.s32 1, %s785_s30   ;;  %s206_s12 = sadd.s32 1, %s781_s29 }
   0x5   : > { %s203_s13 = ssub.s32 %s785_s30, %s858_s11  ;;  %p216_p0 = scmp.ne.s32.totalorder %s781_s29, %s777_s28 }
   0x6   : > { %p204_p1 = scmp.eq.s32.totalorder %s203_s13, 0  ;;  %p217_p2 = scmp.eq.s32.totalorder %s854_s9, 1 }
   0x7   : > { %p222_p3 = scmp.ne.s32.totalorder %s777_s28, %s773_s27  ;;  %p223_p4 = scmp.eq.s32.totalorder %s653_s10, 1 }
   0x8   : > { %s869_s14 = scalar_select %p204_p1, %s781_s29, %s206_s12  }
   0x9   : > { %p871_p5 = por %p217_p2, %p216_p0  ;;  %p875_p6 = por %p223_p4, %p222_p3 }
   0xa   : > { %p656_p7 = scmp.ge.s32.totalorder %s785_s30, 1  ;;  %p272_p8 = scmp.lt.s32.totalorder %s785_s30, 3 }
   0xc   : > { %p273_p9 = pnand %p656_p7, %p272_p8 }
   0xd   : > { %p308_p10 = scmp.lt.s32.totalorder (!%p273_p9), %s854_s9, 1  ;;  %s669_s18 = sshll.u32 (!%p273_p9), %s854_s9, 3 }
   0xe   : > { %276 = sbr.rel (%p273_p9) target bundleno = 854 (0x356), region = 52  ;;  %s580_s21 = scalar_lea.hbm (!%p273_p9), %s1075_s8, %s669_s18 }
   0xf   : > { %s584_s25 = sshll.u32 (!%p273_p9), %s580_s21, 4  ;;  %s585_s25 = int_to_ptr.hbm [resolvable:$true] %s584_s25 }
  0x13   : > { %v323_v0 = vld [vmem:[%s1069_s2 + $0x38] sm:$0xff]  ;;  %v322_v1 = vld [vmem:[%s1069_s2 + $0x30] sm:$0xff]  ;;  %v321_v2 = vld [vmem:[%s1069_s2 + $0x28] sm:$0xff]  ;;  %s309_s23 = scalar_select %p308_p10, %s854_s9, 1  ;;  %vm328_vm0 = vcmask 523264   ;;  %v787_v13 = vmov 0  }
  0x14   : > { %340 = vmatpush.msra.mxu0 %v323_v0  ;;  %v320_v3 = vld [vmem:[%s1069_s2 + $0x20] sm:$0xff]  ;;  %v319_v4 = vld [vmem:[%s1069_s2 + $0x18] sm:$0xff]  ;;  %v318_v6 = vld [vmem:[%s1069_s2 + $0x10] sm:$0xff]  ;;  %vm381_vm3 = vcmask 64512  }
  0x15   : > { %s658_s26 = sshll.u32 %s309_s23, 3  ;;  %v317_v7 = vld [vmem:[%s1069_s2 + $0x8] sm:$0xff]  ;;  %v316_v8 = vld [vmem:[%s1069_s2] sm:$0xff]  ;;  %s314_s17 = scalar_lea.vmem %s1068_s1, %s309_s23  ;;  %v444_v24 = vld [vmem:[%s1072_s5 + $0x38] sm:$0xff] }
  0x16   : > { %341 = vmatpush.msra.mxu0 %v322_v1  ;;  %s311_s13 = scalar_lea.vmem %s1067_s0, %s658_s26  ;;  %v712_v9 = vld [vmem:[%s1070_s3] ss:$0 sm:$0xff]  ;;  %v436_v25 = vld [vmem:[%s1071_s4 + $0x38] sm:$0xff]  ;;  %456 = vmatpush.msra.mxu3 %v444_v24  ;;  %v443_v28 = vld [vmem:[%s1072_s5 + $0x30] sm:$0xff]  ;;  %s737_s26 = sshra.s32 %s585_s25, 4  ;;  %s738_s26 = int_to_ptr.hbm [resolvable:$true] %s737_s26 }
  0x17   : > { %v901_v5 = vld [vmem:[%s311_s13] sm:$0xff]  ;;  %v504_v26 = vld [vmem:[%s1074_s7 + $0x38] sm:$0xff]  ;;  %v435_v29 = vld [vmem:[%s1071_s4 + $0x30] sm:$0xff]  ;;  %s739_s10 = scalar_lea.hbm %s738_s26, 8  ;;  %p744_p0 = scmp.lt.s32.totalorder %s738_s26, %s1075_s8 }
  0x18   : > { %342 = vmatpush.msra.mxu0 %v321_v2  ;;  %424 = vmatpush.msra.mxu2 %v901_v5  ;;  %v375_v12 = vld [vmem:[%s314_s17] sm:$0x1]  ;;  %v496_v27 = vld [vmem:[%s1073_s6 + $0x38] sm:$0xff]  ;;  %v503_v30 = vld [vmem:[%s1074_s7 + $0x30] sm:$0xff]  ;;  %s305_s17 = sand.u32 1, %s777_s28   ;;  %p740_p11 = scmp.ne.s32.totalorder %s738_s26, %s739_s10 }
  0x19   : > { %vm376_vm1 = vcmp.eq.f32.partialorder %v375_v12, 0.0  ;;  %v495_v31 = vld [vmem:[%s1073_s6 + $0x30] sm:$0xff]  ;;  %v442_v32 = vld [vmem:[%s1072_s5 + $0x28] sm:$0xff]  ;;  %457 = vmatpush.msra.mxu3 %v443_v28  ;;  %v441_v36 = vld [vmem:[%s1072_s5 + $0x20] sm:$0xff]  ;;  %s657_s23 = sshll.u32 %s305_s17, 3  ;;  %s570_s9 = scalar_lea.sflag [#allocation3], %s305_s17 }
  0x1a   : > { %343 = vmatpush.msra.mxu0 %v320_v3  ;;  %v377_v14 = vsel %vm376_vm1, 1, %v787_v13  ;;  %476 = vmatpush.msrb.mxu2 %v436_v25  ;;  %v434_v33 = vld [vmem:[%s1071_s4 + $0x28] sm:$0xff]  ;;  %v433_v37 = vld [vmem:[%s1071_s4 + $0x20] sm:$0xff]  ;;  %v440_v40 = vld [vmem:[%s1072_s5 + $0x18] sm:$0xff]  ;;  %s307_s22 = scalar_lea.vmem [#allocation2], %s657_s23  ;;  %p741_p12 = pnand %p740_p11, %p871_p5 }
  0x1b   : > { %v378_v15 = vperm.slane %v377_v14, 0  ;;  %v502_v34 = vld [vmem:[%s1074_s7 + $0x28] sm:$0xff]  ;;  %458 = vmatpush.msra.mxu3 %v442_v32  ;;  %v501_v38 = vld [vmem:[%s1074_s7 + $0x20] sm:$0xff]  ;;  %v432_v41 = vld [vmem:[%s1071_s4 + $0x18] sm:$0xff]  ;;  %s582_s24 = sshll.u32 %s307_s22, 4  ;;  %s743_s23 = scalar_lea.hbm %s1075_s8, 16  ;;  %s583_s24 = int_to_ptr.vmem [resolvable:$true] %s582_s24 }
  0x1c   : > { %344 = vmatpush.msra.mxu0 %v319_v4  ;;  %477 = vmatpush.msrb.mxu2 %v435_v29  ;;  %v494_v35 = vld [vmem:[%s1073_s6 + $0x28] sm:$0xff]  ;;  %v493_v39 = vld [vmem:[%s1073_s6 + $0x20] sm:$0xff]  ;;  %v500_v42 = vld [vmem:[%s1074_s7 + $0x18] sm:$0xff]  ;;  %p742_p13 = pneg %p741_p12  ;;  %p745_p1 = scmp.lt.s32.totalorder %s743_s23, %s739_s10 }
  0x1d   : > { %vm379_vm2 = vcmp.eq.s32.totalorder %v378_v15, 1  ;;  %459 = vmatpush.msra.mxu3 %v441_v36  ;;  %v492_v43 = vld [vmem:[%s1073_s6 + $0x18] sm:$0xff]  ;;  %v439_v44 = vld [vmem:[%s1072_s5 + $0x10] sm:$0xff]  ;;  %v438_v48 = vld [vmem:[%s1072_s5 + $0x8] sm:$0xff] }
  0x1e   : > { %345 = vmatpush.msra.mxu0 %v318_v6  ;;  %478 = vmatpush.msrb.mxu2 %v434_v33  ;;  %v431_v45 = vld [vmem:[%s1071_s4 + $0x10] sm:$0xff]  ;;  %v430_v49 = vld [vmem:[%s1071_s4 + $0x8] sm:$0xff]  ;;  %v437_v0 = vld [vmem:[%s1072_s5] sm:$0xff]  ;;  %p746_p2 = por %p745_p1, %p744_p0 }
  0x1f   : > { %460 = vmatpush.msra.mxu3 %v440_v40  ;;  %v499_v46 = vld [vmem:[%s1074_s7 + $0x10] sm:$0xff]  ;;  %v498_v50 = vld [vmem:[%s1074_s7 + $0x8] sm:$0xff]  ;;  %v429_v1 = vld [vmem:[%s1071_s4] sm:$0xff] }
  0x20   : > { %346 = vmatpush.msra.mxu0 %v317_v7  ;;  %479 = vmatpush.msrb.mxu2 %v433_v37  ;;  %v491_v47 = vld [vmem:[%s1073_s6 + $0x10] sm:$0xff]  ;;  %v490_v51 = vld [vmem:[%s1073_s6 + $0x8] sm:$0xff]  ;;  %v497_v2 = vld [vmem:[%s1074_s7] sm:$0xff]  ;;  %p747_p3 = pnand %p746_p2, %p742_p13 }
  0x21   : > { %461 = vmatpush.msra.mxu3 %v439_v44  ;;  %v489_v3 = vld [vmem:[%s1073_s6] sm:$0xff] }
  0x22   : > { %347 = vmatpush.msra.mxu0 %v316_v8  ;;  %480 = vmatpush.msrb.mxu2 %v432_v41 }
  0x23   : > { %659 = vmatmul.msk.f32.vlgmr.msra.gmra.mxu0 %vm328_vm0, %v901_v5  ;;  %462 = vmatpush.msra.mxu3 %v438_v48 }
  0x24   : > { %533 = vmatpush.msrb.mxu0 %v496_v27  ;;  %481 = vmatpush.msrb.mxu2 %v431_v45 }
  0x25   : > { %463 = vmatpush.msra.mxu3 %v437_v0 }
  0x26   : > { %534 = vmatpush.msrb.mxu0 %v495_v31  ;;  %482 = vmatpush.msrb.mxu2 %v430_v49 }
  0x28   : > { %535 = vmatpush.msrb.mxu0 %v494_v35  ;;  %483 = vmatpush.msrb.mxu2 %v429_v1 }
  0x2a   : > { %536 = vmatpush.msrb.mxu0 %v493_v39 }
  0x2c   : > { %537 = vmatpush.msrb.mxu0 %v492_v43 }
  0x2e   : > { %538 = vmatpush.msrb.mxu0 %v491_v47 }
  0x30   : > { %539 = vmatpush.msrb.mxu0 %v490_v51 }
  0x32   : > { %540 = vmatpush.msrb.mxu0 %v489_v3 }
  0x33   : > { %666 = vmatmul.msk.f32.vlgmr.msrb.gmra.mxu0 %vm328_vm0, %v901_v5 }
  0xa0   : > { %v349_v10 = vpop.f32.mrf.mxu0 }
  0xa1   : > { %v350_v11 = vadd.f32 %v712_v9, %v349_v10 }
  0xa3   : > { %660 = vmatpush.xpose.msk.msra.mxu1 %vm328_vm0, %v350_v11 }
  0xa6   : > { %661 = vmatmul.msk.f32.vlgmr.msra.gmra.mxu1 %vm328_vm0, %v901_v5 }
  0xa7   : > { %513 = vmatpush.msrb.mxu1 %v504_v26 }
  0xa9   : > { %514 = vmatpush.msrb.mxu1 %v503_v30 }
  0xab   : > { %515 = vmatpush.msrb.mxu1 %v502_v34 }
  0xad   : > { %516 = vmatpush.msrb.mxu1 %v501_v38 }
  0xaf   : > { %517 = vmatpush.msrb.mxu1 %v500_v42 }
  0xb0   : > { %v542_v6 = vpop.f32.mrf.mxu0 }
  0xb1   : > { %518 = vmatpush.msrb.mxu1 %v499_v46 }
  0xb3   : > { %519 = vmatpush.msrb.mxu1 %v498_v50 }
  0xb5   : > { %520 = vmatpush.msrb.mxu1 %v497_v2 }
 0x123   : > { %v372_v16 = vpop.f32.mrf.mxu1 }
 0x124   : > { %v380_v17 = vsel %vm379_vm2, -1e+12, %v372_v16 }
 0x125   : > { %v382_v18 = vsel %vm381_vm3, %v380_v17, -inf }
 0x126   : > { %383 = vmax.xlane.f32.xlu0 %v382_v18 }
 0x199   : > { %v384_v19 = vpop.xlane.xlu0 %383 }
 0x19a   : > { %v385_v20 = vsub.f32 %v380_v17, %v384_v19 }
 0x19c   : > { %v386_v21 = vmul.f32 1.442695, %v385_v20 }
 0x19e   : > { %713 = vpow2.f32 %v386_v21 }
 0x1a4   : > { %v925_v22 = vpop.eup %713 }
 0x1a5   : > { %v388_v23 = vsel %vm381_vm3, %v925_v22, 0.0 }
 0x1a6   : > { %389 = vadd.xlane.f32.xlu0 %v388_v23 }
 0x219   : > { %v390_v52 = vpop.xlane.xlu0 %389 }
 0x21a   : > { %715 = vrcp.f32 %v390_v52  ;;  %v402_v56 = vand.u32 2147483648, %v390_v52  ;;  %v400_v58 = vand.u32 2147483647, %v390_v52  ;;  %vm396_vm5 = vweird.f32 %v390_v52 }
 0x21c   : > { %v403_v60 = vor.u32 1.1754944e-38, %v402_v56  ;;  %vm401_vm7 = vcmp.eq.f32.partialorder %v400_v58, 8.507059e+37 }
 0x220   : > { %v716_v53 = vpop.eup %715 }
 0x221   : > { %v392_v54 = vmul.f32 %v716_v53, %v390_v52  ;;  %vm397_vm4 = vweird.f32 %v716_v53 }
 0x222   : > { %vm398_vm6 = vmor %vm396_vm5, %vm397_vm4 }
 0x223   : > { %v393_v55 = vsub.f32 1.0, %v392_v54 }
 0x225   : > { %v394_v57 = vmul.f32 %v716_v53, %v393_v55 }
 0x227   : > { %v395_v59 = vadd.f32 %v716_v53, %v394_v57 }
 0x229   : > { %v399_v61 = vsel %vm398_vm6, %v716_v53, %v395_v59 }
 0x22a   : > { %v404_v62 = vsel %vm401_vm7, %v403_v60, %v399_v61 }
 0x22b   : > { %v405_v63 = vmul.f32 %v925_v22, %v404_v62 }
 0x22d   : > { %662 = vmatmul.msk.f32.vlgmr.msra.gmra.mxu2 %vm381_vm3, %v405_v63 }
 0x235   : > { %664 = vmatmul.msk.f32.vlgmr.msrb.gmra.mxu2 %vm328_vm0, %v901_v5 }
 0x2b0   : > { %v426_v4 = vpop.f32.mrf.mxu2 }
 0x2b1   : > { %663 = vmatmul.msk.f32.vlgmr.msra.gmra.mxu3 %vm328_vm0, %v426_v4  ;;  %665 = vmatmul.msk.f32.vlgmr.msrb.gmra.mxu1 %vm328_vm0, %v426_v4 }
 0x2b8   : > { %v485_v13 = vpop.f32.mrf.mxu2 }
 0x32e   : > { %v522_v7 = vpop.f32.mrf.mxu1 }
 0x32f   : > { %v543_v8 = vadd.f32 %v542_v6, %v522_v7 }
 0x331   : > { %v667_v9 = vmul.f32 -1.442695, %v543_v8 }
 0x333   : > { %717 = vpow2.f32 %v667_v9 }
 0x334   : > { %v465_v12 = vpop.f32.mrf.mxu3 }
 0x335   : > { %v486_v16 = vadd.f32 %v485_v13, %v465_v12 }
 0x339   : > { %v718_v10 = vpop.eup %717 }
 0x33a   : > { %v548_v11 = vadd.f32 1.0, %v718_v10 }
 0x33c   : > { %719 = vrcp.f32 %v548_v11  ;;  %v560_v18 = vand.u32 2147483648, %v548_v11  ;;  %v558_v20 = vand.u32 2147483647, %v548_v11  ;;  %vm554_vm9 = vweird.f32 %v548_v11 }
 0x33d   : > { %721 = vtanh.f32 %v486_v16 }
 0x33e   : > { %v561_v22 = vor.u32 1.1754944e-38, %v560_v18  ;;  %vm559_vm11 = vcmp.eq.f32.partialorder %v558_v20, 8.507059e+37 }
 0x342   : > { %v720_v14 = vpop.eup %719 }
 0x343   : > { %v550_v15 = vmul.f32 %v720_v14, %v548_v11  ;;  %vm555_vm8 = vweird.f32 %v720_v14  ;;  %v722_v26 = vpop.eup %721 }
 0x344   : > { %vm556_vm10 = vmor %vm554_vm9, %vm555_vm8 }
 0x345   : > { %v551_v17 = vsub.f32 1.0, %v550_v15 }
 0x347   : > { %v552_v19 = vmul.f32 %v720_v14, %v551_v17 }
 0x349   : > { %v553_v21 = vadd.f32 %v720_v14, %v552_v19 }
 0x34b   : > { %v557_v23 = vsel %vm556_vm10, %v720_v14, %v553_v21 }
 0x34c   : > { %v562_v24 = vsel %vm559_vm11, %v561_v22, %v557_v23 }
 0x34d   : > { %v565_v25 = vsub.f32 1.0, %v562_v24  ;;  %v564_v27 = vmul.f32 %v722_v26, %v562_v24 }
 0x34f   : > { %v566_v28 = vmul.f32 %v565_v25, %v901_v5 }
 0x351   : > { %v567_v29 = vadd.f32 %v566_v28, %v564_v27 }
 0x353   : > { %568 = vst.msk [vmem:[%s307_s22] sm:$0xff] %vm328_vm0, %v567_v29 }
 0x354   : > { %750 = shalt.err (!%p747_p3)
}
 0x355   : > { %672 = dma.vmem_to_hbm [thread:$0]  (%p871_p5), %s583_s24, 128, %s585_s25, %s570_s9  }
 0x356 PF: > { %p678_p4 = scmp.ge.s32.totalorder %s785_s30, 2  ;;  %s596_s17 = sand.u32 1, %s773_s27  }
 0x357   : > { %s597_s20 = scalar_lea.sflag [#allocation3], %s596_s17 }
 0x358   : > { %p675_p7 = pnand %p678_p4, %p875_p6 }
 0x35a   : > { %p676_p8 = pneg %p675_p7 }
 0x35c   : > { %768 = dma.done.wait (%p676_p8), %s597_s20, 128  }
 0x35d   : > { %770 = vsyncadd (%p676_p8), %s597_s20, 4294967168  ;;  %p18_p9 = scmp.ge.s32.totalorder %s858_s11, 4   ;;  %s1078_s27 = smov %s777_s28 }
 0x35e   : > { %s1079_s28 = smov %s781_s29  ;;  %s1080_s29 = smov %s869_s14 }
 0x35f   : > { %s1081_s30 = smov %s858_s11  ;;  %20 = sbr.rel (!%p18_p9) target bundleno = 3 (0x3), region = 90 }
 0x364   :  { %603 = vsyncpa [#allocation3], 1 }
 0x365   :  { %605 = vsyncpa [#allocation3 + $0x1], 1 }

// kernel: encoder_forward.4
= control target key start
LH: loop header
LB: loop body
LE: loop exit
PB: predicated region body
PF: predicated region fallthrough
CT: control target
= control target key end

     0   :  { %vm101_vm0 = vcmask 130048   ;;  %vm215_vm1 = vcmask 64512   ;;  %vm305_vm2 = vcmask 60416   ;;  %vm392_vm3 = vcmask 1041409   ;;  %s1086_s3 = inlined_call_operand.vmem [shape: f32[16,8], index: 3, kind: input, shape index: {}]   ;;  %s1087_s0 = inlined_call_operand.vmem [shape: f32[16,4,16], index: 0, kind: input, shape index: {}]   ;;  %s1088_s4 = inlined_call_operand.vmem [shape: f32[8,8], index: 4, kind: input, shape index: {}]   ;;  %s1089_s1 = inlined_call_operand.vmem [shape: f32[16,4,8], index: 1, kind: input, shape index: {}]   ;;  %s1090_s2 = inlined_call_operand.vmem [shape: f32[16,4], index: 2, kind: input, shape index: {}]   ;;  %s1091_s5 = inlined_call_operand.vmem [shape: f32[16,16], index: 5, kind: output, shape index: {}]  }
   0x1   :  { %v53_v0 = vld [vmem:[%s1086_s3 + $0x8] sm:$0xff]  ;;  %v52_v1 = vld [vmem:[%s1086_s3] sm:$0xff]  ;;  %v867_v10 = vld [vmem:[%s1087_s0 + $0x10] sm:$0xf]  ;;  %vm394_vm4 = vcmask 1042434   ;;  %vm396_vm5 = vcmask 1043459  }
   0x2   :  { %v830_v2 = vld [vmem:[%s1087_s0] sm:$0xf]  ;;  %132 = vmatpush.msra.mxu0 %v53_v0  ;;  %761 = vmatpush.msra.mxu2 %v53_v0  ;;  %v835_v3 = vld [vmem:[%s1087_s0 + $0x4] sm:$0xf]  ;;  %v845_v5 = vld [vmem:[%s1087_s0 + $0x8] sm:$0xf] }
   0x3   :  { %70 = vst [vmem:[#allocation1] ss:$2 sm:$0xff] %v830_v2  ;;  %v167_v4 = vld [vmem:[%s1088_s4] sm:$0xff]  ;;  %v850_v6 = vld [vmem:[%s1087_s0 + $0xc] sm:$0xf]  ;;  %vm398_vm6 = vcmask 1044484  }
   0x4   :  { %72 = vst [vmem:[#allocation1 + $0x1] ss:$2 sm:$0xff] %v835_v3  ;;  %133 = vmatpush.msra.mxu0 %v52_v1  ;;  %762 = vmatpush.msra.mxu2 %v52_v1  ;;  %v857_v7 = vld [vmem:[%s1087_s0 + $0x20] sm:$0xf]  ;;  %v862_v8 = vld [vmem:[%s1087_s0 + $0x24] sm:$0xf] }
   0x5   :  { %247 = vmatpush.msra.mxu1 %v167_v4  ;;  %763 = vmatpush.msra.mxu3 %v167_v4  ;;  %74 = vst [vmem:[#allocation1 + $0x10] ss:$2 sm:$0xff] %v845_v5  ;;  %v874_v11 = vld [vmem:[%s1087_s0 + $0x14] sm:$0xf]  ;;  %v880_v12 = vld [vmem:[%s1087_s0 + $0x28] sm:$0xf] }
   0x6   :  { %76 = vst [vmem:[#allocation1 + $0x11] ss:$2 sm:$0xff] %v850_v6  ;;  %v885_v13 = vld [vmem:[%s1087_s0 + $0x2c] sm:$0xf]  ;;  %v891_v14 = vld [vmem:[%s1087_s0 + $0x18] sm:$0xf] }
   0x7   :  { %78 = vst [vmem:[#allocation1 + $0x20] ss:$2 sm:$0xff] %v867_v10  ;;  %v898_v16 = vld [vmem:[%s1087_s0 + $0x1c] sm:$0xf]  ;;  %v36_v17 = vld [vmem:[%s1089_s1] sm:$0xf] }
   0x8   :  { %80 = vst [vmem:[#allocation1 + $0x21] ss:$2 sm:$0xff] %v874_v11  ;;  %v37_v18 = vld [vmem:[%s1089_s1 + $0x4] sm:$0xf]  ;;  %v913_v20 = vld [vmem:[%s1087_s0 + $0x30] sm:$0xf] }
   0x9   :  { %82 = vst [vmem:[#allocation1 + $0x30] ss:$2 sm:$0xff] %v891_v14  ;;  %v38_v21 = vld [vmem:[%s1089_s1 + $0x8] sm:$0xf]  ;;  %v922_v22 = vld [vmem:[%s1087_s0 + $0x34] sm:$0xf] }
   0xa   :  { %84 = vst [vmem:[#allocation1 + $0x31] ss:$2 sm:$0xff] %v898_v16  ;;  %v39_v24 = vld [vmem:[%s1089_s1 + $0xc] sm:$0xf]  ;;  %v931_v25 = vld [vmem:[%s1087_s0 + $0x38] sm:$0xf] }
   0xb   :  { %v85_v9 = vld.sshfl [vmem:[#allocation1] sm:$0xff pattern:$0x75316420]  ;;  %v937_v27 = vld [vmem:[%s1087_s0 + $0x3c] sm:$0xf]  ;;  %vm400_vm7 = vcmask 1045509  }
   0xc   :  { %745 = vmatmul.msk.f32.vlgmr.msra.gmra.mxu0 %vm101_vm0, %v85_v9  ;;  %89 = vst [vmem:[#allocation1] ss:$2 sm:$0xff] %v857_v7  ;;  %v44_v29 = vld [vmem:[%s1089_s1 + $0x20] sm:$0xf]  ;;  %v45_v30 = vld [vmem:[%s1089_s1 + $0x24] sm:$0xf] }
   0xd   :  { %90 = vst [vmem:[#allocation1 + $0x1] ss:$2 sm:$0xff] %v862_v8  ;;  %v86_v15 = vld.sshfl [vmem:[#allocation1 + $0x10] sm:$0xff pattern:$0x75316420]  ;;  %vm402_vm8 = vcmask 1046534  }
   0xe   :  { %91 = vst [vmem:[#allocation1 + $0x10] ss:$2 sm:$0xff] %v880_v12  ;;  %v40_v32 = vld [vmem:[%s1089_s1 + $0x10] sm:$0xf]  ;;  %v46_v33 = vld [vmem:[%s1089_s1 + $0x28] sm:$0xf] }
   0xf   :  { %92 = vst [vmem:[#allocation1 + $0x11] ss:$2 sm:$0xff] %v885_v13  ;;  %v87_v23 = vld.sshfl [vmem:[#allocation1 + $0x20] sm:$0xff pattern:$0x75316420]  ;;  %vm404_vm9 = vcmask 1047559  }
  0x10   :  { %93 = vst [vmem:[#allocation1 + $0x20] ss:$2 sm:$0xff] %v913_v20  ;;  %v41_v34 = vld [vmem:[%s1089_s1 + $0x14] sm:$0xf]  ;;  %v47_v36 = vld [vmem:[%s1089_s1 + $0x2c] sm:$0xf] }
  0x11   :  { %94 = vst [vmem:[#allocation1 + $0x21] ss:$2 sm:$0xff] %v922_v22  ;;  %v88_v28 = vld.sshfl [vmem:[#allocation1 + $0x30] sm:$0xff pattern:$0x75316420]  ;;  %vm417_vm11 = vcmask 31744  }
  0x12   :  { %95 = vst [vmem:[#allocation1 + $0x30] ss:$2 sm:$0xff] %v931_v25  ;;  %v42_v37 = vld [vmem:[%s1089_s1 + $0x18] sm:$0xf]  ;;  %v43_v39 = vld [vmem:[%s1089_s1 + $0x1c] sm:$0xf] }
  0x13   :  { %96 = vst [vmem:[#allocation1 + $0x31] ss:$2 sm:$0xff] %v937_v27  ;;  %v48_v41 = vld [vmem:[%s1089_s1 + $0x30] sm:$0xf]  ;;  %v49_v42 = vld [vmem:[%s1089_s1 + $0x34] sm:$0xf] }
  0x14   :  { %v97_v19 = vld.sshfl [vmem:[#allocation1] sm:$0xff pattern:$0x75316420]  ;;  %746 = vmatmul.msk.f32.gmra.mxu0 %vm101_vm0, %v86_v15  ;;  %v50_v44 = vld [vmem:[%s1089_s1 + $0x38] sm:$0xf] }
  0x15   :  { %749 = vmatmul.msk.f32.vlgmr.msra.gmra.mxu2 %vm101_vm0, %v97_v19  ;;  %184 = vst [vmem:[#allocation1] ss:$2 sm:$0xff] %v36_v17  ;;  %v51_v46 = vld [vmem:[%s1089_s1 + $0x3c] sm:$0xf] }
  0x16   :  { %186 = vst [vmem:[#allocation1 + $0x1] ss:$2 sm:$0xff] %v37_v18  ;;  %v98_v26 = vld.sshfl [vmem:[#allocation1 + $0x10] sm:$0xff pattern:$0x75316420] }
  0x17   :  { %188 = vst [vmem:[#allocation1 + $0x10] ss:$2 sm:$0xff] %v38_v21 }
  0x18   :  { %190 = vst [vmem:[#allocation1 + $0x11] ss:$2 sm:$0xff] %v39_v24  ;;  %v99_v35 = vld.sshfl [vmem:[#allocation1 + $0x20] sm:$0xff pattern:$0x75316420] }
  0x19   :  { %192 = vst [vmem:[#allocation1 + $0x20] ss:$2 sm:$0xff] %v40_v32 }
  0x1a   :  { %194 = vst [vmem:[#allocation1 + $0x21] ss:$2 sm:$0xff] %v41_v34  ;;  %v100_v40 = vld.sshfl [vmem:[#allocation1 + $0x30] sm:$0xff pattern:$0x75316420] }
  0x1b   :  { %196 = vst [vmem:[#allocation1 + $0x30] ss:$2 sm:$0xff] %v42_v37 }
  0x1c   :  { %747 = vmatmul.msk.f32.gmra.mxu0 %vm101_vm0, %v87_v23  ;;  %198 = vst [vmem:[#allocation1 + $0x31] ss:$2 sm:$0xff] %v43_v39 }
  0x1d   :  { %v199_v31 = vld.sshfl [vmem:[#allocation1] sm:$0xff pattern:$0x75316420]  ;;  %750 = vmatmul.msk.f32.gmra.mxu2 %vm101_vm0, %v98_v26 }
  0x1e   :  { %203 = vst [vmem:[#allocation1] ss:$2 sm:$0xff] %v44_v29  ;;  %753 = vmatmul.msk.f32.vlgmr.msra.gmra.mxu1 %vm215_vm1, %v199_v31 }
  0x1f   :  { %204 = vst [vmem:[#allocation1 + $0x1] ss:$2 sm:$0xff] %v45_v30  ;;  %v200_v38 = vld.sshfl [vmem:[#allocation1 + $0x10] sm:$0xff pattern:$0x75316420] }
  0x20   :  { %205 = vst [vmem:[#allocation1 + $0x10] ss:$2 sm:$0xff] %v46_v33 }
  0x21   :  { %206 = vst [vmem:[#allocation1 + $0x11] ss:$2 sm:$0xff] %v47_v36  ;;  %v201_v43 = vld.sshfl [vmem:[#allocation1 + $0x20] sm:$0xff pattern:$0x75316420] }
  0x22   :  { %207 = vst [vmem:[#allocation1 + $0x20] ss:$2 sm:$0xff] %v48_v41 }
  0x23   :  { %208 = vst [vmem:[#allocation1 + $0x21] ss:$2 sm:$0xff] %v49_v42  ;;  %v202_v47 = vld.sshfl [vmem:[#allocation1 + $0x30] sm:$0xff pattern:$0x75316420] }
  0x24   :  { %748 = vmatmul.msk.f32.gmra.mxu0 %vm101_vm0, %v88_v28  ;;  %209 = vst [vmem:[#allocation1 + $0x30] ss:$2 sm:$0xff] %v50_v44 }
  0x25   :  { %751 = vmatmul.msk.f32.gmra.mxu2 %vm101_vm0, %v99_v35  ;;  %210 = vst [vmem:[#allocation1 + $0x31] ss:$2 sm:$0xff] %v51_v46 }
  0x26   :  { %754 = vmatmul.msk.f32.gmra.mxu1 %vm215_vm1, %v200_v38  ;;  %v211_v50 = vld.sshfl [vmem:[#allocation1] sm:$0xff pattern:$0x75316420] }
  0x28   :  { %v212_v45 = vld.sshfl [vmem:[#allocation1 + $0x10] sm:$0xff pattern:$0x75316420] }
  0x29   :  { %758 = vmatmul.msk.f32.vlgmr.msra.gmra.mxu3 %vm215_vm1, %v212_v45 }
  0x2a   :  { %v213_v48 = vld.sshfl [vmem:[#allocation1 + $0x20] sm:$0xff pattern:$0x75316420] }
  0x2c   :  { %v214_v49 = vld.sshfl [vmem:[#allocation1 + $0x30] sm:$0xff pattern:$0x75316420] }
  0x2d   :  { %752 = vmatmul.msk.f32.gmra.mxu2 %vm101_vm0, %v100_v40 }
  0x2e   :  { %755 = vmatmul.msk.f32.gmra.mxu1 %vm215_vm1, %v201_v43 }
  0x31   :  { %759 = vmatmul.msk.f32.gmra.mxu3 %vm215_vm1, %v213_v48 }
  0x36   :  { %756 = vmatmul.msk.f32.gmra.mxu1 %vm215_vm1, %v202_v47 }
  0x39   :  { %760 = vmatmul.msk.f32.gmra.mxu3 %vm215_vm1, %v214_v49 }
  0x3e   :  { %757 = vmatmul.msk.f32.gmra.mxu1 %vm215_vm1, %v211_v50 }
  0x89   :  { %v135_v51 = vpop.f32.mrf.mxu0 }
  0x8a   :  { %767 = vtanh.f32 %v135_v51 }
  0x90   :  { %v768_v53 = vpop.eup %767 }
  0x91   :  { %v138_v52 = vpop.f32.mrf.mxu0 }
  0x92   :  { %769 = vtanh.f32 %v138_v52 }
  0x98   :  { %v147_v54 = vpop.f32.mrf.mxu2  ;;  %v770_v58 = vpop.eup %769 }
  0x99   :  { %v141_v63 = vpop.f32.mrf.mxu0 }
  0x9b   :  { %v249_v55 = vpop.f32.mrf.mxu1 }
  0x9c   :  { %v273_v56 = vmul.f32 %v768_v53, %v249_v55 }
  0x9e   :  { %v306_v57 = vsel %vm305_vm2, %v273_v56, 0.0  ;;  %v289_v59 = vrot.slane %v273_v56, 4 }
  0x9f   :  { %307 = vadd.xlane.f32.xlu0 %v306_v57 }
  0xa0   :  { %v150_v60 = vpop.f32.mrf.mxu2  ;;  %v309_v0 = vsel %vm305_vm2, %v289_v59, 0.0 }
  0xa1   :  { %771 = vtanh.f32 %v150_v60  ;;  %v144_v24 = vpop.f32.mrf.mxu0 }
  0xa2   :  { %773 = vtanh.f32 %v141_v63 }
  0xa3   :  { %v252_v61 = vpop.f32.mrf.mxu1 }
  0xa4   :  { %v274_v62 = vmul.f32 %v770_v58, %v252_v61 }
  0xa6   :  { %v312_v1 = vsel %vm305_vm2, %v274_v62, 0.0  ;;  %v290_v4 = vrot.slane %v274_v62, 4 }
  0xa7   :  { %310 = vadd.xlane.f32.xlu0 %v309_v0  ;;  %313 = vadd.xlane.f32.xlu2 %v312_v1  ;;  %v772_v17 = vpop.eup %771  ;;  %v374_v1 = vlaneseq }
  0xa8   :  { %v153_v15 = vpop.f32.mrf.mxu2  ;;  %v774_v18 = vpop.eup %773  ;;  %v315_v21 = vsel %vm305_vm2, %v290_v4, 0.0 }
  0xa9   :  { %775 = vtanh.f32 %v153_v15 }
  0xaa   :  { %777 = vtanh.f32 %v144_v24 }
  0xab   :  { %v255_v9 = vpop.f32.mrf.mxu1  ;;  %779 = vtanh.f32 %v147_v54 }
  0xac   :  { %v264_v19 = vpop.f32.mrf.mxu3  ;;  %v275_v26 = vmul.f32 %v774_v18, %v255_v9 }
  0xad   :  { %v278_v23 = vmul.f32 %v772_v17, %v264_v19  ;;  %v375_v17 = vand.u32 127, %v374_v1 }
  0xae   :  { %v291_v34 = vrot.slane %v275_v26, 4  ;;  %v318_v37 = vsel %vm305_vm2, %v275_v26, 0.0 }
  0xaf   :  { %316 = vadd.xlane.f32.xlu0 %v315_v21  ;;  %v336_v28 = vsel %vm305_vm2, %v278_v23, 0.0  ;;  %v294_v29 = vrot.slane %v278_v23, 4  ;;  %v776_v33 = vpop.eup %775 }
  0xb0   :  { %337 = vadd.xlane.f32.xlu2 %v336_v28  ;;  %v156_v32 = vpop.f32.mrf.mxu2  ;;  %v778_v38 = vpop.eup %777  ;;  %v321_v39 = vsel %vm305_vm2, %v291_v34, 0.0 }
  0xb1   :  { %v339_v30 = vsel %vm305_vm2, %v294_v29, 0.0  ;;  %781 = vtanh.f32 %v156_v32  ;;  %v780_v41 = vpop.eup %779 }
  0xb2   :  { %340 = vadd.xlane.f32.xlu1 %v339_v30 }
  0xb3   :  { %v258_v31 = vpop.f32.mrf.mxu1 }
  0xb4   :  { %v267_v35 = vpop.f32.mrf.mxu3  ;;  %v276_v42 = vmul.f32 %v778_v38, %v258_v31 }
  0xb5   :  { %v279_v36 = vmul.f32 %v776_v33, %v267_v35 }
  0xb6   :  { %v324_v48 = vsel %vm305_vm2, %v276_v42, 0.0  ;;  %v292_v53 = vrot.slane %v276_v42, 4 }
  0xb7   :  { %v342_v40 = vsel %vm305_vm2, %v279_v36, 0.0  ;;  %v295_v44 = vrot.slane %v279_v36, 4  ;;  %v782_v45 = vpop.eup %781  ;;  %v354_v36 = vld [vmem:[%s1090_s2] sm:$0xff] }
  0xb8   :  { %319 = vadd.xlane.f32.xlu2 %v318_v37  ;;  %343 = vadd.xlane.f32.xlu0 %v342_v40  ;;  %v327_v56 = vsel %vm305_vm2, %v292_v53, 0.0  ;;  %vm356_vm10 = vcmp.ne.f32.partialorder %v354_v36, 0.0 }
  0xb9   :  { %v345_v49 = vsel %vm305_vm2, %v295_v44, 0.0 }
  0xba   :  { %322 = vadd.xlane.f32.xlu1 %v321_v39 }
  0xbb   :  { %v261_v43 = vpop.f32.mrf.mxu1 }
  0xbc   :  { %v277_v46 = vmul.f32 %v780_v41, %v261_v43  ;;  %v270_v47 = vpop.f32.mrf.mxu3 }
  0xbd   :  { %v280_v50 = vmul.f32 %v782_v45, %v270_v47 }
  0xbe   :  { %v330_v51 = vsel %vm305_vm2, %v277_v46, 0.0  ;;  %v293_v54 = vrot.slane %v277_v46, 4 }
  0xbf   :  { %v296_v52 = vrot.slane %v280_v50, 4  ;;  %v348_v58 = vsel %vm305_vm2, %v280_v50, 0.0 }
  0xc0   :  { %325 = vadd.xlane.f32.xlu0 %v324_v48  ;;  %346 = vadd.xlane.f32.xlu2 %v345_v49  ;;  %v333_v57 = vsel %vm305_vm2, %v293_v54, 0.0  ;;  %v355_v54 = vld [vmem:[%s1090_s2 + $0x8] sm:$0xff] }
  0xc1   :  { %v351_v55 = vsel %vm305_vm2, %v296_v52, 0.0  ;;  %vm357_vm12 = vcmp.ne.f32.partialorder %v355_v54, 0.0 }
  0xc2   :  { %331 = vadd.xlane.f32.xlu1 %v330_v51 }
  0xc8   :  { %328 = vadd.xlane.f32.xlu2 %v327_v56  ;;  %352 = vadd.xlane.f32.xlu0 %v351_v55 }
  0xca   :  { %334 = vadd.xlane.f32.xlu1 %v333_v57 }
  0xd2   :  { %349 = vadd.xlane.f32.xlu1 %v348_v58 }
 0x112   :  { %v308_v59 = vpop.xlane.xlu0 %307 }
 0x113   :  { %v376_v19 = vperm.slane %v308_v59, %v375_v17 }
 0x11a   :  { %v311_v60 = vpop.xlane.xlu0 %310  ;;  %v314_v61 = vpop.xlane.xlu2 %313 }
 0x11b   :  { %v377_v18 = vperm.slane %v311_v60, %v375_v17  ;;  %v378_v21 = vperm.slane %v314_v61, %v375_v17 }
 0x11d   :  { %v393_v24 = vsel %vm392_vm3, %v377_v18, %v376_v19 }
 0x11e   :  { %v395_v31 = vsel %vm394_vm4, %v378_v21, %v393_v24 }
 0x122   :  { %v317_v62 = vpop.xlane.xlu0 %316 }
 0x123   :  { %v338_v63 = vpop.xlane.xlu2 %337  ;;  %v379_v26 = vperm.slane %v317_v62, %v375_v17 }
 0x124   :  { %v386_v45 = vperm.slane %v338_v63, %v375_v17 }
 0x125   :  { %v341_v0 = vpop.xlane.xlu1 %340  ;;  %v397_v32 = vsel %vm396_vm5, %v379_v26, %v395_v31 }
 0x126   :  { %v387_v47 = vperm.slane %v341_v0, %v375_v17 }
 0x12b   :  { %v320_v4 = vpop.xlane.xlu2 %319  ;;  %v344_v9 = vpop.xlane.xlu0 %343 }
 0x12c   :  { %v380_v28 = vperm.slane %v320_v4, %v375_v17  ;;  %v388_v51 = vperm.slane %v344_v9, %v375_v17 }
 0x12d   :  { %v323_v15 = vpop.xlane.xlu1 %322 }
 0x12e   :  { %v381_v33 = vperm.slane %v323_v15, %v375_v17  ;;  %v399_v34 = vsel %vm398_vm6, %v380_v28, %v397_v32  ;;  %v468_v28 = vshrl.u32 %v374_v1, 7 }
 0x130   :  { %v401_v38 = vsel %vm400_vm7, %v381_v33, %v399_v34  ;;  %766 = vset.pattern.permute.xlu1 %v468_v28  ;;  %765 = vset.pattern.permute.xlu0 %v468_v28 }
 0x131   :  { %764 = vset.pattern.permute.xlu2 %v468_v28 }
 0x133   :  { %v347_v23 = vpop.xlane.xlu2 %346  ;;  %v326_v30 = vpop.xlane.xlu0 %325 }
 0x134   :  { %v382_v35 = vperm.slane %v326_v30, %v375_v17  ;;  %v389_v56 = vperm.slane %v347_v23, %v375_v17 }
 0x135   :  { %v332_v29 = vpop.xlane.xlu1 %331 }
 0x136   :  { %v403_v41 = vsel %vm402_vm8, %v382_v35, %v401_v38  ;;  %v384_v42 = vperm.slane %v332_v29, %v375_v17 }
 0x13b   :  { %v329_v37 = vpop.xlane.xlu2 %328  ;;  %v353_v53 = vpop.xlane.xlu0 %352 }
 0x13c   :  { %v383_v39 = vperm.slane %v329_v37, %v375_v17  ;;  %v391_v58 = vperm.slane %v353_v53, %v375_v17 }
 0x13d   :  { %v335_v40 = vpop.xlane.xlu1 %334 }
 0x13e   :  { %v385_v43 = vperm.slane %v335_v40, %v375_v17  ;;  %v405_v44 = vsel %vm404_vm9, %v383_v39, %v403_v41 }
 0x13f   :  { %v415_v46 = vsel %vm356_vm10, -1e+12, %v405_v44 }
 0x140   :  { %v406_v48 = vsel %vm392_vm3, %v385_v43, %v384_v42  ;;  %v418_v49 = vsel %vm417_vm11, %v415_v46, -inf }
 0x141   :  { %v407_v50 = vsel %vm394_vm4, %v386_v45, %v406_v48  ;;  %419 = vmax.xlane.f32.xlu1 %v418_v49 }
 0x142   :  { %v408_v52 = vsel %vm396_vm5, %v387_v47, %v407_v50 }
 0x143   :  { %v409_v55 = vsel %vm398_vm6, %v388_v51, %v408_v52 }
 0x144   :  { %v410_v60 = vsel %vm400_vm7, %v389_v56, %v409_v55 }
 0x145   :  { %v350_v57 = vpop.xlane.xlu1 %349 }
 0x146   :  { %v390_v59 = vperm.slane %v350_v57, %v375_v17 }
 0x148   :  { %v411_v61 = vsel %vm402_vm8, %v390_v59, %v410_v60 }
 0x149   :  { %v412_v62 = vsel %vm404_vm9, %v391_v58, %v411_v61 }
 0x14a   :  { %v416_v63 = vsel %vm357_vm12, -1e+12, %v412_v62 }
 0x14b   :  { %v421_v0 = vsel %vm417_vm11, %v416_v63, -inf }
 0x14c   :  { %422 = vmax.xlane.f32.xlu2 %v421_v0 }
 0x1b4   :  { %v420_v4 = vpop.xlane.xlu1 %419 }
 0x1b5   :  { %v424_v9 = vsub.f32 %v415_v46, %v420_v4 }
 0x1b7   :  { %v426_v15 = vmul.f32 1.442695, %v424_v9 }
 0x1b9   :  { %783 = vpow2.f32 %v426_v15 }
 0x1bf   :  { %v784_v18 = vpop.eup %783  ;;  %v423_v19 = vpop.xlane.xlu2 %422 }
 0x1c0   :  { %v425_v21 = vsub.f32 %v416_v63, %v423_v19  ;;  %v430_v17 = vsel %vm417_vm11, %v784_v18, 0.0 }
 0x1c1   :  { %431 = vadd.xlane.f32.xlu0 %v430_v17 }
 0x1c2   :  { %v428_v23 = vmul.f32 1.442695, %v425_v21 }
 0x1c4   :  { %785 = vpow2.f32 %v428_v23 }
 0x1ca   :  { %v786_v24 = vpop.eup %785 }
 0x1cb   :  { %v433_v26 = vsel %vm417_vm11, %v786_v24, 0.0 }
 0x1cc   :  { %434 = vadd.xlane.f32.xlu1 %v433_v26 }
 0x234   :  { %v432_v29 = vpop.xlane.xlu0 %431 }
 0x235   :  { %787 = vrcp.f32 %v432_v29  ;;  %v447_v33 = vand.u32 2147483648, %v432_v29  ;;  %v445_v36 = vand.u32 2147483647, %v432_v29  ;;  %vm441_vm14 = vweird.f32 %v432_v29 }
 0x237   :  { %v448_v38 = vor.u32 1.1754944e-38, %v447_v33  ;;  %vm446_vm1 = vcmp.eq.f32.partialorder %v445_v36, 8.507059e+37 }
 0x23b   :  { %v788_v30 = vpop.eup %787 }
 0x23c   :  { %v437_v31 = vmul.f32 %v788_v30, %v432_v29  ;;  %vm442_vm13 = vweird.f32 %v788_v30 }
 0x23d   :  { %vm443_vm15 = vmor %vm441_vm14, %vm442_vm13  ;;  %vm594_vm13 = vcmask 125952  }
 0x23e   :  { %v438_v32 = vsub.f32 1.0, %v437_v31 }
 0x23f   :  { %v435_v34 = vpop.xlane.xlu1 %434 }
 0x240   :  { %v439_v35 = vmul.f32 %v788_v30, %v438_v32  ;;  %789 = vrcp.f32 %v435_v34  ;;  %v462_v47 = vand.u32 2147483648, %v435_v34  ;;  %v460_v49 = vand.u32 2147483647, %v435_v34 }
 0x241   :  { %vm456_vm10 = vweird.f32 %v435_v34 }
 0x242   :  { %v440_v37 = vadd.f32 %v788_v30, %v439_v35  ;;  %v463_v51 = vor.u32 1.1754944e-38, %v462_v47  ;;  %vm461_vm12 = vcmp.eq.f32.partialorder %v460_v49, 8.507059e+37 }
 0x244   :  { %v444_v39 = vsel %vm443_vm15, %v788_v30, %v440_v37 }
 0x245   :  { %v449_v1 = vsel %vm446_vm1, %v448_v38, %v444_v39 }
 0x246   :  { %v790_v40 = vpop.eup %789  ;;  %v450_v41 = vmul.f32 %v784_v18, %v449_v1 }
 0x247   :  { %v452_v42 = vmul.f32 %v790_v40, %v435_v34  ;;  %vm457_vm2 = vweird.f32 %v790_v40 }
 0x248   :  { %v480_v43 = vperm.slane %v450_v41, 2  ;;  %v473_v44 = vperm.slane %v450_v41, 1  ;;  %v466_v45 = vperm.slane %v450_v41, 0  ;;  %vm458_vm11 = vmor %vm456_vm10, %vm457_vm2  ;;  %v501_v54 = vperm.slane %v450_v41, 5 }
 0x249   :  { %v453_v46 = vsub.f32 1.0, %v452_v42  ;;  %v487_v56 = vperm.slane %v450_v41, 3  ;;  %v494_v59 = vperm.slane %v450_v41, 4  ;;  %v508_v62 = vperm.slane %v450_v41, 6 }
 0x24a   :  { %485 = vperm.xlu1 %766, %v480_v43   ;;  %478 = vperm.xlu0 %765, %v473_v44   ;;  %v515_v63 = vperm.slane %v450_v41, 7 }
 0x24b   :  { %v454_v48 = vmul.f32 %v790_v40, %v453_v46  ;;  %471 = vperm.xlu2 %764, %v466_v45  }
 0x24d   :  { %v455_v50 = vadd.f32 %v790_v40, %v454_v48 }
 0x24f   :  { %v459_v52 = vsel %vm458_vm11, %v790_v40, %v455_v50 }
 0x250   :  { %v464_v53 = vsel %vm461_vm12, %v463_v51, %v459_v52 }
 0x251   :  { %v465_v55 = vmul.f32 %v786_v24, %v464_v53 }
 0x252   :  { %506 = vperm.xlu1 %766, %v501_v54  }
 0x253   :  { %492 = vperm.xlu2 %764, %v487_v56   ;;  %v536_v57 = vperm.slane %v465_v55, 2  ;;  %v529_v58 = vperm.slane %v465_v55, 1  ;;  %v557_v60 = vperm.slane %v465_v55, 5  ;;  %v550_v61 = vperm.slane %v465_v55, 4 }
 0x254   :  { %v564_v0 = vperm.slane %v465_v55, 6  ;;  %v522_v4 = vperm.slane %v465_v55, 0  ;;  %v543_v9 = vperm.slane %v465_v55, 3  ;;  %v571_v15 = vperm.slane %v465_v55, 7 }
 0x255   :  { %541 = vperm.xlu0 %765, %v536_v57  }
 0x25a   :  { %534 = vperm.xlu1 %766, %v529_v58  }
 0x25b   :  { %499 = vperm.xlu2 %764, %v494_v59  }
 0x25d   :  { %562 = vperm.xlu0 %765, %v557_v60  }
 0x262   :  { %555 = vperm.xlu1 %766, %v550_v61  }
 0x263   :  { %513 = vperm.xlu2 %764, %v508_v62  }
 0x265   :  { %520 = vperm.xlu0 %765, %v515_v63  }
 0x26a   :  { %569 = vperm.xlu1 %766, %v564_v0  }
 0x26b   :  { %527 = vperm.xlu2 %764, %v522_v4  }
 0x273   :  { %548 = vperm.xlu2 %764, %v543_v9  }
 0x27b   :  { %576 = vperm.xlu2 %764, %v571_v15  }
 0x2a5   :  { %v472_v18 = vpop.permute.xlu2 %471 }
 0x2a6   :  { %v578_v17 = vmul.f32 %v472_v18, %v830_v2 }
 0x2a8   :  { %v595_v26 = vsel %vm594_vm13, %v578_v17, 0.0 }
 0x2a9   :  { %v596_v34 = vrot.slane %v595_v26, 4 }
 0x2ab   :  { %v597_v39 = vadd.f32 %v596_v34, %v595_v26 }
 0x2ad   :  { %v493_v19 = vpop.permute.xlu2 %492  ;;  %v598_v45 = vrot.slane %v597_v39, 2 }
 0x2ae   :  { %v581_v31 = vmul.f32 %v493_v19, %v850_v6 }
 0x2b0   :  { %v616_v2 = vsel %vm594_vm13, %v581_v31, 0.0 }
 0x2b5   :  { %v500_v21 = vpop.permute.xlu2 %499 }
 0x2b6   :  { %v582_v36 = vmul.f32 %v500_v21, %v867_v10 }
 0x2b8   :  { %v623_v6 = vsel %vm594_vm13, %v582_v36, 0.0 }
 0x2b9   :  { %v624_v48 = vrot.slane %v623_v6, 4 }
 0x2bb   :  { %v625_v57 = vadd.f32 %v624_v48, %v623_v6 }
 0x2bc   :  { %v486_v23 = vpop.permute.xlu1 %485  ;;  %v479_v24 = vpop.permute.xlu0 %478 }
 0x2bd   :  { %v580_v28 = vmul.f32 %v486_v23, %v845_v5  ;;  %v579_v29 = vmul.f32 %v479_v24, %v835_v3  ;;  %v514_v30 = vpop.permute.xlu2 %513  ;;  %v617_v5 = vrot.slane %v616_v2, 4  ;;  %v626_v23 = vrot.slane %v625_v57, 2 }
 0x2be   :  { %v584_v49 = vmul.f32 %v514_v30, %v891_v14 }
 0x2bf   :  { %v609_v32 = vsel %vm594_vm13, %v580_v28, 0.0  ;;  %v602_v33 = vsel %vm594_vm13, %v579_v29, 0.0  ;;  %v618_v47 = vadd.f32 %v617_v5, %v616_v2 }
 0x2c0   :  { %v603_v35 = vrot.slane %v602_v33, 4  ;;  %v610_v37 = vrot.slane %v609_v32, 4  ;;  %v637_v58 = vsel %vm594_vm13, %v584_v49, 0.0 }
 0x2c1   :  { %v619_v56 = vrot.slane %v618_v47, 2  ;;  %v638_v18 = vrot.slane %v637_v58, 4 }
 0x2c2   :  { %v604_v38 = vadd.f32 %v603_v35, %v602_v33  ;;  %v611_v41 = vadd.f32 %v610_v37, %v609_v32 }
 0x2c3   :  { %v620_v17 = vadd.f32 %v619_v56, %v618_v47  ;;  %v639_v34 = vadd.f32 %v638_v18, %v637_v58 }
 0x2c4   :  { %v507_v1 = vpop.permute.xlu1 %506  ;;  %v605_v43 = vrot.slane %v604_v38, 2 }
 0x2c5   :  { %v583_v3 = vmul.f32 %v507_v1, %v874_v11  ;;  %v528_v40 = vpop.permute.xlu2 %527  ;;  %v612_v11 = vrot.slane %v611_v41, 2  ;;  %v621_v37 = vrot.slane %v620_v17, 1 }
 0x2c6   :  { %v586_v42 = vmul.f32 %v528_v40, %v857_v7  ;;  %v606_v51 = vadd.f32 %v605_v43, %v604_v38  ;;  %v599_v7 = vadd.f32 %v598_v45, %v597_v39  ;;  %v627_v38 = vadd.f32 %v626_v23, %v625_v57 }
 0x2c7   :  { %v542_v44 = vpop.permute.xlu0 %541  ;;  %v630_v46 = vsel %vm594_vm13, %v583_v3, 0.0  ;;  %v613_v61 = vadd.f32 %v612_v11, %v611_v41 }
 0x2c8   :  { %v651_v10 = vsel %vm594_vm13, %v586_v42, 0.0  ;;  %v588_v50 = vmul.f32 %v542_v44, %v880_v12  ;;  %v631_v52 = vrot.slane %v630_v46, 4  ;;  %v607_v12 = vrot.slane %v606_v51, 1 }
 0x2c9   :  { %v652_v53 = vrot.slane %v651_v10, 4  ;;  %v600_v15 = vrot.slane %v599_v7, 1  ;;  %v614_v26 = vrot.slane %v613_v61, 1  ;;  %v628_v57 = vrot.slane %v627_v38, 1 }
 0x2ca   :  { %v665_v54 = vsel %vm594_vm13, %v588_v50, 0.0  ;;  %v632_v63 = vadd.f32 %v631_v52, %v630_v46  ;;  %v640_v46 = vrot.slane %v639_v34, 2 }
 0x2cb   :  { %v666_v62 = vrot.slane %v665_v54, 4  ;;  %v653_v0 = vadd.f32 %v652_v53, %v651_v10  ;;  %v601_v33 = vadd.f32 %v600_v15, %v599_v7 }
 0x2cc   :  { %v535_v55 = vpop.permute.xlu1 %534  ;;  %v633_v30 = vrot.slane %v632_v63, 2  ;;  %v641_v58 = vadd.f32 %v640_v46, %v639_v34 }
 0x2cd   :  { %v587_v59 = vmul.f32 %v535_v55, %v862_v8  ;;  %v549_v60 = vpop.permute.xlu2 %548  ;;  %v667_v28 = vadd.f32 %v666_v62, %v665_v54  ;;  %v654_v31 = vrot.slane %v653_v0, 2 }
 0x2ce   :  { %v589_v14 = vmul.f32 %v549_v60, %v885_v13  ;;  %v608_v13 = vadd.f32 %v607_v12, %v606_v51  ;;  %v634_v42 = vadd.f32 %v633_v30, %v632_v63  ;;  %v622_v51 = vadd.f32 %v621_v37, %v620_v17 }
 0x2cf   :  { %v658_v4 = vsel %vm594_vm13, %v587_v59, 0.0  ;;  %v563_v9 = vpop.permute.xlu0 %562  ;;  %v668_v3 = vrot.slane %v667_v28, 2  ;;  %v655_v43 = vadd.f32 %v654_v31, %v653_v0  ;;  %v629_v17 = vadd.f32 %v628_v57, %v627_v38 }
 0x2d0   :  { %v659_v19 = vrot.slane %v658_v4, 4  ;;  %v672_v21 = vsel %vm594_vm13, %v589_v14, 0.0  ;;  %v591_v8 = vmul.f32 %v563_v9, %v922_v22  ;;  %v615_v22 = vadd.f32 %v614_v26, %v613_v61 }
 0x2d1   :  { %v673_v24 = vrot.slane %v672_v21, 4  ;;  %v723_v41 = vsel %vm392_vm3, %v608_v13, %v601_v33  ;;  %v669_v52 = vadd.f32 %v668_v3, %v667_v28  ;;  %v635_v54 = vrot.slane %v634_v42, 1 }
 0x2d2   :  { %v660_v29 = vadd.f32 %v659_v19, %v658_v4  ;;  %v686_v32 = vsel %vm594_vm13, %v591_v8, 0.0  ;;  %v656_v7 = vrot.slane %v655_v43, 1  ;;  %v642_v26 = vrot.slane %v641_v58, 1 }
 0x2d3   :  { %v674_v2 = vadd.f32 %v673_v24, %v672_v21  ;;  %v687_v39 = vrot.slane %v686_v32, 4  ;;  %v670_v0 = vrot.slane %v669_v52, 1  ;;  %v636_v15 = vadd.f32 %v635_v54, %v634_v42 }
 0x2d4   :  { %v661_v35 = vrot.slane %v660_v29, 2  ;;  %v556_v36 = vpop.permute.xlu1 %555  ;;  %v657_v18 = vadd.f32 %v656_v7, %v655_v43  ;;  %v643_v38 = vadd.f32 %v642_v26, %v641_v58 }
 0x2d5   :  { %v590_v1 = vmul.f32 %v556_v36, %v913_v20  ;;  %v577_v5 = vpop.permute.xlu2 %576  ;;  %v675_v10 = vrot.slane %v674_v2, 2  ;;  %v688_v20 = vadd.f32 %v687_v39, %v686_v32  ;;  %v671_v30 = vadd.f32 %v670_v0, %v669_v52 }
 0x2d6   :  { %v662_v40 = vadd.f32 %v661_v35, %v660_v29  ;;  %v593_v6 = vmul.f32 %v577_v5, %v937_v27  ;;  %v724_v27 = vsel %vm394_vm4, %v615_v22, %v723_v41 }
 0x2d7   :  { %v679_v44 = vsel %vm594_vm13, %v590_v1, 0.0  ;;  %v521_v45 = vpop.permute.xlu0 %520  ;;  %v676_v14 = vadd.f32 %v675_v10, %v674_v2  ;;  %v689_v12 = vrot.slane %v688_v20, 2  ;;  %v725_v63 = vsel %vm396_vm5, %v622_v51, %v724_v27 }
 0x2d8   :  { %v680_v47 = vrot.slane %v679_v44, 4  ;;  %v700_v48 = vsel %vm594_vm13, %v593_v6, 0.0  ;;  %v663_v49 = vrot.slane %v662_v40, 1  ;;  %v585_v11 = vmul.f32 %v521_v45, %v898_v16 }
 0x2d9   :  { %v701_v50 = vrot.slane %v700_v48, 4  ;;  %v677_v29 = vrot.slane %v676_v14, 1  ;;  %v690_v13 = vadd.f32 %v689_v12, %v688_v20 }
 0x2da   :  { %v681_v53 = vadd.f32 %v680_v47, %v679_v44  ;;  %v644_v56 = vsel %vm594_vm13, %v585_v11, 0.0  ;;  %v664_v62 = vadd.f32 %v663_v49, %v662_v40 }
 0x2db   :  { %v702_v55 = vadd.f32 %v701_v50, %v700_v48  ;;  %v645_v60 = vrot.slane %v644_v56, 4  ;;  %v678_v39 = vadd.f32 %v677_v29, %v676_v14  ;;  %v691_v1 = vrot.slane %v690_v13, 1 }
 0x2dc   :  { %v682_v59 = vrot.slane %v681_v53, 2  ;;  %v570_v61 = vpop.permute.xlu1 %569  ;;  %v730_v28 = vsel %vm392_vm3, %v664_v62, %v657_v18 }
 0x2dd   :  { %v592_v16 = vmul.f32 %v570_v61, %v931_v25  ;;  %v646_v9 = vadd.f32 %v645_v60, %v644_v56  ;;  %v703_v19 = vrot.slane %v702_v55, 2  ;;  %v726_v25 = vsel %vm398_vm6, %v629_v17, %v725_v63 }
 0x2de   :  { %v683_v4 = vadd.f32 %v682_v59, %v681_v53  ;;  %v727_v33 = vsel %vm400_vm7, %v636_v15, %v726_v25  ;;  %v731_v35 = vsel %vm394_vm4, %v671_v30, %v730_v28  ;;  %v692_v44 = vadd.f32 %v691_v1, %v690_v13 }
 0x2df   :  { %v693_v21 = vsel %vm594_vm13, %v592_v16, 0.0  ;;  %v647_v24 = vrot.slane %v646_v9, 2  ;;  %v704_v34 = vadd.f32 %v703_v19, %v702_v55  ;;  %v732_v3 = vsel %vm396_vm5, %v678_v39, %v731_v35 }
 0x2e0   :  { %v684_v23 = vrot.slane %v683_v4, 1  ;;  %v694_v8 = vrot.slane %v693_v21, 4  ;;  %v728_v6 = vsel %vm402_vm8, %v643_v38, %v727_v33 }
 0x2e1   :  { %v648_v31 = vadd.f32 %v647_v24, %v646_v9  ;;  %v705_v40 = vrot.slane %v704_v34, 1 }
 0x2e2   :  { %v695_v32 = vadd.f32 %v694_v8, %v693_v21  ;;  %v685_v2 = vadd.f32 %v684_v23, %v683_v4 }
 0x2e3   :  { %v649_v36 = vrot.slane %v648_v31, 1  ;;  %v706_v46 = vadd.f32 %v705_v40, %v704_v34 }
 0x2e4   :  { %v696_v37 = vrot.slane %v695_v32, 2  ;;  %v733_v41 = vsel %vm398_vm6, %v685_v2, %v732_v3 }
 0x2e5   :  { %v650_v5 = vadd.f32 %v649_v36, %v648_v31  ;;  %v734_v10 = vsel %vm400_vm7, %v692_v44, %v733_v41 }
 0x2e6   :  { %v697_v22 = vadd.f32 %v696_v37, %v695_v32 }
 0x2e7   :  { %v729_v42 = vsel %vm404_vm9, %v650_v5, %v728_v6 }
 0x2e8   :  { %v698_v43 = vrot.slane %v697_v22, 1  ;;  %739 = vst.msk [vmem:[%s1091_s5] sm:$0xff] %vm101_vm0, %v729_v42 }
 0x2ea   :  { %v699_v45 = vadd.f32 %v698_v43, %v697_v22 }
 0x2ec   :  { %v735_v47 = vsel %vm402_vm8, %v699_v45, %v734_v10 }
 0x2ed   :  { %v736_v48 = vsel %vm404_vm9, %v706_v46, %v735_v47 }
 0x2ee   :  { %740 = vst.msk [vmem:[%s1091_s5 + $0x8] sm:$0xff] %vm101_vm0, %v736_v48 }

// kernel: encoder_forward.5
= control target key start
LH: loop header
LB: loop body
LE: loop exit
PB: predicated region body
PF: predicated region fallthrough
CT: control target
= control target key end

     0   :  { %v1700_v4 = vmov 0.0   ;;  %s1701_s14 = smov 64   ;;  %s1702_s15 = smov 32   ;;  %v1703_v24 = vmov 0   ;;  %vm30_vm4 = vcmask 261120   ;;  %s2254_s3 = inlined_call_operand.vmem [shape: f32[32,128], index: 3, kind: input, shape index: {}]   ;;  %s2255_s0 = inlined_call_operand.vmem [shape: f32[8,2,128], index: 0, kind: input, shape index: {}]   ;;  %s2256_s2 = inlined_call_operand.vmem [shape: f32[8,2,1], index: 2, kind: input, shape index: {}]   ;;  %s2257_s4 = inlined_call_operand.vmem [shape: f32[32,128], index: 4, kind: input, shape index: {}]   ;;  %s2258_s1 = inlined_call_operand.vmem [shape: f32[8,2,128], index: 1, kind: input, shape index: {}]   ;;  %s2259_s5 = inlined_call_operand.vmem [shape: f32[8,2,32], index: 5, kind: output, shape index: {0}]   ;;  %s2260_s6 = inlined_call_operand.vmem [shape: f32[8,2,32], index: 6, kind: output, shape index: {1}]   ;;  %s2261_s7 = inlined_call_operand.vmem [shape: f32[2,2,32], index: 7, kind: output, shape index: {2}]   ;;  %s2262_s8 = inlined_call_operand.vmem [shape: f32[2,2,32], index: 8, kind: output, shape index: {3}]  }
   0x1   :  { %v27_v0 = vld [vmem:[%s2254_s3 + $0x18] sm:$0xff]  ;;  %v26_v1 = vld [vmem:[%s2254_s3 + $0x10] sm:$0xff]  ;;  %v25_v2 = vld [vmem:[%s2254_s3 + $0x8] sm:$0xff]  ;;  %1569 = vset.pattern.permute.xlu1 %v1703_v24  ;;  %1570 = vset.pattern.permute.xlu2 %v1703_v24  ;;  %s1704_s28 = smov 96  }
   0x2   :  { %46 = vmatpush.msra.mxu0 %v27_v0  ;;  %135 = vmatpush.msra.mxu1 %v27_v0  ;;  %v24_v3 = vld [vmem:[%s2254_s3] sm:$0xff] }
   0x3   :  { %225 = vmatpush.msra.mxu2 %v27_v0  ;;  %315 = vmatpush.msra.mxu3 %v27_v0  ;;  %v28_v5 = vld [vmem:[%s2255_s0] sm:$0x3]  ;;  %v1491_v39 = vld [vmem:[%s2255_s0 + $0x2] sm:$0x3] }
   0x4   :  { %47 = vmatpush.msra.mxu0 %v26_v1  ;;  %136 = vmatpush.msra.mxu1 %v26_v1  ;;  %v29_v25 = vld [vmem:[%s2256_s2] sm:$0x3]  ;;  %v1492_v46 = vld [vmem:[%s2256_s2 + $0x2] sm:$0x3] }
   0x5   :  { %226 = vmatpush.msra.mxu2 %v26_v1  ;;  %316 = vmatpush.msra.mxu3 %v26_v1  ;;  %v104_v26 = vsub.f32 1.0, %v29_v25  ;;  %v193_v59 = vsub.f32 1.0, %v1492_v46 }
   0x6   :  { %48 = vmatpush.msra.mxu0 %v25_v2  ;;  %137 = vmatpush.msra.mxu1 %v25_v2 }
   0x7   :  { %227 = vmatpush.msra.mxu2 %v25_v2  ;;  %317 = vmatpush.msra.mxu3 %v25_v2 }
   0x8   :  { %49 = vmatpush.msra.mxu0 %v24_v3  ;;  %138 = vmatpush.msra.mxu1 %v24_v3 }
   0x9   :  { %50 = vmatmul.f32.vlgmr.msra.gmra.mxu0 %v1700_v4  ;;  %228 = vmatpush.msra.mxu2 %v24_v3 }
   0xa   :  { %318 = vmatpush.msra.mxu3 %v24_v3  ;;  %405 = vmatpush.msrb.mxu0 %v27_v0 }
   0xb   :  { %495 = vmatpush.msrb.mxu1 %v27_v0  ;;  %585 = vmatpush.msrb.mxu2 %v27_v0 }
   0xc   :  { %406 = vmatpush.msrb.mxu0 %v26_v1  ;;  %675 = vmatpush.msrb.mxu3 %v27_v0 }
   0xd   :  { %496 = vmatpush.msrb.mxu1 %v26_v1  ;;  %586 = vmatpush.msrb.mxu2 %v26_v1 }
   0xe   :  { %407 = vmatpush.msrb.mxu0 %v25_v2  ;;  %676 = vmatpush.msrb.mxu3 %v26_v1 }
   0xf   :  { %497 = vmatpush.msrb.mxu1 %v25_v2  ;;  %587 = vmatpush.msrb.mxu2 %v25_v2 }
  0x10   :  { %408 = vmatpush.msrb.mxu0 %v24_v3  ;;  %677 = vmatpush.msrb.mxu3 %v25_v2 }
  0x11   :  { %498 = vmatpush.msrb.mxu1 %v24_v3  ;;  %588 = vmatpush.msrb.mxu2 %v24_v3 }
  0x12   :  { %678 = vmatpush.msrb.mxu3 %v24_v3  ;;  %1571 = vset.pattern.permute.xlu0 %v1703_v24 }
  0x13   :  { %107 = vperm.xlu2 %1570, %v104_v26  }
  0x6d   :  { %v108_v32 = vpop.permute.xlu2 %107 }
  0x6e   :  { %v110_v34 = vmul.f32 0.0, %v108_v32 }
  0x86   :  { %v51_v6 = vpop.f32.mrf.mxu0 }
  0x87   :  { %v54_v7 = vadd.f32 %v51_v6, %v28_v5 }
  0x89   :  { %1572 = vtanh.f32 %v54_v7  ;;  %v1490_v9 = vmul.f32 -1.442695, %v54_v7 }
  0x8b   :  { %1574 = vpow2.f32 %v1490_v9 }
  0x8f   :  { %v1573_v8 = vpop.eup %1572 }
  0x90   :  { %77 = vrot.lane.b32.xlu0 %v1573_v8, %s1701_s14 }
  0x91   :  { %v1575_v10 = vpop.eup %1574 }
  0x92   :  { %v58_v11 = vadd.f32 1.0, %v1575_v10 }
  0x94   :  { %1576 = vrcp.f32 %v58_v11  ;;  %v70_v17 = vand.u32 2147483648, %v58_v11  ;;  %vm64_vm1 = vweird.f32 %v58_v11  ;;  %v68_v18 = vand.u32 2147483647, %v58_v11 }
  0x96   :  { %v71_v20 = vor.u32 1.1754944e-38, %v70_v17  ;;  %vm69_vm3 = vcmp.eq.f32.partialorder %v68_v18, 8.507059e+37 }
  0x9a   :  { %v1577_v12 = vpop.eup %1576 }
  0x9b   :  { %v60_v13 = vmul.f32 %v1577_v12, %v58_v11  ;;  %vm65_vm0 = vweird.f32 %v1577_v12  ;;  %v1496_v11 = vld [vmem:[%s2255_s0 + $0x4] sm:$0x3] }
  0x9c   :  { %vm66_vm2 = vmor %vm64_vm1, %vm65_vm0 }
  0x9d   :  { %v61_v14 = vsub.f32 1.0, %v60_v13 }
  0x9f   :  { %v62_v15 = vmul.f32 %v1577_v12, %v61_v14 }
  0xa1   :  { %v63_v16 = vadd.f32 %v1577_v12, %v62_v15  ;;  %v1497_v15 = vld [vmem:[%s2256_s2 + $0x4] sm:$0x3] }
  0xa3   :  { %v67_v19 = vsel %vm66_vm2, %v1577_v12, %v63_v16 }
  0xa4   :  { %v72_v22 = vsel %vm69_vm3, %v71_v20, %v67_v19 }
  0xa5   :  { %v75_v27 = vmul.f32 0.0, %v72_v22 }
 0x102   :  { %v78_v21 = vpop.permute.xlu0 %77 }
 0x103   :  { %v80_v23 = vmul.f32 %v78_v21, %v72_v22 }
 0x105   :  { %82 = vrot.lane.b32.xlu0 %v80_v23, %s1702_s15 }
 0x177   :  { %v83_v28 = vpop.permute.xlu0 %82 }
 0x178   :  { %v85_v29 = vadd.f32 %v83_v28, %v75_v27 }
 0x17a   :  { %1578 = vtanh.f32 %v85_v29 }
 0x180   :  { %v1579_v30 = vpop.eup %1578 }
 0x181   :  { %88 = vrot.lane.b32.xlu1 %v1579_v30, %s1701_s14 }
 0x189   :  { %94 = vperm.xlu1 %1569, %v29_v25  }
 0x1f3   :  { %v89_v31 = vpop.permute.xlu1 %88 }
 0x1f4   :  { %v91_v33 = vmul.f32 %v89_v31, %v72_v22  ;;  %v283_v31 = vsub.f32 1.0, %v1497_v15 }
 0x1fb   :  { %v95_v35 = vpop.permute.xlu1 %94 }
 0x1fc   :  { %v1772_v36 = vmul.f32 %v95_v35, %v91_v33  ;;  %v112_v60 = vmul.f32 %v95_v35, %v85_v29 }
 0x1fe   :  { %v111_v37 = vadd.f32 %v110_v34, %v1772_v36  ;;  %v113_v61 = vadd.f32 %v112_v60, %v110_v34 }
 0x200   :  { %119 = vrot.lane.b32.xlu2 %v111_v37, %s1702_s15 }
 0x25a   :  { %v120_v38 = vpop.permute.xlu2 %119 }
 0x25b   :  { %1493 = vmatmul.msk.f32.vlgmr.msra.gmra.mxu1 %vm30_vm4, %v120_v38 }
 0x2d8   :  { %v140_v40 = vpop.f32.mrf.mxu1 }
 0x2d9   :  { %v143_v41 = vadd.f32 %v1491_v39, %v140_v40 }
 0x2db   :  { %1580 = vtanh.f32 %v143_v41  ;;  %v1494_v43 = vmul.f32 -1.442695, %v143_v41 }
 0x2dd   :  { %1582 = vpow2.f32 %v1494_v43 }
 0x2e1   :  { %v1581_v42 = vpop.eup %1580 }
 0x2e2   :  { %166 = vrot.lane.b32.xlu0 %v1581_v42, %s1701_s14 }
 0x2e3   :  { %v1583_v44 = vpop.eup %1582 }
 0x2e4   :  { %v147_v45 = vadd.f32 1.0, %v1583_v44 }
 0x2e6   :  { %1584 = vrcp.f32 %v147_v45  ;;  %v159_v52 = vand.u32 2147483648, %v147_v45  ;;  %vm153_vm6 = vweird.f32 %v147_v45  ;;  %v157_v53 = vand.u32 2147483647, %v147_v45 }
 0x2e8   :  { %v160_v55 = vor.u32 1.1754944e-38, %v159_v52  ;;  %vm158_vm8 = vcmp.eq.f32.partialorder %v157_v53, 8.507059e+37  ;;  %v1502_v52 = vld [vmem:[%s2256_s2 + $0x6] sm:$0x3] }
 0x2ea   :  { %183 = vperm.xlu0 %1571, %v1492_v46  }
 0x2ec   :  { %v1585_v47 = vpop.eup %1584 }
 0x2ed   :  { %v149_v48 = vmul.f32 %v1585_v47, %v147_v45  ;;  %vm154_vm5 = vweird.f32 %v1585_v47 }
 0x2ee   :  { %vm155_vm7 = vmor %vm153_vm6, %vm154_vm5 }
 0x2ef   :  { %v150_v49 = vsub.f32 1.0, %v149_v48  ;;  %v1501_v48 = vld [vmem:[%s2255_s0 + $0x6] sm:$0x3] }
 0x2f1   :  { %v151_v50 = vmul.f32 %v1585_v47, %v150_v49 }
 0x2f3   :  { %v152_v51 = vadd.f32 %v1585_v47, %v151_v50 }
 0x2f5   :  { %v156_v54 = vsel %vm155_vm7, %v1585_v47, %v152_v51 }
 0x2f6   :  { %v161_v57 = vsel %vm158_vm8, %v160_v55, %v156_v54 }
 0x2f7   :  { %v164_v62 = vmul.f32 %v161_v57, %v113_v61 }
 0x354   :  { %v167_v56 = vpop.permute.xlu0 %166 }
 0x355   :  { %v169_v58 = vmul.f32 %v167_v56, %v161_v57 }
 0x357   :  { %171 = vrot.lane.b32.xlu1 %v169_v58, %s1702_s15 }
 0x35c   :  { %v184_v6 = vpop.permute.xlu0 %183 }
 0x35f   :  { %196 = vperm.xlu1 %1569, %v193_v59  }
 0x3c9   :  { %v172_v63 = vpop.permute.xlu1 %171 }
 0x3ca   :  { %v174_v0 = vadd.f32 %v172_v63, %v164_v62 }
 0x3cc   :  { %1586 = vtanh.f32 %v174_v0  ;;  %v201_v33 = vmul.f32 %v184_v6, %v174_v0 }
 0x3d1   :  { %v197_v2 = vpop.permute.xlu1 %196 }
 0x3d2   :  { %v1587_v1 = vpop.eup %1586  ;;  %v199_v7 = vmul.f32 %v197_v2, %v111_v37  ;;  %v202_v32 = vmul.f32 %v197_v2, %v113_v61 }
 0x3d3   :  { %177 = vrot.lane.b32.xlu2 %v1587_v1, %s1701_s14 }
 0x3d4   :  { %v203_v34 = vadd.f32 %v202_v32, %v201_v33 }
 0x42d   :  { %v178_v3 = vpop.permute.xlu2 %177 }
 0x42e   :  { %v180_v5 = vmul.f32 %v178_v3, %v161_v57 }
 0x430   :  { %v1786_v8 = vmul.f32 %v184_v6, %v180_v5  ;;  %v373_v5 = vsub.f32 1.0, %v1502_v52 }
 0x432   :  { %v200_v9 = vadd.f32 %v199_v7, %v1786_v8 }
 0x434   :  { %209 = vrot.lane.b32.xlu2 %v200_v9, %s1702_s15 }
 0x48e   :  { %v210_v10 = vpop.permute.xlu2 %209 }
 0x48f   :  { %1498 = vmatmul.msk.f32.vlgmr.msra.gmra.mxu2 %vm30_vm4, %v210_v10 }
 0x512   :  { %v230_v12 = vpop.f32.mrf.mxu2 }
 0x513   :  { %v233_v13 = vadd.f32 %v1496_v11, %v230_v12 }
 0x515   :  { %1588 = vtanh.f32 %v233_v13  ;;  %v1499_v16 = vmul.f32 -1.442695, %v233_v13 }
 0x517   :  { %1590 = vpow2.f32 %v1499_v16 }
 0x51b   :  { %v1589_v14 = vpop.eup %1588 }
 0x51c   :  { %256 = vrot.lane.b32.xlu1 %v1589_v14, %s1701_s14 }
 0x51d   :  { %v1591_v17 = vpop.eup %1590 }
 0x51e   :  { %v237_v18 = vadd.f32 1.0, %v1591_v17 }
 0x520   :  { %1592 = vrcp.f32 %v237_v18  ;;  %v249_v24 = vand.u32 2147483648, %v237_v18  ;;  %vm243_vm10 = vweird.f32 %v237_v18  ;;  %v247_v25 = vand.u32 2147483647, %v237_v18 }
 0x522   :  { %v250_v27 = vor.u32 1.1754944e-38, %v249_v24  ;;  %vm248_vm12 = vcmp.eq.f32.partialorder %v247_v25, 8.507059e+37  ;;  %v1857_v24 = vld [vmem:[%s2257_s4] sm:$0xff] }
 0x524   :  { %273 = vperm.xlu1 %1569, %v1497_v15  }
 0x526   :  { %v1593_v19 = vpop.eup %1592 }
 0x527   :  { %v239_v20 = vmul.f32 %v1593_v19, %v237_v18  ;;  %vm244_vm9 = vweird.f32 %v1593_v19 }
 0x528   :  { %vm245_vm11 = vmor %vm243_vm10, %vm244_vm9 }
 0x529   :  { %v240_v21 = vsub.f32 1.0, %v239_v20 }
 0x52b   :  { %v241_v22 = vmul.f32 %v1593_v19, %v240_v21  ;;  %v1836_v21 = vld [vmem:[%s2257_s4 + $0x18] sm:$0xff] }
 0x52c   :  { %763 = vmatpush.msra.mxu0 %v1836_v21  ;;  %851 = vmatpush.msra.mxu1 %v1836_v21 }
 0x52d   :  { %v242_v23 = vadd.f32 %v1593_v19, %v241_v22  ;;  %v1841_v22 = vld [vmem:[%s2257_s4 + $0x10] sm:$0xff]  ;;  %940 = vmatpush.msra.mxu2 %v1836_v21 }
 0x52e   :  { %764 = vmatpush.msra.mxu0 %v1841_v22  ;;  %852 = vmatpush.msra.mxu1 %v1841_v22 }
 0x52f   :  { %v246_v26 = vsel %vm245_vm11, %v1593_v19, %v242_v23  ;;  %v1848_v23 = vld [vmem:[%s2257_s4 + $0x8] sm:$0xff]  ;;  %941 = vmatpush.msra.mxu2 %v1841_v22 }
 0x530   :  { %v251_v29 = vsel %vm248_vm12, %v250_v27, %v246_v26  ;;  %765 = vmatpush.msra.mxu0 %v1848_v23  ;;  %853 = vmatpush.msra.mxu1 %v1848_v23  ;;  %v1506_v26 = vld [vmem:[%s2255_s0 + $0x8] sm:$0x3] }
 0x531   :  { %v254_v35 = vmul.f32 %v251_v29, %v203_v34  ;;  %942 = vmatpush.msra.mxu2 %v1848_v23 }
 0x532   :  { %766 = vmatpush.msra.mxu0 %v1857_v24  ;;  %854 = vmatpush.msra.mxu1 %v1857_v24 }
 0x533   :  { %943 = vmatpush.msra.mxu2 %v1857_v24 }
 0x58e   :  { %v257_v28 = vpop.permute.xlu1 %256 }
 0x58f   :  { %v259_v30 = vmul.f32 %v257_v28, %v251_v29 }
 0x591   :  { %261 = vrot.lane.b32.xlu2 %v259_v30, %s1702_s15 }
 0x596   :  { %v274_v43 = vpop.permute.xlu1 %273 }
 0x599   :  { %286 = vperm.xlu2 %1570, %v283_v31  }
 0x5eb   :  { %v262_v37 = vpop.permute.xlu2 %261 }
 0x5ec   :  { %v264_v38 = vadd.f32 %v262_v37, %v254_v35 }
 0x5ee   :  { %1594 = vtanh.f32 %v264_v38  ;;  %v291_v7 = vmul.f32 %v274_v43, %v264_v38 }
 0x5f3   :  { %v287_v40 = vpop.permute.xlu2 %286 }
 0x5f4   :  { %v1595_v39 = vpop.eup %1594  ;;  %v289_v44 = vmul.f32 %v287_v40, %v200_v9  ;;  %v292_v6 = vmul.f32 %v287_v40, %v203_v34 }
 0x5f5   :  { %267 = vrot.lane.b32.xlu0 %v1595_v39, %s1701_s14 }
 0x5f6   :  { %v1813_v9 = vadd.f32 %v292_v6, %v291_v7 }
 0x667   :  { %v268_v41 = vpop.permute.xlu0 %267 }
 0x668   :  { %v270_v42 = vmul.f32 %v268_v41, %v251_v29  ;;  %v1526_v29 = vld [vmem:[%s2258_s1 + $0xe] sm:$0x3] }
 0x66a   :  { %v1800_v45 = vmul.f32 %v274_v43, %v270_v42 }
 0x66c   :  { %v290_v46 = vadd.f32 %v289_v44, %v1800_v45 }
 0x66e   :  { %299 = vrot.lane.b32.xlu0 %v290_v46, %s1702_s15 }
 0x6e0   :  { %v300_v47 = vpop.permute.xlu0 %299 }
 0x6e1   :  { %1503 = vmatmul.msk.f32.vlgmr.msra.gmra.mxu3 %vm30_vm4, %v300_v47 }
 0x6e2   :  { %1029 = vmatpush.msra.mxu3 %v1836_v21 }
 0x6e4   :  { %1030 = vmatpush.msra.mxu3 %v1841_v22 }
 0x6e6   :  { %1031 = vmatpush.msra.mxu3 %v1848_v23 }
 0x6e8   :  { %1032 = vmatpush.msra.mxu3 %v1857_v24 }
 0x764   :  { %v320_v49 = vpop.f32.mrf.mxu3 }
 0x765   :  { %v323_v50 = vadd.f32 %v1501_v48, %v320_v49 }
 0x767   :  { %1596 = vtanh.f32 %v323_v50  ;;  %v1504_v53 = vmul.f32 -1.442695, %v323_v50 }
 0x769   :  { %1598 = vpow2.f32 %v1504_v53 }
 0x76d   :  { %v1597_v51 = vpop.eup %1596 }
 0x76e   :  { %346 = vrot.lane.b32.xlu1 %v1597_v51, %s1701_s14 }
 0x76f   :  { %v1599_v54 = vpop.eup %1598 }
 0x770   :  { %v327_v55 = vadd.f32 1.0, %v1599_v54 }
 0x772   :  { %1600 = vrcp.f32 %v327_v55  ;;  %v339_v61 = vand.u32 2147483648, %v327_v55  ;;  %vm333_vm14 = vweird.f32 %v327_v55  ;;  %v337_v62 = vand.u32 2147483647, %v327_v55 }
 0x774   :  { %v340_v0 = vor.u32 1.1754944e-38, %v339_v61  ;;  %vm338_vm0 = vcmp.eq.f32.partialorder %v337_v62, 8.507059e+37  ;;  %v1527_v62 = vld [vmem:[%s2256_s2 + $0xe] sm:$0x3] }
 0x776   :  { %363 = vperm.xlu1 %1569, %v1502_v52  }
 0x778   :  { %v1601_v56 = vpop.eup %1600 }
 0x779   :  { %v329_v57 = vmul.f32 %v1601_v56, %v327_v55  ;;  %vm334_vm13 = vweird.f32 %v1601_v56 }
 0x77a   :  { %vm335_vm15 = vmor %vm333_vm14, %vm334_vm13 }
 0x77b   :  { %v330_v58 = vsub.f32 1.0, %v329_v57 }
 0x77d   :  { %v331_v59 = vmul.f32 %v1601_v56, %v330_v58 }
 0x77f   :  { %v332_v60 = vadd.f32 %v1601_v56, %v331_v59 }
 0x781   :  { %v336_v63 = vsel %vm335_vm15, %v1601_v56, %v332_v60  ;;  %v1507_v56 = vld [vmem:[%s2256_s2 + $0x8] sm:$0x3] }
 0x782   :  { %v341_v2 = vsel %vm338_vm0, %v340_v0, %v336_v63  ;;  %v463_v58 = vsub.f32 1.0, %v1507_v56 }
 0x783   :  { %v344_v10 = vmul.f32 %v341_v2, %v1813_v9 }
 0x7e0   :  { %v347_v1 = vpop.permute.xlu1 %346 }
 0x7e1   :  { %v349_v3 = vmul.f32 %v347_v1, %v341_v2  ;;  %v821_v1 = vsub.f32 1.0, %v1527_v62 }
 0x7e3   :  { %351 = vrot.lane.b32.xlu2 %v349_v3, %s1702_s15 }
 0x7e8   :  { %v1822_v17 = vpop.permute.xlu1 %363 }
 0x7eb   :  { %376 = vperm.xlu2 %1570, %v373_v5  }
 0x83d   :  { %v352_v11 = vpop.permute.xlu2 %351 }
 0x83e   :  { %v1816_v12 = vadd.f32 %v352_v11, %v344_v10 }
 0x840   :  { %1602 = vtanh.f32 %v1816_v12  ;;  %v381_v7 = vmul.f32 %v1822_v17, %v1816_v12 }
 0x845   :  { %v1820_v14 = vpop.permute.xlu2 %376 }
 0x846   :  { %v1603_v13 = vpop.eup %1602  ;;  %v379_v18 = vmul.f32 %v1820_v14, %v290_v46  ;;  %v382_v6 = vmul.f32 %v1820_v14, %v1813_v9 }
 0x847   :  { %357 = vrot.lane.b32.xlu0 %v1603_v13, %s1701_s14 }
 0x848   :  { %v383_v11 = vadd.f32 %v382_v6, %v381_v7 }
 0x8b9   :  { %v358_v15 = vpop.permute.xlu0 %357 }
 0x8ba   :  { %v360_v16 = vmul.f32 %v358_v15, %v341_v2 }
 0x8bc   :  { %v1826_v19 = vmul.f32 %v1822_v17, %v360_v16 }
 0x8be   :  { %v1829_v20 = vadd.f32 %v379_v18, %v1826_v19 }
 0x8c0   :  { %389 = vrot.lane.b32.xlu0 %v1829_v20, %s1702_s15 }
 0x932   :  { %v390_v25 = vpop.permute.xlu0 %389 }
 0x933   :  { %1508 = vmatmul.msk.f32.vlgmr.msrb.gmra.mxu0 %vm30_vm4, %v390_v25 }
 0x934   :  { %1118 = vmatpush.msrb.mxu0 %v1836_v21 }
 0x936   :  { %1119 = vmatpush.msrb.mxu0 %v1841_v22 }
 0x938   :  { %1120 = vmatpush.msrb.mxu0 %v1848_v23 }
 0x93a   :  { %1121 = vmatpush.msrb.mxu0 %v1857_v24 }
 0x93b   :  { %767 = vmatmul.f32.vlgmr.msra.gmra.mxu0 %v1700_v4 }
 0x9b0   :  { %v410_v27 = vpop.f32.mrf.mxu0 }
 0x9b1   :  { %v413_v28 = vadd.f32 %v1506_v26, %v410_v27 }
 0x9b3   :  { %1604 = vtanh.f32 %v413_v28  ;;  %v1509_v37 = vmul.f32 -1.442695, %v413_v28 }
 0x9b8   :  { %v768_v30 = vpop.f32.mrf.mxu0 }
 0x9b9   :  { %v1605_v31 = vpop.eup %1604  ;;  %v771_v32 = vadd.f32 %v1526_v29, %v768_v30 }
 0x9ba   :  { %436 = vrot.lane.b32.xlu1 %v1605_v31, %s1701_s14 }
 0x9bb   :  { %1606 = vtanh.f32 %v771_v32  ;;  %v1528_v4 = vmul.f32 -1.442695, %v771_v32 }
 0x9bd   :  { %1608 = vpow2.f32 %v1528_v4 }
 0x9c1   :  { %v1607_v33 = vpop.eup %1606 }
 0x9c2   :  { %794 = vrot.lane.b32.xlu2 %v1607_v33, %s1701_s14 }
 0x9c3   :  { %v1609_v34 = vpop.eup %1608 }
 0x9c4   :  { %v775_v35 = vadd.f32 1.0, %v1609_v34 }
 0x9c6   :  { %1610 = vrcp.f32 %v775_v35  ;;  %vm781_vm1 = vweird.f32 %v775_v35  ;;  %v787_v44 = vand.u32 2147483648, %v775_v35  ;;  %v785_v47 = vand.u32 2147483647, %v775_v35 }
 0x9c7   :  { %1612 = vpow2.f32 %v1509_v37 }
 0x9c8   :  { %v788_v49 = vor.u32 1.1754944e-38, %v787_v44  ;;  %vm786_vm5 = vcmp.eq.f32.partialorder %v785_v47, 8.507059e+37  ;;  %v1530_v47 = vld [vmem:[%s2258_s1 + $0xc] sm:$0x3] }
 0x9cc   :  { %v1611_v38 = vpop.eup %1610 }
 0x9cd   :  { %v1613_v39 = vpop.eup %1612  ;;  %v777_v40 = vmul.f32 %v1611_v38, %v775_v35  ;;  %vm782_vm2 = vweird.f32 %v1611_v38 }
 0x9ce   :  { %v417_v41 = vadd.f32 1.0, %v1613_v39  ;;  %vm783_vm3 = vmor %vm781_vm1, %vm782_vm2 }
 0x9cf   :  { %v778_v42 = vsub.f32 1.0, %v777_v40 }
 0x9d0   :  { %1614 = vrcp.f32 %v417_v41  ;;  %v429_v60 = vand.u32 2147483648, %v417_v41  ;;  %vm423_vm7 = vweird.f32 %v417_v41  ;;  %v427_v61 = vand.u32 2147483647, %v417_v41 }
 0x9d1   :  { %v779_v43 = vmul.f32 %v1611_v38, %v778_v42  ;;  %v1511_v42 = vld [vmem:[%s2255_s0 + $0xa] sm:$0x3] }
 0x9d2   :  { %v430_v0 = vor.u32 1.1754944e-38, %v429_v60  ;;  %vm428_vm9 = vcmp.eq.f32.partialorder %v427_v61, 8.507059e+37 }
 0x9d3   :  { %v780_v46 = vadd.f32 %v1611_v38, %v779_v43 }
 0x9d5   :  { %v784_v50 = vsel %vm783_vm3, %v1611_v38, %v780_v46 }
 0x9d6   :  { %v1615_v48 = vpop.eup %1614  ;;  %v789_v53 = vsel %vm786_vm5, %v788_v49, %v784_v50 }
 0x9d7   :  { %v419_v51 = vmul.f32 %v1615_v48, %v417_v41  ;;  %vm424_vm6 = vweird.f32 %v1615_v48  ;;  %v792_v18 = vmul.f32 0.0, %v789_v53 }
 0x9d8   :  { %vm425_vm8 = vmor %vm423_vm7, %vm424_vm6 }
 0x9d9   :  { %v420_v55 = vsub.f32 1.0, %v419_v51 }
 0x9db   :  { %v421_v57 = vmul.f32 %v1615_v48, %v420_v55 }
 0x9dd   :  { %v422_v59 = vadd.f32 %v1615_v48, %v421_v57 }
 0x9df   :  { %v426_v63 = vsel %vm425_vm8, %v1615_v48, %v422_v59 }
 0x9e0   :  { %v431_v3 = vsel %vm428_vm9, %v430_v0, %v426_v63 }
 0x9e1   :  { %v434_v13 = vmul.f32 %v431_v3, %v383_v11 }
 0xa1c   :  { %v795_v52 = vpop.permute.xlu2 %794 }
 0xa1d   :  { %v797_v54 = vmul.f32 %v795_v52, %v789_v53 }
 0xa1f   :  { %799 = vrot.lane.b32.xlu1 %v797_v54, %s1702_s15 }
 0xa27   :  { %466 = vperm.xlu1 %1569, %v463_v58  }
 0xa2c   :  { %v437_v2 = vpop.permute.xlu1 %436 }
 0xa2d   :  { %v439_v5 = vmul.f32 %v437_v2, %v431_v3 }
 0xa2f   :  { %824 = vperm.xlu1 %1569, %v821_v1   ;;  %441 = vrot.lane.b32.xlu0 %v439_v5, %s1702_s15 }
 0xa37   :  { %453 = vperm.xlu0 %1571, %v1507_v56  }
 0xa3f   :  { %811 = vperm.xlu0 %1571, %v1527_v62  }
 0xa91   :  { %v800_v10 = vpop.permute.xlu1 %799 }
 0xa92   :  { %v1895_v26 = vadd.f32 %v800_v10, %v792_v18 }
 0xa99   :  { %v467_v25 = vpop.permute.xlu1 %466 }
 0xa9a   :  { %v472_v29 = vmul.f32 %v467_v25, %v383_v11  ;;  %v469_v31 = vmul.f32 %v467_v25, %v1829_v20 }
 0xaa1   :  { %v442_v15 = vpop.permute.xlu0 %441  ;;  %v825_v4 = vpop.permute.xlu1 %824 }
 0xaa2   :  { %v444_v16 = vadd.f32 %v442_v15, %v434_v13  ;;  %v1912_v38 = vmul.f32 0.0, %v825_v4 }
 0xaa4   :  { %1616 = vtanh.f32 %v444_v16 }
 0xaa5   :  { %1618 = vtanh.f32 %v1895_v26 }
 0xaa9   :  { %v454_v27 = vpop.permute.xlu0 %453 }
 0xaaa   :  { %v1617_v28 = vpop.eup %1616  ;;  %v471_v30 = vmul.f32 %v454_v27, %v444_v16 }
 0xaab   :  { %447 = vrot.lane.b32.xlu2 %v1617_v28, %s1701_s14  ;;  %v1619_v12 = vpop.eup %1618 }
 0xaac   :  { %v1899_v9 = vadd.f32 %v472_v29, %v471_v30  ;;  %v1512_v29 = vld [vmem:[%s2256_s2 + $0xa] sm:$0x3] }
 0xab1   :  { %v1910_v37 = vpop.permute.xlu0 %811 }
 0xab3   :  { %805 = vrot.lane.b32.xlu2 %v1619_v12, %s1701_s14  ;;  %v553_v12 = vsub.f32 1.0, %v1512_v29 }
 0xb05   :  { %v448_v14 = vpop.permute.xlu2 %447 }
 0xb06   :  { %v450_v17 = vmul.f32 %v448_v14, %v431_v3  ;;  %v1531_v14 = vld [vmem:[%s2256_s2 + $0xc] sm:$0x3] }
 0xb08   :  { %v1903_v32 = vmul.f32 %v454_v27, %v450_v17  ;;  %v909_v17 = vsub.f32 1.0, %v1531_v14 }
 0xb0a   :  { %v1906_v33 = vadd.f32 %v469_v31, %v1903_v32 }
 0xb0c   :  { %479 = vrot.lane.b32.xlu2 %v1906_v33, %s1702_s15 }
 0xb0d   :  { %v806_v34 = vpop.permute.xlu2 %805 }
 0xb0e   :  { %v808_v35 = vmul.f32 %v806_v34, %v789_v53  ;;  %v829_v34 = vmul.f32 %v1910_v37, %v1895_v26 }
 0xb10   :  { %v1915_v39 = vmul.f32 %v1910_v37, %v808_v35 }
 0xb12   :  { %v1919_v20 = vadd.f32 %v1912_v38, %v1915_v39 }
 0xb14   :  { %835 = vrot.lane.b32.xlu0 %v1919_v20, %s1702_s15 }
 0xb66   :  { %v480_v40 = vpop.permute.xlu2 %479 }
 0xb67   :  { %1513 = vmatmul.msk.f32.vlgmr.msrb.gmra.mxu1 %vm30_vm4, %v480_v40  ;;  %v1949_v40 = vadd.f32 %v829_v34, %v1912_v38 }
 0xb68   :  { %1207 = vmatpush.msrb.mxu1 %v1836_v21 }
 0xb6a   :  { %1208 = vmatpush.msrb.mxu1 %v1841_v22 }
 0xb6c   :  { %1209 = vmatpush.msrb.mxu1 %v1848_v23 }
 0xb6e   :  { %1210 = vmatpush.msrb.mxu1 %v1857_v24 }
 0xb86   :  { %v836_v41 = vpop.permute.xlu0 %835 }
 0xb87   :  { %1532 = vmatmul.msk.f32.vlgmr.msra.gmra.mxu1 %vm30_vm4, %v836_v41 }
 0xbe4   :  { %v500_v43 = vpop.f32.mrf.mxu1 }
 0xbe5   :  { %v503_v44 = vadd.f32 %v1511_v42, %v500_v43 }
 0xbe7   :  { %1620 = vtanh.f32 %v503_v44  ;;  %v1514_v51 = vmul.f32 -1.442695, %v503_v44 }
 0xbed   :  { %v1621_v46 = vpop.eup %1620 }
 0xbee   :  { %526 = vrot.lane.b32.xlu1 %v1621_v46, %s1701_s14 }
 0xc04   :  { %v856_v48 = vpop.f32.mrf.mxu1 }
 0xc05   :  { %v859_v49 = vadd.f32 %v1530_v47, %v856_v48 }
 0xc07   :  { %1622 = vtanh.f32 %v859_v49  ;;  %v1533_v52 = vmul.f32 -1.442695, %v859_v49 }
 0xc08   :  { %1624 = vpow2.f32 %v1514_v51 }
 0xc09   :  { %1626 = vpow2.f32 %v1533_v52 }
 0xc0d   :  { %v1623_v50 = vpop.eup %1622 }
 0xc0e   :  { %882 = vrot.lane.b32.xlu2 %v1623_v50, %s1701_s14  ;;  %v1625_v53 = vpop.eup %1624 }
 0xc0f   :  { %v507_v54 = vadd.f32 1.0, %v1625_v53  ;;  %v1627_v55 = vpop.eup %1626 }
 0xc10   :  { %v863_v56 = vadd.f32 1.0, %v1627_v55 }
 0xc11   :  { %1628 = vrcp.f32 %v507_v54  ;;  %v519_v1 = vand.u32 2147483648, %v507_v54  ;;  %vm513_vm11 = vweird.f32 %v507_v54  ;;  %v517_v2 = vand.u32 2147483647, %v507_v54 }
 0xc12   :  { %1630 = vrcp.f32 %v863_v56  ;;  %v875_v15 = vand.u32 2147483648, %v863_v56  ;;  %vm869_vm15 = vweird.f32 %v863_v56  ;;  %v873_v16 = vand.u32 2147483647, %v863_v56 }
 0xc13   :  { %v520_v6 = vor.u32 1.1754944e-38, %v519_v1  ;;  %vm518_vm13 = vcmp.eq.f32.partialorder %v517_v2, 8.507059e+37 }
 0xc14   :  { %v876_v25 = vor.u32 1.1754944e-38, %v875_v15  ;;  %vm874_vm1 = vcmp.eq.f32.partialorder %v873_v16, 8.507059e+37 }
 0xc17   :  { %v1629_v57 = vpop.eup %1628 }
 0xc18   :  { %v509_v58 = vmul.f32 %v1629_v57, %v507_v54  ;;  %v1631_v60 = vpop.eup %1630  ;;  %vm514_vm10 = vweird.f32 %v1629_v57 }
 0xc19   :  { %v865_v62 = vmul.f32 %v1631_v60, %v863_v56  ;;  %vm515_vm12 = vmor %vm513_vm11, %vm514_vm10  ;;  %vm870_vm14 = vweird.f32 %v1631_v60 }
 0xc1a   :  { %v510_v59 = vsub.f32 1.0, %v509_v58  ;;  %vm871_vm0 = vmor %vm869_vm15, %vm870_vm14 }
 0xc1b   :  { %v866_v0 = vsub.f32 1.0, %v865_v62 }
 0xc1c   :  { %v511_v61 = vmul.f32 %v1629_v57, %v510_v59 }
 0xc1d   :  { %v867_v5 = vmul.f32 %v1631_v60, %v866_v0  ;;  %v1535_v0 = vld [vmem:[%s2258_s1 + $0xa] sm:$0x3] }
 0xc1e   :  { %v512_v63 = vadd.f32 %v1629_v57, %v511_v61 }
 0xc1f   :  { %v868_v13 = vadd.f32 %v1631_v60, %v867_v5 }
 0xc20   :  { %v516_v3 = vsel %vm515_vm12, %v1629_v57, %v512_v63 }
 0xc21   :  { %v521_v10 = vsel %vm518_vm13, %v520_v6, %v516_v3  ;;  %v872_v18 = vsel %vm871_vm0, %v1631_v60, %v868_v13  ;;  %v1516_v60 = vld [vmem:[%s2255_s0 + $0xc] sm:$0x3] }
 0xc22   :  { %v877_v28 = vsel %vm874_vm1, %v876_v25, %v872_v18  ;;  %v524_v31 = vmul.f32 %v521_v10, %v1899_v9 }
 0xc23   :  { %v880_v41 = vmul.f32 %v877_v28, %v1949_v40 }
 0xc60   :  { %v527_v7 = vpop.permute.xlu1 %526 }
 0xc61   :  { %v529_v11 = vmul.f32 %v527_v7, %v521_v10 }
 0xc63   :  { %531 = vrot.lane.b32.xlu0 %v529_v11, %s1702_s15 }
 0xc68   :  { %v883_v27 = vpop.permute.xlu2 %882 }
 0xc69   :  { %v885_v30 = vmul.f32 %v883_v27, %v877_v28 }
 0xc6b   :  { %887 = vrot.lane.b32.xlu1 %v885_v30, %s1702_s15  ;;  %543 = vperm.xlu0 %1571, %v1512_v29  }
 0xc73   :  { %556 = vperm.xlu1 %1569, %v553_v12   ;;  %899 = vperm.xlu0 %1571, %v1531_v14  }
 0xc7b   :  { %912 = vperm.xlu1 %1569, %v909_v17  }
 0xcd5   :  { %v532_v4 = vpop.permute.xlu0 %531 }
 0xcd6   :  { %v534_v35 = vadd.f32 %v532_v4, %v524_v31 }
 0xcd8   :  { %1632 = vtanh.f32 %v534_v35 }
 0xcdd   :  { %v888_v42 = vpop.permute.xlu1 %887  ;;  %v544_v46 = vpop.permute.xlu0 %543 }
 0xcde   :  { %v1633_v43 = vpop.eup %1632  ;;  %v1952_v44 = vadd.f32 %v888_v42, %v880_v41  ;;  %v561_v49 = vmul.f32 %v544_v46, %v534_v35 }
 0xcdf   :  { %537 = vrot.lane.b32.xlu2 %v1633_v43, %s1701_s14 }
 0xce0   :  { %1634 = vtanh.f32 %v1952_v44 }
 0xce5   :  { %v557_v47 = vpop.permute.xlu1 %556  ;;  %v1970_v56 = vpop.permute.xlu0 %899 }
 0xce6   :  { %v1635_v48 = vpop.eup %1634  ;;  %v562_v26 = vmul.f32 %v557_v47, %v1899_v9  ;;  %v559_v51 = vmul.f32 %v557_v47, %v1906_v33 }
 0xce7   :  { %893 = vrot.lane.b32.xlu2 %v1635_v48, %s1701_s14 }
 0xce8   :  { %v1958_v37 = vadd.f32 %v562_v26, %v561_v49 }
 0xced   :  { %v1968_v54 = vpop.permute.xlu1 %912 }
 0xcee   :  { %v915_v57 = vmul.f32 %v1968_v54, %v1919_v20 }
 0xd39   :  { %v538_v38 = vpop.permute.xlu2 %537 }
 0xd3a   :  { %v540_v50 = vmul.f32 %v538_v38, %v521_v10  ;;  %v1517_v38 = vld [vmem:[%s2256_s2 + $0xc] sm:$0x3] }
 0xd3c   :  { %v1961_v52 = vmul.f32 %v544_v46, %v540_v50 }
 0xd3e   :  { %v1964_v53 = vadd.f32 %v559_v51, %v1961_v52  ;;  %v643_v51 = vsub.f32 1.0, %v1517_v38 }
 0xd40   :  { %569 = vrot.lane.b32.xlu2 %v1964_v53, %s1702_s15 }
 0xd41   :  { %v894_v55 = vpop.permute.xlu2 %893 }
 0xd42   :  { %v896_v9 = vmul.f32 %v894_v55, %v877_v28  ;;  %v1536_v55 = vld [vmem:[%s2256_s2 + $0xa] sm:$0x3] }
 0xd44   :  { %v1975_v58 = vmul.f32 %v1970_v56, %v896_v9  ;;  %v998_v9 = vsub.f32 1.0, %v1536_v55 }
 0xd46   :  { %v1978_v33 = vadd.f32 %v915_v57, %v1975_v58 }
 0xd48   :  { %924 = vrot.lane.b32.xlu0 %v1978_v33, %s1702_s15 }
 0xd9a   :  { %v570_v59 = vpop.permute.xlu2 %569 }
 0xd9b   :  { %1518 = vmatmul.msk.f32.vlgmr.msrb.gmra.mxu2 %vm30_vm4, %v570_v59 }
 0xd9c   :  { %1296 = vmatpush.msrb.mxu2 %v1836_v21 }
 0xd9e   :  { %1297 = vmatpush.msrb.mxu2 %v1841_v22 }
 0xda0   :  { %1298 = vmatpush.msrb.mxu2 %v1848_v23 }
 0xda2   :  { %1299 = vmatpush.msrb.mxu2 %v1857_v24 }
 0xdba   :  { %v925_v20 = vpop.permute.xlu0 %924 }
 0xdbb   :  { %1537 = vmatmul.msk.f32.vlgmr.msra.gmra.mxu2 %vm30_vm4, %v925_v20  ;;  %v918_v20 = vmul.f32 %v1968_v54, %v1949_v40 }
 0xe1e   :  { %v590_v61 = vpop.f32.mrf.mxu2 }
 0xe1f   :  { %v593_v62 = vadd.f32 %v1516_v60, %v590_v61  ;;  %v917_v61 = vmul.f32 %v1970_v56, %v1952_v44 }
 0xe21   :  { %1636 = vtanh.f32 %v593_v62  ;;  %v1519_v5 = vmul.f32 -1.442695, %v593_v62  ;;  %v2009_v62 = vadd.f32 %v918_v20, %v917_v61 }
 0xe27   :  { %v1637_v63 = vpop.eup %1636 }
 0xe28   :  { %616 = vrot.lane.b32.xlu1 %v1637_v63, %s1701_s14 }
 0xe3e   :  { %v945_v1 = vpop.f32.mrf.mxu2 }
 0xe3f   :  { %v948_v2 = vadd.f32 %v1535_v0, %v945_v1 }
 0xe41   :  { %1638 = vtanh.f32 %v948_v2  ;;  %v1538_v6 = vmul.f32 -1.442695, %v948_v2 }
 0xe42   :  { %1640 = vpow2.f32 %v1519_v5 }
 0xe43   :  { %1642 = vpow2.f32 %v1538_v6 }
 0xe47   :  { %v1639_v3 = vpop.eup %1638 }
 0xe48   :  { %971 = vrot.lane.b32.xlu2 %v1639_v3, %s1701_s14  ;;  %v1641_v7 = vpop.eup %1640 }
 0xe49   :  { %v597_v10 = vadd.f32 1.0, %v1641_v7  ;;  %v1643_v11 = vpop.eup %1642 }
 0xe4a   :  { %v952_v13 = vadd.f32 1.0, %v1643_v11 }
 0xe4b   :  { %1644 = vrcp.f32 %v597_v10  ;;  %v609_v12 = vand.u32 2147483648, %v597_v10  ;;  %vm603_vm3 = vweird.f32 %v597_v10  ;;  %v607_v14 = vand.u32 2147483647, %v597_v10 }
 0xe4c   :  { %1646 = vrcp.f32 %v952_v13  ;;  %v964_v43 = vand.u32 2147483648, %v952_v13  ;;  %vm958_vm8 = vweird.f32 %v952_v13  ;;  %v962_v46 = vand.u32 2147483647, %v952_v13 }
 0xe4d   :  { %v610_v4 = vor.u32 1.1754944e-38, %v609_v12  ;;  %vm608_vm6 = vcmp.eq.f32.partialorder %v607_v14, 8.507059e+37 }
 0xe4e   :  { %v965_v48 = vor.u32 1.1754944e-38, %v964_v43  ;;  %vm963_vm10 = vcmp.eq.f32.partialorder %v962_v46, 8.507059e+37 }
 0xe51   :  { %v1645_v15 = vpop.eup %1644 }
 0xe52   :  { %v599_v16 = vmul.f32 %v1645_v15, %v597_v10  ;;  %v1647_v25 = vpop.eup %1646  ;;  %vm604_vm2 = vweird.f32 %v1645_v15 }
 0xe53   :  { %v954_v28 = vmul.f32 %v1647_v25, %v952_v13  ;;  %vm605_vm5 = vmor %vm603_vm3, %vm604_vm2  ;;  %vm959_vm7 = vweird.f32 %v1647_v25 }
 0xe54   :  { %v600_v18 = vsub.f32 1.0, %v599_v16  ;;  %vm960_vm9 = vmor %vm958_vm8, %vm959_vm7 }
 0xe55   :  { %v955_v30 = vsub.f32 1.0, %v954_v28 }
 0xe56   :  { %v601_v27 = vmul.f32 %v1645_v15, %v600_v18 }
 0xe57   :  { %v956_v31 = vmul.f32 %v1647_v25, %v955_v30  ;;  %v1540_v30 = vld [vmem:[%s2258_s1 + $0x8] sm:$0x3] }
 0xe58   :  { %v602_v29 = vadd.f32 %v1645_v15, %v601_v27 }
 0xe59   :  { %v957_v42 = vadd.f32 %v1647_v25, %v956_v31 }
 0xe5a   :  { %v606_v17 = vsel %vm605_vm5, %v1645_v15, %v602_v29 }
 0xe5b   :  { %v611_v35 = vsel %vm608_vm6, %v610_v4, %v606_v17  ;;  %v961_v47 = vsel %vm960_vm9, %v1647_v25, %v957_v42 }
 0xe5c   :  { %v966_v26 = vsel %vm963_vm10, %v965_v48, %v961_v47  ;;  %v614_v57 = vmul.f32 %v611_v35, %v1958_v37 }
 0xe5d   :  { %v969_v63 = vmul.f32 %v966_v26, %v2009_v62 }
 0xe9a   :  { %v617_v34 = vpop.permute.xlu1 %616 }
 0xe9b   :  { %v619_v41 = vmul.f32 %v617_v34, %v611_v35 }
 0xe9d   :  { %621 = vrot.lane.b32.xlu0 %v619_v41, %s1702_s15 }
 0xea2   :  { %v972_v49 = vpop.permute.xlu2 %971 }
 0xea3   :  { %v974_v50 = vmul.f32 %v972_v49, %v966_v26 }
 0xea5   :  { %976 = vrot.lane.b32.xlu1 %v974_v50, %s1702_s15  ;;  %633 = vperm.xlu0 %1571, %v1517_v38  }
 0xead   :  { %646 = vperm.xlu1 %1569, %v643_v51   ;;  %988 = vperm.xlu0 %1571, %v1536_v55  }
 0xeb5   :  { %1001 = vperm.xlu1 %1569, %v998_v9  }
 0xf0f   :  { %v622_v59 = vpop.permute.xlu0 %621 }
 0xf10   :  { %v624_v60 = vadd.f32 %v622_v59, %v614_v57 }
 0xf12   :  { %1648 = vtanh.f32 %v624_v60 }
 0xf17   :  { %v977_v0 = vpop.permute.xlu1 %976  ;;  %v634_v3 = vpop.permute.xlu0 %633 }
 0xf18   :  { %v1649_v1 = vpop.eup %1648  ;;  %v2012_v2 = vadd.f32 %v977_v0, %v969_v63  ;;  %v651_v54 = vmul.f32 %v634_v3, %v624_v60 }
 0xf19   :  { %627 = vrot.lane.b32.xlu2 %v1649_v1, %s1701_s14 }
 0xf1a   :  { %1650 = vtanh.f32 %v2012_v2 }
 0xf1f   :  { %v647_v5 = vpop.permute.xlu1 %646 }
 0xf20   :  { %v1651_v40 = vpop.eup %1650  ;;  %v652_v6 = vmul.f32 %v647_v5, %v1958_v37  ;;  %v649_v10 = vmul.f32 %v647_v5, %v1964_v53  ;;  %v989_v37 = vpop.permute.xlu0 %988 }
 0xf21   :  { %982 = vrot.lane.b32.xlu2 %v1651_v40, %s1701_s14  ;;  %v1006_v51 = vmul.f32 %v989_v37, %v2012_v2  ;;  %v1545_v2 = vld [vmem:[%s2258_s1 + $0x6] sm:$0x3] }
 0xf22   :  { %v2018_v44 = vadd.f32 %v652_v6, %v651_v54 }
 0xf27   :  { %v1002_v15 = vpop.permute.xlu1 %1001 }
 0xf28   :  { %v1004_v25 = vmul.f32 %v1002_v15, %v1978_v33  ;;  %v1007_v50 = vmul.f32 %v1002_v15, %v2009_v62 }
 0xf2a   :  { %v1008_v55 = vadd.f32 %v1007_v50, %v1006_v51  ;;  %v1550_v50 = vld [vmem:[%s2258_s1 + $0x4] sm:$0x3] }
 0xf73   :  { %v628_v56 = vpop.permute.xlu2 %627 }
 0xf74   :  { %v630_v7 = vmul.f32 %v628_v56, %v611_v35  ;;  %v1546_v56 = vld [vmem:[%s2256_s2 + $0x6] sm:$0x3] }
 0xf76   :  { %v2021_v11 = vmul.f32 %v634_v3, %v630_v7 }
 0xf78   :  { %v2024_v13 = vadd.f32 %v649_v10, %v2021_v11 }
 0xf7a   :  { %659 = vrot.lane.b32.xlu2 %v2024_v13, %s1702_s15 }
 0xf7b   :  { %v983_v16 = vpop.permute.xlu2 %982 }
 0xf7c   :  { %v985_v18 = vmul.f32 %v983_v16, %v966_v26 }
 0xf7e   :  { %v2029_v27 = vmul.f32 %v989_v37, %v985_v18 }
 0xf80   :  { %v1005_v28 = vadd.f32 %v1004_v25, %v2029_v27 }
 0xf82   :  { %1013 = vrot.lane.b32.xlu0 %v1005_v28, %s1702_s15 }
 0xfd4   :  { %v660_v53 = vpop.permute.xlu2 %659 }
 0xfd5   :  { %1523 = vmatmul.msk.f32.vlgmr.msrb.gmra.mxu3 %vm30_vm4, %v660_v53 }
 0xfd6   :  { %1384 = vmatpush.msrb.mxu3 %v1836_v21  ;;  %v1541_v21 = vld [vmem:[%s2256_s2 + $0x8] sm:$0x3] }
 0xfd7   :  { %v1087_v38 = vsub.f32 1.0, %v1541_v21 }
 0xfd8   :  { %1385 = vmatpush.msrb.mxu3 %v1841_v22 }
 0xfda   :  { %1386 = vmatpush.msrb.mxu3 %v1848_v23 }
 0xfdc   :  { %1387 = vmatpush.msrb.mxu3 %v1857_v24 }
 0xff4   :  { %v1014_v29 = vpop.permute.xlu0 %1013 }
 0xff5   :  { %1542 = vmatmul.msk.f32.vlgmr.msra.gmra.mxu3 %vm30_vm4, %v1014_v29 }
0x1058   :  { %v2039_v33 = vpop.f32.mrf.mxu3 }
0x1078   :  { %v1034_v12 = vpop.f32.mrf.mxu3 }
0x1079   :  { %v1037_v14 = vadd.f32 %v1540_v30, %v1034_v12 }
0x107b   :  { %1652 = vtanh.f32 %v1037_v14  ;;  %v1543_v22 = vmul.f32 -1.442695, %v1037_v14 }
0x107d   :  { %1654 = vpow2.f32 %v1543_v22  ;;  %v1176_v22 = vsub.f32 1.0, %v1546_v56 }
0x1081   :  { %v1653_v17 = vpop.eup %1652 }
0x1082   :  { %1060 = vrot.lane.b32.xlu1 %v1653_v17, %s1701_s14 }
0x1083   :  { %v1655_v23 = vpop.eup %1654 }
0x1084   :  { %v1041_v24 = vadd.f32 1.0, %v1655_v23 }
0x1086   :  { %1656 = vrcp.f32 %v1041_v24  ;;  %v1053_v42 = vand.u32 2147483648, %v1041_v24  ;;  %vm1047_vm12 = vweird.f32 %v1041_v24  ;;  %v1051_v43 = vand.u32 2147483647, %v1041_v24 }
0x1088   :  { %v1054_v47 = vor.u32 1.1754944e-38, %v1053_v42  ;;  %vm1052_vm14 = vcmp.eq.f32.partialorder %v1051_v43, 8.507059e+37 }
0x108a   :  { %1077 = vperm.xlu1 %1569, %v1541_v21  }
0x108c   :  { %v1657_v31 = vpop.eup %1656 }
0x108d   :  { %v1043_v4 = vmul.f32 %v1657_v31, %v1041_v24  ;;  %vm1048_vm11 = vweird.f32 %v1657_v31 }
0x108e   :  { %vm1049_vm13 = vmor %vm1047_vm12, %vm1048_vm11 }
0x108f   :  { %v1044_v34 = vsub.f32 1.0, %v1043_v4 }
0x1091   :  { %v1045_v35 = vmul.f32 %v1657_v31, %v1044_v34 }
0x1093   :  { %v1046_v41 = vadd.f32 %v1657_v31, %v1045_v35 }
0x1095   :  { %v1050_v46 = vsel %vm1049_vm13, %v1657_v31, %v1046_v41 }
0x1096   :  { %v1055_v49 = vsel %vm1052_vm14, %v1054_v47, %v1050_v46 }
0x1097   :  { %v1058_v9 = vmul.f32 %v1055_v49, %v1008_v55 }
0x10f4   :  { %v1061_v48 = vpop.permute.xlu1 %1060 }
0x10f5   :  { %v1063_v26 = vmul.f32 %v1061_v48, %v1055_v49 }
0x10f7   :  { %1065 = vrot.lane.b32.xlu2 %v1063_v26, %s1702_s15 }
0x10fc   :  { %v1078_v0 = vpop.permute.xlu1 %1077 }
0x10ff   :  { %1090 = vperm.xlu2 %1570, %v1087_v38  }
0x1151   :  { %v1066_v57 = vpop.permute.xlu2 %1065 }
0x1152   :  { %v1068_v59 = vadd.f32 %v1066_v57, %v1058_v9  ;;  %v1551_v57 = vld [vmem:[%s2256_s2 + $0x4] sm:$0x3] }
0x1154   :  { %1658 = vtanh.f32 %v1068_v59  ;;  %v1095_v24 = vmul.f32 %v1078_v0, %v1068_v59 }
0x1159   :  { %v1091_v60 = vpop.permute.xlu2 %1090 }
0x115a   :  { %v1659_v20 = vpop.eup %1658  ;;  %v1093_v1 = vmul.f32 %v1091_v60, %v1005_v28  ;;  %v1096_v23 = vmul.f32 %v1091_v60, %v1008_v55 }
0x115b   :  { %1071 = vrot.lane.b32.xlu0 %v1659_v20, %s1701_s14 }
0x115c   :  { %v1097_v31 = vadd.f32 %v1096_v23, %v1095_v24  ;;  %v1555_v24 = vld [vmem:[%s2258_s1 + $0x2] sm:$0x3] }
0x11cd   :  { %v1072_v61 = vpop.permute.xlu0 %1071 }
0x11ce   :  { %v1074_v63 = vmul.f32 %v1072_v61, %v1055_v49 }
0x11d0   :  { %v2052_v3 = vmul.f32 %v1078_v0, %v1074_v63 }
0x11d2   :  { %v1094_v5 = vadd.f32 %v1093_v1, %v2052_v3 }
0x11d4   :  { %1102 = vrot.lane.b32.xlu0 %v1094_v5, %s1702_s15 }
0x1246   :  { %v1103_v62 = vpop.permute.xlu0 %1102 }
0x1247   :  { %1547 = vmatmul.msk.f32.vlgmr.msrb.gmra.mxu0 %vm30_vm4, %v1103_v62 }
0x12c4   :  { %v1123_v40 = vpop.f32.mrf.mxu0 }
0x12c5   :  { %v1126_v54 = vadd.f32 %v1545_v2, %v1123_v40 }
0x12c7   :  { %1660 = vtanh.f32 %v1126_v54  ;;  %v1548_v7 = vmul.f32 -1.442695, %v1126_v54 }
0x12c9   :  { %1662 = vpow2.f32 %v1548_v7 }
0x12cd   :  { %v1661_v6 = vpop.eup %1660 }
0x12ce   :  { %1149 = vrot.lane.b32.xlu1 %v1661_v6, %s1701_s14 }
0x12cf   :  { %v1663_v10 = vpop.eup %1662 }
0x12d0   :  { %v1130_v15 = vadd.f32 1.0, %v1663_v10  ;;  %v1265_v10 = vsub.f32 1.0, %v1551_v57 }
0x12d2   :  { %1664 = vrcp.f32 %v1130_v15  ;;  %v1142_v53 = vand.u32 2147483648, %v1130_v15  ;;  %vm1136_vm0 = vweird.f32 %v1130_v15  ;;  %v1140_v29 = vand.u32 2147483647, %v1130_v15 }
0x12d4   :  { %v1143_v12 = vor.u32 1.1754944e-38, %v1142_v53  ;;  %vm1141_vm2 = vcmp.eq.f32.partialorder %v1140_v29, 8.507059e+37 }
0x12d6   :  { %1166 = vperm.xlu1 %1569, %v1546_v56  }
0x12d8   :  { %v1665_v16 = vpop.eup %1664 }
0x12d9   :  { %v1132_v18 = vmul.f32 %v1665_v16, %v1130_v15  ;;  %vm1137_vm15 = vweird.f32 %v1665_v16 }
0x12da   :  { %vm1138_vm1 = vmor %vm1136_vm0, %vm1137_vm15  ;;  %vm102_vm0 = vcmask 254976  }
0x12db   :  { %v1133_v37 = vsub.f32 1.0, %v1132_v18 }
0x12dd   :  { %v1134_v25 = vmul.f32 %v1665_v16, %v1133_v37 }
0x12df   :  { %v1135_v28 = vadd.f32 %v1665_v16, %v1134_v25 }
0x12e1   :  { %v1139_v30 = vsel %vm1138_vm1, %v1665_v16, %v1135_v28 }
0x12e2   :  { %v1144_v17 = vsel %vm1141_vm2, %v1143_v12, %v1139_v30 }
0x12e3   :  { %v1147_v4 = vmul.f32 %v1144_v17, %v1097_v31 }
0x1340   :  { %v1150_v14 = vpop.permute.xlu1 %1149 }
0x1341   :  { %v1152_v21 = vmul.f32 %v1150_v14, %v1144_v17 }
0x1343   :  { %1154 = vrot.lane.b32.xlu2 %v1152_v21, %s1702_s15 }
0x1348   :  { %v1167_v47 = vpop.permute.xlu1 %1166 }
0x134b   :  { %1179 = vperm.xlu2 %1570, %v1176_v22  }
0x139d   :  { %v1155_v34 = vpop.permute.xlu2 %1154 }
0x139e   :  { %v1157_v35 = vadd.f32 %v1155_v34, %v1147_v4 }
0x13a0   :  { %1666 = vtanh.f32 %v1157_v35  ;;  %v1184_v16 = vmul.f32 %v1167_v47, %v1157_v35  ;;  %v1521_v35 = vld [vmem:[%s2255_s0 + $0xe] sm:$0x3] }
0x13a5   :  { %v1180_v42 = vpop.permute.xlu2 %1179 }
0x13a6   :  { %v1667_v41 = vpop.eup %1666  ;;  %v1182_v48 = vmul.f32 %v1180_v42, %v1094_v5  ;;  %v1185_v15 = vmul.f32 %v1180_v42, %v1097_v31  ;;  %v1556_v42 = vld [vmem:[%s2256_s2 + $0x2] sm:$0x3] }
0x13a7   :  { %1160 = vrot.lane.b32.xlu0 %v1667_v41, %s1701_s14  ;;  %v683_v41 = vadd.f32 %v1521_v35, %v2039_v33  ;;  %v1522_v35 = vld [vmem:[%s2256_s2 + $0xe] sm:$0x3] }
0x13a8   :  { %v1186_v18 = vadd.f32 %v1185_v15, %v1184_v16 }
0x1419   :  { %v1161_v43 = vpop.permute.xlu0 %1160 }
0x141a   :  { %v1163_v46 = vmul.f32 %v1161_v43, %v1144_v17 }
0x141c   :  { %v2066_v49 = vmul.f32 %v1167_v47, %v1163_v46 }
0x141e   :  { %v1183_v26 = vadd.f32 %v1182_v48, %v2066_v49 }
0x1420   :  { %1191 = vrot.lane.b32.xlu0 %v1183_v26, %s1702_s15 }
0x1492   :  { %v1192_v38 = vpop.permute.xlu0 %1191 }
0x1493   :  { %1552 = vmatmul.msk.f32.vlgmr.msrb.gmra.mxu1 %vm30_vm4, %v1192_v38 }
0x1510   :  { %v1212_v51 = vpop.f32.mrf.mxu1 }
0x1511   :  { %v1215_v55 = vadd.f32 %v1550_v50, %v1212_v51 }
0x1513   :  { %1668 = vtanh.f32 %v1215_v55  ;;  %v1553_v59 = vmul.f32 -1.442695, %v1215_v55 }
0x1515   :  { %1670 = vpow2.f32 %v1553_v59 }
0x1519   :  { %v1669_v9 = vpop.eup %1668 }
0x151a   :  { %1238 = vrot.lane.b32.xlu1 %v1669_v9, %s1701_s14 }
0x151b   :  { %v1671_v20 = vpop.eup %1670 }
0x151c   :  { %v1219_v60 = vadd.f32 1.0, %v1671_v20 }
0x151e   :  { %1672 = vrcp.f32 %v1219_v60  ;;  %v1231_v62 = vand.u32 2147483648, %v1219_v60  ;;  %vm1225_vm5 = vweird.f32 %v1219_v60  ;;  %v1229_v2 = vand.u32 2147483647, %v1219_v60 }
0x1520   :  { %v1232_v54 = vor.u32 1.1754944e-38, %v1231_v62  ;;  %vm1230_vm7 = vcmp.eq.f32.partialorder %v1229_v2, 8.507059e+37 }
0x1522   :  { %1255 = vperm.xlu1 %1569, %v1551_v57  }
0x1524   :  { %v1673_v61 = vpop.eup %1672 }
0x1525   :  { %v1221_v63 = vmul.f32 %v1673_v61, %v1219_v60  ;;  %vm1226_vm3 = vweird.f32 %v1673_v61 }
0x1526   :  { %vm1227_vm6 = vmor %vm1225_vm5, %vm1226_vm3 }
0x1527   :  { %v1222_v0 = vsub.f32 1.0, %v1221_v63  ;;  %v1354_v63 = vsub.f32 1.0, %v1556_v42 }
0x1529   :  { %v1223_v1 = vmul.f32 %v1673_v61, %v1222_v0 }
0x152b   :  { %v1224_v5 = vadd.f32 %v1673_v61, %v1223_v1 }
0x152d   :  { %v1228_v40 = vsel %vm1227_vm6, %v1673_v61, %v1224_v5 }
0x152e   :  { %v1233_v56 = vsel %vm1230_vm7, %v1232_v54, %v1228_v40 }
0x152f   :  { %v1236_v37 = vmul.f32 %v1233_v56, %v1186_v18 }
0x158c   :  { %v1239_v6 = vpop.permute.xlu1 %1238 }
0x158d   :  { %v1241_v7 = vmul.f32 %v1239_v6, %v1233_v56  ;;  %v1524_v6 = vmul.f32 -1.442695, %v683_v41 }
0x158f   :  { %1243 = vrot.lane.b32.xlu2 %v1241_v7, %s1702_s15 }
0x1594   :  { %v1256_v14 = vpop.permute.xlu1 %1255 }
0x1597   :  { %1268 = vperm.xlu2 %1570, %v1265_v10  }
0x15e9   :  { %v1244_v25 = vpop.permute.xlu2 %1243 }
0x15ea   :  { %v1246_v28 = vadd.f32 %v1244_v25, %v1236_v37 }
0x15ec   :  { %1674 = vtanh.f32 %v1246_v28  ;;  %v1273_v1 = vmul.f32 %v1256_v14, %v1246_v28 }
0x15f1   :  { %v1269_v29 = vpop.permute.xlu2 %1268 }
0x15f2   :  { %v1675_v53 = vpop.eup %1674  ;;  %v1271_v17 = vmul.f32 %v1269_v29, %v1183_v26  ;;  %v1274_v0 = vmul.f32 %v1269_v29, %v1186_v18 }
0x15f3   :  { %1249 = vrot.lane.b32.xlu0 %v1675_v53, %s1701_s14 }
0x15f4   :  { %v1275_v5 = vadd.f32 %v1274_v0, %v1273_v1 }
0x1665   :  { %v1250_v30 = vpop.permute.xlu0 %1249 }
0x1666   :  { %v1252_v12 = vmul.f32 %v1250_v30, %v1233_v56 }
0x1668   :  { %v2080_v21 = vmul.f32 %v1256_v14, %v1252_v12 }
0x166a   :  { %v2083_v22 = vadd.f32 %v1271_v17, %v2080_v21 }
0x166c   :  { %1280 = vrot.lane.b32.xlu0 %v2083_v22, %s1702_s15 }
0x16de   :  { %v1281_v23 = vpop.permute.xlu0 %1280 }
0x16df   :  { %1557 = vmatmul.msk.f32.vlgmr.msrb.gmra.mxu2 %vm30_vm4, %v1281_v23 }
0x1762   :  { %v1301_v31 = vpop.f32.mrf.mxu2 }
0x1763   :  { %v1304_v4 = vadd.f32 %v1555_v24, %v1301_v31 }
0x1765   :  { %1676 = vtanh.f32 %v1304_v4  ;;  %v1558_v46 = vmul.f32 -1.442695, %v1304_v4 }
0x1766   :  { %1678 = vtanh.f32 %v683_v41  ;;  %v1366_v41 = vld [vmem:[%s2256_s2] sm:$0x3] }
0x1767   :  { %1680 = vpow2.f32 %v1558_v46 }
0x176b   :  { %v1677_v34 = vpop.eup %1676 }
0x176c   :  { %1327 = vrot.lane.b32.xlu1 %v1677_v34, %s1701_s14  ;;  %v1679_v43 = vpop.eup %1678 }
0x176d   :  { %v1681_v47 = vpop.eup %1680 }
0x176e   :  { %v1308_v48 = vadd.f32 1.0, %v1681_v47 }
0x1770   :  { %1682 = vrcp.f32 %v1308_v48  ;;  %v1320_v33 = vand.u32 2147483648, %v1308_v48  ;;  %vm1314_vm9 = vweird.f32 %v1308_v48  ;;  %v1318_v9 = vand.u32 2147483647, %v1308_v48 }
0x1772   :  { %v1321_v59 = vor.u32 1.1754944e-38, %v1320_v33  ;;  %vm1319_vm11 = vcmp.eq.f32.partialorder %v1318_v9, 8.507059e+37 }
0x1774   :  { %1344 = vperm.xlu1 %1569, %v1556_v42   ;;  %v1441_v42 = vsub.f32 1.0, %v1366_v41 }
0x1776   :  { %v1683_v26 = vpop.eup %1682 }
0x1777   :  { %v1310_v38 = vmul.f32 %v1683_v26, %v1308_v48  ;;  %vm1315_vm8 = vweird.f32 %v1683_v26 }
0x1778   :  { %vm1316_vm10 = vmor %vm1314_vm9, %vm1315_vm8 }
0x1779   :  { %v1311_v50 = vsub.f32 1.0, %v1310_v38 }
0x177b   :  { %v1312_v51 = vmul.f32 %v1683_v26, %v1311_v50 }
0x177c   :  { %706 = vrot.lane.b32.xlu1 %v1679_v43, %s1701_s14 }
0x177d   :  { %v1313_v55 = vadd.f32 %v1683_v26, %v1312_v51 }
0x177f   :  { %v1317_v57 = vsel %vm1316_vm10, %v1683_v26, %v1313_v55  ;;  %v1365_v55 = vld [vmem:[%s2258_s1] sm:$0x3] }
0x1780   :  { %v1322_v60 = vsel %vm1319_vm11, %v1321_v59, %v1317_v57 }
0x1781   :  { %v1325_v62 = vmul.f32 %v1322_v60, %v1275_v5 }
0x17de   :  { %v1328_v20 = vpop.permute.xlu1 %1327 }
0x17df   :  { %v1330_v61 = vmul.f32 %v1328_v20, %v1322_v60 }
0x17e1   :  { %1332 = vrot.lane.b32.xlu2 %v1330_v61, %s1702_s15 }
0x17e6   :  { %v1345_v37 = vpop.permute.xlu1 %1344 }
0x17e9   :  { %1357 = vperm.xlu2 %1570, %v1354_v63  }
0x17ee   :  { %v707_v31 = vpop.permute.xlu1 %706 }
0x183b   :  { %v1333_v2 = vpop.permute.xlu2 %1332 }
0x183c   :  { %v1335_v40 = vadd.f32 %v1333_v2, %v1325_v62 }
0x183e   :  { %1684 = vtanh.f32 %v1335_v40  ;;  %v1362_v26 = vmul.f32 %v1345_v37, %v1335_v40 }
0x183f   :  { %1686 = vpow2.f32 %v1524_v6 }
0x1843   :  { %v1358_v25 = vpop.permute.xlu2 %1357 }
0x1844   :  { %v1685_v54 = vpop.eup %1684  ;;  %v1360_v29 = vmul.f32 %v1358_v25, %v2083_v22  ;;  %v1363_v48 = vmul.f32 %v1358_v25, %v1275_v5 }
0x1845   :  { %1338 = vrot.lane.b32.xlu0 %v1685_v54, %s1701_s14  ;;  %v1687_v56 = vpop.eup %1686 }
0x1846   :  { %v687_v7 = vadd.f32 1.0, %v1687_v56  ;;  %v1364_v38 = vadd.f32 %v1363_v48, %v1362_v26 }
0x1848   :  { %1688 = vrcp.f32 %v687_v7  ;;  %v699_v17 = vand.u32 2147483648, %v687_v7  ;;  %vm693_vm13 = vweird.f32 %v687_v7  ;;  %v697_v23 = vand.u32 2147483647, %v687_v7 }
0x184a   :  { %v700_v4 = vor.u32 1.1754944e-38, %v699_v17  ;;  %vm698_vm15 = vcmp.eq.f32.partialorder %v697_v23, 8.507059e+37 }
0x184e   :  { %v1689_v10 = vpop.eup %1688 }
0x184f   :  { %v689_v15 = vmul.f32 %v1689_v10, %v687_v7  ;;  %vm694_vm12 = vweird.f32 %v1689_v10 }
0x1850   :  { %vm695_vm14 = vmor %vm693_vm13, %vm694_vm12 }
0x1851   :  { %v690_v16 = vsub.f32 1.0, %v689_v15 }
0x1853   :  { %v691_v28 = vmul.f32 %v1689_v10, %v690_v16 }
0x1855   :  { %v692_v12 = vadd.f32 %v1689_v10, %v691_v28 }
0x1857   :  { %v696_v24 = vsel %vm695_vm14, %v1689_v10, %v692_v12 }
0x1858   :  { %v2110_v34 = vsel %vm698_vm15, %v700_v4, %v696_v24 }
0x1859   :  { %v709_v22 = vmul.f32 %v707_v31, %v2110_v34 }
0x18b7   :  { %v1339_v18 = vpop.permute.xlu0 %1338 }
0x18b8   :  { %v1341_v53 = vmul.f32 %v1339_v18, %v1322_v60 }
0x18ba   :  { %v2103_v30 = vmul.f32 %v1345_v37, %v1341_v53  ;;  %v733_v37 = vsub.f32 1.0, %v1522_v35 }
0x18bc   :  { %v2106_v14 = vadd.f32 %v1360_v29, %v2103_v30 }
0x18be   :  { %1368 = vrot.lane.b32.xlu0 %v2106_v14, %s1702_s15 }
0x18c6   :  { %711 = vrot.lane.b32.xlu0 %v709_v22, %s1702_s15 }
0x18ce   :  { %188 = vrot.lane.b32.xlu0 %v1786_v8, %s1702_s15 }
0x18d6   :  { %723 = vperm.xlu0 %1571, %v1522_v35  }
0x18de   :  { %1444 = vperm.xlu0 %1571, %v1441_v42  }
0x18e6   :  { %458 = vrot.lane.b32.xlu0 %v1903_v32, %s1702_s15 }
0x1930   :  { %v1369_v43 = vpop.permute.xlu0 %1368 }
0x1931   :  { %1560 = vmatmul.msk.f32.vlgmr.msrb.gmra.mxu3 %vm30_vm4, %v1369_v43 }
0x1938   :  { %v712_v46 = vpop.permute.xlu0 %711 }
0x1940   :  { %v189_v8 = vpop.permute.xlu0 %188 }
0x1941   :  { %1495 = vst.msk [vmem:[%s2259_s5 + $0x2] sm:$0x3] %vm102_vm0, %v189_v8 }
0x1948   :  { %v2129_v47 = vpop.permute.xlu0 %723 }
0x1950   :  { %v2131_v50 = vpop.permute.xlu0 %1444 }
0x1951   :  { %v1450_v32 = vmul.f32 %v2131_v50, %v1364_v38 }
0x1958   :  { %v459_v51 = vpop.permute.xlu0 %458 }
0x1959   :  { %1510 = vst.msk [vmem:[%s2259_s5 + $0x8] sm:$0x3] %vm102_vm0, %v459_v51 }
0x19b4   :  { %v1389_v33 = vpop.f32.mrf.mxu3 }
0x19b5   :  { %v1392_v9 = vadd.f32 %v1389_v33, %v1365_v55 }
0x19b7   :  { %1690 = vtanh.f32 %v1392_v9  ;;  %v1561_v59 = vmul.f32 -1.442695, %v1392_v9 }
0x19b9   :  { %1692 = vpow2.f32 %v1561_v59 }
0x19bd   :  { %v1691_v57 = vpop.eup %1690 }
0x19be   :  { %1415 = vrot.lane.b32.xlu2 %v1691_v57, %s1701_s14 }
0x19bf   :  { %v1693_v20 = vpop.eup %1692 }
0x19c0   :  { %v1396_v60 = vadd.f32 1.0, %v1693_v20 }
0x19c2   :  { %1694 = vrcp.f32 %v1396_v60  ;;  %v1408_v62 = vand.u32 2147483648, %v1396_v60  ;;  %vm1402_vm1 = vweird.f32 %v1396_v60  ;;  %v1406_v2 = vand.u32 2147483647, %v1396_v60 }
0x19c4   :  { %v1409_v54 = vor.u32 1.1754944e-38, %v1408_v62  ;;  %vm1407_vm3 = vcmp.eq.f32.partialorder %v1406_v2, 8.507059e+37 }
0x19c6   :  { %99 = vrot.lane.b32.xlu2 %v1772_v36, %s1702_s15  ;;  %v704_v36 = vmul.f32 %v2110_v34, %v2018_v44 }
0x19c8   :  { %v1695_v61 = vpop.eup %1694  ;;  %v714_v6 = vadd.f32 %v712_v46, %v704_v36 }
0x19c9   :  { %v1398_v63 = vmul.f32 %v1695_v61, %v1396_v60  ;;  %vm1403_vm4 = vweird.f32 %v1695_v61 }
0x19ca   :  { %vm1404_vm2 = vmor %vm1402_vm1, %vm1403_vm4  ;;  %1696 = vtanh.f32 %v714_v6 }
0x19cb   :  { %v1399_v0 = vsub.f32 1.0, %v1398_v63 }
0x19cd   :  { %v1400_v1 = vmul.f32 %v1695_v61, %v1399_v0 }
0x19ce   :  { %1432 = vperm.xlu2 %1570, %v1366_v41  }
0x19cf   :  { %v1401_v5 = vadd.f32 %v1695_v61, %v1400_v1 }
0x19d0   :  { %v1697_v16 = vpop.eup %1696 }
0x19d1   :  { %v1405_v40 = vsel %vm1404_vm2, %v1695_v61, %v1401_v5 }
0x19d2   :  { %v1410_v7 = vsel %vm1407_vm3, %v1409_v54, %v1405_v40 }
0x19d3   :  { %v1413_v25 = vmul.f32 %v1410_v7, %v1364_v38 }
0x1a18   :  { %v1416_v56 = vpop.permute.xlu2 %1415 }
0x1a19   :  { %v1418_v10 = vmul.f32 %v1416_v56, %v1410_v7 }
0x1a1b   :  { %1420 = vrot.lane.b32.xlu1 %v1418_v10, %s1702_s15 }
0x1a20   :  { %v100_v15 = vpop.permute.xlu2 %99 }
0x1a21   :  { %103 = vst.msk [vmem:[%s2259_s5] sm:$0x3] %vm102_vm0, %v100_v15 }
0x1a23   :  { %717 = vrot.lane.b32.xlu1 %v1697_v16, %s1701_s14 }
0x1a28   :  { %v1433_v53 = vpop.permute.xlu2 %1432 }
0x1a2b   :  { %736 = vperm.xlu1 %1569, %v733_v37  }
0x1a33   :  { %278 = vrot.lane.b32.xlu1 %v1800_v45, %s1702_s15 }
0x1a3b   :  { %548 = vrot.lane.b32.xlu1 %v1961_v52, %s1702_s15 }
0x1a43   :  { %816 = vrot.lane.b32.xlu1 %v1915_v39, %s1702_s15 }
0x1a4b   :  { %1082 = vrot.lane.b32.xlu1 %v2052_v3, %s1702_s15 }
0x1a53   :  { %1349 = vrot.lane.b32.xlu1 %v2103_v30, %s1702_s15  ;;  %v741_v30 = vmul.f32 %v2129_v47, %v714_v6 }
0x1a8d   :  { %v1421_v18 = vpop.permute.xlu1 %1420 }
0x1a8e   :  { %v1423_v28 = vadd.f32 %v1421_v18, %v1413_v25 }
0x1a90   :  { %1698 = vtanh.f32 %v1423_v28  ;;  %v1449_v29 = vmul.f32 %v1433_v53, %v1423_v28 }
0x1a92   :  { %v1451_v12 = vadd.f32 %v1450_v32, %v1449_v29 }
0x1a95   :  { %v718_v45 = vpop.permute.xlu1 %717 }
0x1a96   :  { %v1699_v17 = vpop.eup %1698  ;;  %v720_v52 = vmul.f32 %v718_v45, %v2110_v34  ;;  %v1447_v34 = vmul.f32 %v2131_v50, %v2106_v14 }
0x1a97   :  { %1426 = vrot.lane.b32.xlu2 %v1699_v17, %s1701_s14 }
0x1a98   :  { %v726_v39 = vmul.f32 %v2129_v47, %v720_v52 }
0x1a9a   :  { %728 = vrot.lane.b32.xlu0 %v726_v39, %s1702_s15 }
0x1a9d   :  { %v737_v3 = vpop.permute.xlu1 %736 }
0x1a9e   :  { %v742_v23 = vmul.f32 %v737_v3, %v2018_v44  ;;  %v739_v44 = vmul.f32 %v737_v3, %v2024_v13 }
0x1a9f   :  { %368 = vrot.lane.b32.xlu2 %v1826_v19, %s1702_s15 }
0x1aa0   :  { %v743_v24 = vadd.f32 %v742_v23, %v741_v30  ;;  %v740_v19 = vadd.f32 %v739_v44, %v726_v39 }
0x1aa2   :  { %993 = vrot.lane.b32.xlu0 %v2029_v27, %s1702_s15 }
0x1aa5   :  { %v279_v31 = vpop.permute.xlu1 %278 }
0x1aa6   :  { %1500 = vst.msk [vmem:[%s2259_s5 + $0x4] sm:$0x3] %vm102_vm0, %v279_v31 }
0x1aa7   :  { %638 = vrot.lane.b32.xlu2 %v2021_v11, %s1702_s15 }
0x1aaa   :  { %1260 = vrot.lane.b32.xlu0 %v2080_v21, %s1702_s15 }
0x1aad   :  { %v549_v4 = vpop.permute.xlu1 %548 }
0x1aae   :  { %1515 = vst.msk [vmem:[%s2259_s5 + $0xa] sm:$0x3] %vm102_vm0, %v549_v4 }
0x1aaf   :  { %904 = vrot.lane.b32.xlu2 %v1975_v58, %s1702_s15 }
0x1ab2   :  { %1453 = vrot.lane.b32.xlu0 %v740_v19, %s1702_s15 }
0x1ab5   :  { %v817_v27 = vpop.permute.xlu1 %816 }
0x1ab6   :  { %1529 = vst.msk [vmem:[%s2260_s6 + $0xe] sm:$0x3] %vm102_vm0, %v817_v27 }
0x1ab7   :  { %1171 = vrot.lane.b32.xlu2 %v2066_v49, %s1702_s15 }
0x1aba   :  { %1469 = vrot.lane.b32.xlu0 %v1451_v12, %s1704_s28 }
0x1abd   :  { %v1083_v11 = vpop.permute.xlu1 %1082 }
0x1abe   :  { %1544 = vst.msk [vmem:[%s2260_s6 + $0x8] sm:$0x3] %vm102_vm0, %v1083_v11 }
0x1ac5   :  { %v1350_v58 = vpop.permute.xlu1 %1349 }
0x1ac6   :  { %1559 = vst.msk [vmem:[%s2260_s6 + $0x2] sm:$0x3] %vm102_vm0, %v1350_v58 }
0x1af1   :  { %v1427_v13 = vpop.permute.xlu2 %1426 }
0x1af2   :  { %v1429_v21 = vmul.f32 %v1427_v13, %v1410_v7 }
0x1af4   :  { %v1435_v49 = vmul.f32 %v1433_v53, %v1429_v21 }
0x1af6   :  { %1437 = vrot.lane.b32.xlu2 %v1435_v49, %s1702_s15  ;;  %v1448_v22 = vadd.f32 %v1447_v34, %v1435_v49 }
0x1af8   :  { %1458 = vrot.lane.b32.xlu1 %v1448_v22, %s1702_s15 }
0x1af9   :  { %v369_v35 = vpop.permute.xlu2 %368 }
0x1afa   :  { %1505 = vst.msk [vmem:[%s2259_s5 + $0x6] sm:$0x3] %vm102_vm0, %v369_v35 }
0x1afe   :  { %1464 = vrot.lane.b32.xlu2 %v743_v24, %s1704_s28 }
0x1b01   :  { %v639_v41 = vpop.permute.xlu2 %638 }
0x1b02   :  { %1520 = vst.msk [vmem:[%s2259_s5 + $0xc] sm:$0x3] %vm102_vm0, %v639_v41 }
0x1b09   :  { %v905_v14 = vpop.permute.xlu2 %904 }
0x1b0a   :  { %1534 = vst.msk [vmem:[%s2260_s6 + $0xc] sm:$0x3] %vm102_vm0, %v905_v14 }
0x1b0c   :  { %v729_v42 = vpop.permute.xlu0 %728 }
0x1b0d   :  { %1525 = vst.msk [vmem:[%s2259_s5 + $0xe] sm:$0x3] %vm102_vm0, %v729_v42 }
0x1b11   :  { %v1172_v43 = vpop.permute.xlu2 %1171 }
0x1b12   :  { %1549 = vst.msk [vmem:[%s2260_s6 + $0x6] sm:$0x3] %vm102_vm0, %v1172_v43 }
0x1b14   :  { %v994_v46 = vpop.permute.xlu0 %993 }
0x1b15   :  { %1539 = vst.msk [vmem:[%s2260_s6 + $0xa] sm:$0x3] %vm102_vm0, %v994_v46 }
0x1b1c   :  { %v1261_v8 = vpop.permute.xlu0 %1260 }
0x1b1d   :  { %1554 = vst.msk [vmem:[%s2260_s6 + $0x4] sm:$0x3] %vm102_vm0, %v1261_v8 }
0x1b24   :  { %v1454_v47 = vpop.permute.xlu0 %1453 }
0x1b25   :  { %1456 = vst.msk [vmem:[%s2261_s7] sm:$0x3] %vm102_vm0, %v1454_v47 }
0x1b2c   :  { %v1470_v48 = vpop.permute.xlu0 %1469 }
0x1b2d   :  { %1563 = vst.msk [vmem:[%s2262_s8 + $0x2] sm:$0x3] %vm102_vm0, %v1470_v48 }
0x1b50   :  { %v1438_v26 = vpop.permute.xlu2 %1437 }
0x1b51   :  { %1440 = vst.msk [vmem:[%s2260_s6] sm:$0x3] %vm102_vm0, %v1438_v26 }
0x1b58   :  { %v1465_v38 = vpop.permute.xlu2 %1464 }
0x1b59   :  { %1467 = vst.msk [vmem:[%s2262_s8] sm:$0x3] %vm102_vm0, %v1465_v38 }
0x1b6a   :  { %v1459_v50 = vpop.permute.xlu1 %1458 }
0x1b6b   :  { %1562 = vst.msk [vmem:[%s2261_s7 + $0x2] sm:$0x3] %vm102_vm0, %v1459_v50 }

</bundles_post_ra>
